<compile_context>
chip_gen: v6e
topology: v6e:2x2x1
jax: 0.10.0
libtpu: 0.0.40
codegen_flags: <defaults>
</compile_context>

<pallas_src>
import functools
import math

import jax
import jax.numpy as jnp
from jax.experimental import pallas as pl
from jax.experimental.pallas import tpu as pltpu


# ----------------------------------------------------------------------------
# Fused kernel: grid = (batch_tiles, T).  For each batch tile, time step 0
# copies x0 into the carried VMEM state; every later step integrates one output
# interval with n_sub RK4 substeps; every step writes the state to y[ti].
# ----------------------------------------------------------------------------
def _cnode_rk4_kernel(n_sub, scal_ref, x0_ref, wt_ref, b_ref, y_ref, state_ref):
    # scal_ref  : SMEM (T,)        [gate, dt_1, dt_2, ..., dt_{T-1}]
    # x0_ref    : VMEM (Bt, N)     initial state for this batch tile
    # wt_ref    : VMEM (N, N)      W^T of the fitness Linear layer (resident)
    # b_ref     : VMEM (1, N)      bias of the fitness Linear layer (resident)
    # y_ref     : VMEM (Bt, N)     output slot for time index ti (time dim squeezed)
    # state_ref : VMEM (Bt, N)     carried state (scratch, persists across grid)
    ti = pl.program_id(1)

    @pl.when(ti == 0)
    def _():
        state_ref[...] = x0_ref[...]

    @pl.when(ti > 0)
    def _():
        gate = scal_ref[0]
        dt = scal_ref[ti] / float(n_sub)
        half_dt = 0.5 * dt
        dt_6 = dt * (1.0 / 6.0)
        dt_3 = dt * (1.0 / 3.0)

        wt = wt_ref[...]
        # Hoist the (1, N) -> (Bt, N) bias broadcast out of dxdt (JAX does not
        # CSE broadcast_in_dim; otherwise it is re-emitted 4 * n_sub times).
        bias = jnp.broadcast_to(b_ref[...], state_ref.shape)

        def dxdt(x):
            # f(x) = x @ W^T + b  (nn.Linear)
            fx = jnp.dot(x, wt, preferred_element_type=jnp.float32) + bias
            # xT_fx = sum(x * fx, dim=-1, keepdim=True)
            s = jnp.sum(x * fx, axis=-1, keepdims=True)
            # gate * x * (fx - xT_fx)
            return gate * (x * (fx - s))

        def rk4_step(_, x):
            # Incremental accumulation keeps <= 3 full (Bt, N) tensors live.
            k1 = dxdt(x)
            acc = x + dt_6 * k1
            k2 = dxdt(x + half_dt * k1)
            acc = acc + dt_3 * k2
            k3 = dxdt(x + half_dt * k2)
            acc = acc + dt_3 * k3
            k4 = dxdt(x + dt * k3)
            return acc + dt_6 * k4

        state_ref[...] = jax.lax.fori_loop(
            0, n_sub, rk4_step, state_ref[...], unroll=True)

    # Lane-dense write of the trajectory (slot 0 gets x0, slot ti gets x(t_ti)).
    y_ref[...] = state_ref[...]


# ----------------------------------------------------------------------------
# Module-level forward: y = odeint(func, x, t)  ->  (T, B, N)
# ----------------------------------------------------------------------------
def cnode_fnfitness_forward(t, x, W, b, gate, *, n_sub=8, b_tile=None):
    x = jnp.asarray(x, jnp.float32)
    B, N = x.shape
    T = int(t.shape[0])

    w_t = jnp.asarray(W, jnp.float32).T               # (N, N)
    b2d = jnp.asarray(b, jnp.float32).reshape(1, -1)  # (1, N)
    t = jnp.asarray(t, jnp.float32)

    # scal[0] = gate, scal[i] = t[i] - t[i-1] for i >= 1  (total length T)
    gate_arr = jnp.asarray(gate, jnp.float32).reshape(1)
    scal = jnp.concatenate([gate_arr, t[1:] - t[:-1]]) if T > 1 else gate_arr

    if b_tile is None:
        b_tile = B if B <= 256 else 256
    assert B % b_tile == 0, "batch must divide evenly into batch tiles"
    assert b_tile == B or b_tile % 8 == 0, "batch tile must be a multiple of 8"
    nb = B // b_tile

    # Rough VMEM budget (resident W^T + double-buffered x0/y tiles + scratch).
    vmem_est = 4 * (2 * N * N + 7 * b_tile * N + 4 * N) + (4 << 20)
    vmem_limit = int(min(max(vmem_est, 32 << 20), 64 << 20))

    kernel = functools.partial(_cnode_rk4_kernel, n_sub)
    return pl.pallas_call(
        kernel,
        out_shape=jax.ShapeDtypeStruct((T, B, N), jnp.float32),
        grid=(nb, T),
        in_specs=[
            pl.BlockSpec(memory_space=pltpu.MemorySpace.SMEM),   # scal (gate, dts)
            pl.BlockSpec((b_tile, N), lambda bi, ti: (bi, 0)),   # x0 tile
            pl.BlockSpec((N, N), lambda bi, ti: (0, 0)),         # W^T (resident)
            pl.BlockSpec((1, N), lambda bi, ti: (0, 0)),         # bias (resident)
        ],
        out_specs=pl.BlockSpec((None, b_tile, N), lambda bi, ti: (ti, bi, 0)),
        scratch_shapes=[pltpu.VMEM((b_tile, N), jnp.float32)],
        compiler_params=pltpu.CompilerParams(
            dimension_semantics=("parallel", "arbitrary"),
            vmem_limit_bytes=vmem_limit,
        ),
    )(scal, x, w_t, b2d)


# ----------------------------------------------------------------------------
# Pure-JAX reference (same RK4 discretization) for a sanity check.
# ----------------------------------------------------------------------------
def _reference_forward(t, x, W, b, gate, *, n_sub=8):
    W = jnp.asarray(W, jnp.float32)
    b = jnp.asarray(b, jnp.float32)
    x = jnp.asarray(x, jnp.float32)

    def dxdt(x):
        fx = x @ W.T + b
        s = jnp.sum(x * fx, axis=-1, keepdims=True)
        return gate * (x * (fx - s))

    ys = [x]
    xk = x
    for i in range(t.shape[0] - 1):
        dt = (t[i + 1] - t[i]) / n_sub
        for _ in range(n_sub):
            k1 = dxdt(xk)
            acc = xk + (dt / 6.0) * k1
            k2 = dxdt(xk + 0.5 * dt * k1)
            acc = acc + (dt / 3.0) * k2
            k3 = dxdt(xk + 0.5 * dt * k2)
            acc = acc + (dt / 3.0) * k3
            k4 = dxdt(xk + dt * k3)
            xk = acc + (dt / 6.0) * k4
        ys.append(xk)
    return jnp.stack(ys, axis=0)


if __name__ == "__main__":
    B, N, T = 8, 128, 5           # batch, features (species, lane-aligned), time points
    key = jax.random.PRNGKey(0)
    kx, kw, kb = jax.random.split(key, 3)

    # Deterministic parameters for f = nn.Linear(N, N) (synthetic init).
    bound = 1.0 / math.sqrt(N)
    W = jax.random.uniform(kw, (N, N), jnp.float32, -bound, bound)
    b = jax.random.uniform(kb, (N,), jnp.float32, -bound, bound)

    # identity_gate=False -> gate is a buffer fixed at 1.0
    # (identity_gate=True would be a learnable scalar initialized to 0.0).
    gate = jnp.float32(1.0)

    # Compositional state: rows of x live on the simplex.
    x0 = jax.nn.softmax(jax.random.normal(kx, (B, N), jnp.float32), axis=-1)
    t = jnp.linspace(0.0, 1.0, T, dtype=jnp.float32)

    y = cnode_fnfitness_forward(t, x0, W, b, gate, n_sub=8)
    y = jax.block_until_ready(y)

    y_ref = _reference_forward(t, x0, W, b, gate, n_sub=8)
    assert y.shape == (T, B, N)
    assert jnp.allclose(y, y_ref, atol=2e-5, rtol=1e-4), "mismatch vs reference"

    print("KERNEL_OK")
</pallas_src>

<mosaic_0001>
module attributes {stable_mosaic.version = 11 : i64} {
  func.func @_cnode_rk4_kernel(%arg0: i32, %arg1: i32, %arg2: memref<5xf32, #tpu.memory_space<smem>>, %arg3: memref<8x128xf32, #tpu.memory_space<vmem>>, %arg4: memref<128x128xf32, #tpu.memory_space<vmem>>, %arg5: memref<1x128xf32, #tpu.memory_space<vmem>>, %arg6: memref<1x8x128xf32, #tpu.memory_space<vmem>>, %arg7: memref<8x128xf32, #tpu.memory_space<vmem>>) attributes {dimension_semantics = [#tpu.dimension_semantics<parallel>, #tpu.dimension_semantics<arbitrary>], iteration_bounds = array<i64: 1, 5>, scalar_prefetch = 0 : i64, scratch_operands = 1 : i64, tpu.core_type = #tpu.core_type<tc>, window_params = [{transform_indices = @transform_0, window_bounds = array<i64: 5>}, {transform_indices = @transform_1, window_bounds = array<i64: 8, 128>}, {pipeline_mode = #tpu.pipeline_mode<synchronous>, transform_indices = @transform_2, window_bounds = array<i64: 128, 128>}, {pipeline_mode = #tpu.pipeline_mode<synchronous>, transform_indices = @transform_3, window_bounds = array<i64: 1, 128>}, {transform_indices = @transform_4, window_bounds = array<i64: 1, 8, 128>}]} {
    %c0_i32 = arith.constant 0 : i32
    %0 = arith.cmpi eq, %arg1, %c0_i32 : i32
    %1 = arith.extui %0 : i1 to i32
    %c0_i32_0 = arith.constant 0 : i32
    %2 = arith.cmpi ne, %1, %c0_i32_0 : i32
    scf.if %2 {
      %c0_7 = arith.constant 0 : index
      %c0_8 = arith.constant 0 : index
      %10 = vector.load %arg3[%c0_7, %c0_8] : memref<8x128xf32, #tpu.memory_space<vmem>>, vector<8x128xf32>
      %c0_9 = arith.constant 0 : index
      %c0_10 = arith.constant 0 : index
      %11 = vector.load %arg7[%c0_9, %c0_10] : memref<8x128xf32, #tpu.memory_space<vmem>>, vector<8x128xf32>
      tpu.vector_store %arg7[%c0_9, %c0_10], %10 {strides = array<i32>} : memref<8x128xf32, #tpu.memory_space<vmem>>, vector<8x128xf32>,
    } else {
    }
    %c0_i32_1 = arith.constant 0 : i32
    %3 = arith.cmpi sgt, %arg1, %c0_i32_1 : i32
    %4 = arith.extui %3 : i1 to i32
    %c0_i32_2 = arith.constant 0 : i32
    %5 = arith.cmpi ne, %4, %c0_i32_2 : i32
    scf.if %5 {
      %c0_7 = arith.constant 0 : index
      %10 = memref.load %arg2[%c0_7] : memref<5xf32, #tpu.memory_space<smem>>
      %11 = arith.index_cast %arg1 : i32 to index
      %12 = memref.load %arg2[%11] : memref<5xf32, #tpu.memory_space<smem>>
      %cst = arith.constant 8.000000e+00 : f32
      %13 = arith.divf %12, %cst : f32
      %cst_8 = arith.constant 5.000000e-01 : f32
      %14 = arith.mulf %cst_8, %13 : f32
      %cst_9 = arith.constant 0.166666672 : f32
      %15 = arith.mulf %13, %cst_9 : f32
      %cst_10 = arith.constant 0.333333343 : f32
      %16 = arith.mulf %13, %cst_10 : f32
      %c0_11 = arith.constant 0 : index
      %c0_12 = arith.constant 0 : index
      %17 = vector.load %arg4[%c0_11, %c0_12] : memref<128x128xf32, #tpu.memory_space<vmem>>, vector<128x128xf32>
      %c0_13 = arith.constant 0 : index
      %c0_14 = arith.constant 0 : index
      %18 = vector.load %arg5[%c0_13, %c0_14] : memref<1x128xf32, #tpu.memory_space<vmem>>, vector<1x128xf32>
      %19 = vector.shape_cast %18 : vector<1x128xf32> to vector<1x128xf32>
      %20 = vector.broadcast %19 : vector<1x128xf32> to vector<8x128xf32>
      %c0_15 = arith.constant 0 : index
      %c0_16 = arith.constant 0 : index
      %21 = vector.load %arg7[%c0_15, %c0_16] : memref<8x128xf32, #tpu.memory_space<vmem>>, vector<8x128xf32>
      %c0_i32_17 = arith.constant 0 : i32
      %cst_18 = arith.constant dense<0.000000e+00> : vector<8x128xf32>
      %22 = tpu.matmul %21, %17, %cst_18 {dimension_numbers = #tpu.dot_dimension_numbers<[1], [0], [0], [1], [0, 0, 1, 1], [], []>} : vector<8x128xf32>, vector<128x128xf32>, vector<8x128xf32> -> vector<8x128xf32>
      %23 = arith.addf %22, %20 : vector<8x128xf32>
      %24 = arith.mulf %21, %23 : vector<8x128xf32>
      %cst_19 = arith.constant dense<0.000000e+00> : vector<8xf32>
      %25 = vector.multi_reduction <add>, %24, %cst_19 [1] : vector<8x128xf32> to vector<8xf32>
      %26 = vector.shape_cast %25 : vector<8xf32> to vector<8x1xf32>
      %27 = vector.broadcast %26 : vector<8x1xf32> to vector<8x128xf32>
      %28 = arith.subf %23, %27 : vector<8x128xf32>
      %29 = arith.mulf %21, %28 : vector<8x128xf32>
      %30 = vector.broadcast %10 : f32 to vector<8x128xf32>
      %31 = arith.mulf %30, %29 : vector<8x128xf32>
      %32 = vector.broadcast %15 : f32 to vector<8x128xf32>
      %33 = arith.mulf %32, %31 : vector<8x128xf32>
      %34 = arith.addf %21, %33 : vector<8x128xf32>
      %35 = vector.broadcast %14 : f32 to vector<8x128xf32>
      %36 = arith.mulf %35, %31 : vector<8x128xf32>
      %37 = arith.addf %21, %36 : vector<8x128xf32>
      %cst_20 = arith.constant dense<0.000000e+00> : vector<8x128xf32>
      %38 = tpu.matmul %37, %17, %cst_20 {dimension_numbers = #tpu.dot_dimension_numbers<[1], [0], [0], [1], [0, 0, 1, 1], [], []>} : vector<8x128xf32>, vector<128x128xf32>, vector<8x128xf32> -> vector<8x128xf32>
      %39 = arith.addf %38, %20 : vector<8x128xf32>
      %40 = arith.mulf %37, %39 : vector<8x128xf32>
      %cst_21 = arith.constant dense<0.000000e+00> : vector<8xf32>
      %41 = vector.multi_reduction <add>, %40, %cst_21 [1] : vector<8x128xf32> to vector<8xf32>
      %42 = vector.shape_cast %41 : vector<8xf32> to vector<8x1xf32>
      %43 = vector.broadcast %42 : vector<8x1xf32> to vector<8x128xf32>
      %44 = arith.subf %39, %43 : vector<8x128xf32>
      %45 = arith.mulf %37, %44 : vector<8x128xf32>
      %46 = vector.broadcast %10 : f32 to vector<8x128xf32>
      %47 = arith.mulf %46, %45 : vector<8x128xf32>
      %48 = vector.broadcast %16 : f32 to vector<8x128xf32>
      %49 = arith.mulf %48, %47 : vector<8x128xf32>
      %50 = arith.addf %34, %49 : vector<8x128xf32>
      %51 = vector.broadcast %14 : f32 to vector<8x128xf32>
      %52 = arith.mulf %51, %47 : vector<8x128xf32>
      %53 = arith.addf %21, %52 : vector<8x128xf32>
      %cst_22 = arith.constant dense<0.000000e+00> : vector<8x128xf32>
      %54 = tpu.matmul %53, %17, %cst_22 {dimension_numbers = #tpu.dot_dimension_numbers<[1], [0], [0], [1], [0, 0, 1, 1], [], []>} : vector<8x128xf32>, vector<128x128xf32>, vector<8x128xf32> -> vector<8x128xf32>
      %55 = arith.addf %54, %20 : vector<8x128xf32>
      %56 = arith.mulf %53, %55 : vector<8x128xf32>
      %cst_23 = arith.constant dense<0.000000e+00> : vector<8xf32>
      %57 = vector.multi_reduction <add>, %56, %cst_23 [1] : vector<8x128xf32> to vector<8xf32>
      %58 = vector.shape_cast %57 : vector<8xf32> to vector<8x1xf32>
      %59 = vector.broadcast %58 : vector<8x1xf32> to vector<8x128xf32>
      %60 = arith.subf %55, %59 : vector<8x128xf32>
      %61 = arith.mulf %53, %60 : vector<8x128xf32>
      %62 = vector.broadcast %10 : f32 to vector<8x128xf32>
      %63 = arith.mulf %62, %61 : vector<8x128xf32>
      %64 = vector.broadcast %16 : f32 to vector<8x128xf32>
      %65 = arith.mulf %64, %63 : vector<8x128xf32>
      %66 = arith.addf %50, %65 : vector<8x128xf32>
      %67 = vector.broadcast %13 : f32 to vector<8x128xf32>
      %68 = arith.mulf %67, %63 : vector<8x128xf32>
      %69 = arith.addf %21, %68 : vector<8x128xf32>
      %cst_24 = arith.constant dense<0.000000e+00> : vector<8x128xf32>
      %70 = tpu.matmul %69, %17, %cst_24 {dimension_numbers = #tpu.dot_dimension_numbers<[1], [0], [0], [1], [0, 0, 1, 1], [], []>} : vector<8x128xf32>, vector<128x128xf32>, vector<8x128xf32> -> vector<8x128xf32>
      %71 = arith.addf %70, %20 : vector<8x128xf32>
      %72 = arith.mulf %69, %71 : vector<8x128xf32>
      %cst_25 = arith.constant dense<0.000000e+00> : vector<8xf32>
      %73 = vector.multi_reduction <add>, %72, %cst_25 [1] : vector<8x128xf32> to vector<8xf32>
      %74 = vector.shape_cast %73 : vector<8xf32> to vector<8x1xf32>
      %75 = vector.broadcast %74 : vector<8x1xf32> to vector<8x128xf32>
      %76 = arith.subf %71, %75 : vector<8x128xf32>
      %77 = arith.mulf %69, %76 : vector<8x128xf32>
      %78 = vector.broadcast %10 : f32 to vector<8x128xf32>
      %79 = arith.mulf %78, %77 : vector<8x128xf32>
      %80 = vector.broadcast %15 : f32 to vector<8x128xf32>
      %81 = arith.mulf %80, %79 : vector<8x128xf32>
      %82 = arith.addf %66, %81 : vector<8x128xf32>
      %c1_i32 = arith.constant 1 : i32
      %cst_26 = arith.constant dense<0.000000e+00> : vector<8x128xf32>
      %83 = tpu.matmul %82, %17, %cst_26 {dimension_numbers = #tpu.dot_dimension_numbers<[1], [0], [0], [1], [0, 0, 1, 1], [], []>} : vector<8x128xf32>, vector<128x128xf32>, vector<8x128xf32> -> vector<8x128xf32>
      %84 = arith.addf %83, %20 : vector<8x128xf32>
      %85 = arith.mulf %82, %84 : vector<8x128xf32>
      %cst_27 = arith.constant dense<0.000000e+00> : vector<8xf32>
      %86 = vector.multi_reduction <add>, %85, %cst_27 [1] : vector<8x128xf32> to vector<8xf32>
      %87 = vector.shape_cast %86 : vector<8xf32> to vector<8x1xf32>
      %88 = vector.broadcast %87 : vector<8x1xf32> to vector<8x128xf32>
      %89 = arith.subf %84, %88 : vector<8x128xf32>
      %90 = arith.mulf %82, %89 : vector<8x128xf32>
      %91 = vector.broadcast %10 : f32 to vector<8x128xf32>
      %92 = arith.mulf %91, %90 : vector<8x128xf32>
      %93 = vector.broadcast %15 : f32 to vector<8x128xf32>
      %94 = arith.mulf %93, %92 : vector<8x128xf32>
      %95 = arith.addf %82, %94 : vector<8x128xf32>
      %96 = vector.broadcast %14 : f32 to vector<8x128xf32>
      %97 = arith.mulf %96, %92 : vector<8x128xf32>
      %98 = arith.addf %82, %97 : vector<8x128xf32>
      %cst_28 = arith.constant dense<0.000000e+00> : vector<8x128xf32>
      %99 = tpu.matmul %98, %17, %cst_28 {dimension_numbers = #tpu.dot_dimension_numbers<[1], [0], [0], [1], [0, 0, 1, 1], [], []>} : vector<8x128xf32>, vector<128x128xf32>, vector<8x128xf32> -> vector<8x128xf32>
      %100 = arith.addf %99, %20 : vector<8x128xf32>
      %101 = arith.mulf %98, %100 : vector<8x128xf32>
      %cst_29 = arith.constant dense<0.000000e+00> : vector<8xf32>
      %102 = vector.multi_reduction <add>, %101, %cst_29 [1] : vector<8x128xf32> to vector<8xf32>
      %103 = vector.shape_cast %102 : vector<8xf32> to vector<8x1xf32>
      %104 = vector.broadcast %103 : vector<8x1xf32> to vector<8x128xf32>
      %105 = arith.subf %100, %104 : vector<8x128xf32>
      %106 = arith.mulf %98, %105 : vector<8x128xf32>
      %107 = vector.broadcast %10 : f32 to vector<8x128xf32>
      %108 = arith.mulf %107, %106 : vector<8x128xf32>
      %109 = vector.broadcast %16 : f32 to vector<8x128xf32>
      %110 = arith.mulf %109, %108 : vector<8x128xf32>
      %111 = arith.addf %95, %110 : vector<8x128xf32>
      %112 = vector.broadcast %14 : f32 to vector<8x128xf32>
      %113 = arith.mulf %112, %108 : vector<8x128xf32>
      %114 = arith.addf %82, %113 : vector<8x128xf32>
      %cst_30 = arith.constant dense<0.000000e+00> : vector<8x128xf32>
      %115 = tpu.matmul %114, %17, %cst_30 {dimension_numbers = #tpu.dot_dimension_numbers<[1], [0], [0], [1], [0, 0, 1, 1], [], []>} : vector<8x128xf32>, vector<128x128xf32>, vector<8x128xf32> -> vector<8x128xf32>
      %116 = arith.addf %115, %20 : vector<8x128xf32>
      %117 = arith.mulf %114, %116 : vector<8x128xf32>
      %cst_31 = arith.constant dense<0.000000e+00> : vector<8xf32>
      %118 = vector.multi_reduction <add>, %117, %cst_31 [1] : vector<8x128xf32> to vector<8xf32>
      %119 = vector.shape_cast %118 : vector<8xf32> to vector<8x1xf32>
      %120 = vector.broadcast %119 : vector<8x1xf32> to vector<8x128xf32>
      %121 = arith.subf %116, %120 : vector<8x128xf32>
      %122 = arith.mulf %114, %121 : vector<8x128xf32>
      %123 = vector.broadcast %10 : f32 to vector<8x128xf32>
      %124 = arith.mulf %123, %122 : vector<8x128xf32>
      %125 = vector.broadcast %16 : f32 to vector<8x128xf32>
      %126 = arith.mulf %125, %124 : vector<8x128xf32>
      %127 = arith.addf %111, %126 : vector<8x128xf32>
      %128 = vector.broadcast %13 : f32 to vector<8x128xf32>
      %129 = arith.mulf %128, %124 : vector<8x128xf32>
      %130 = arith.addf %82, %129 : vector<8x128xf32>
      %cst_32 = arith.constant dense<0.000000e+00> : vector<8x128xf32>
      %131 = tpu.matmul %130, %17, %cst_32 {dimension_numbers = #tpu.dot_dimension_numbers<[1], [0], [0], [1], [0, 0, 1, 1], [], []>} : vector<8x128xf32>, vector<128x128xf32>, vector<8x128xf32> -> vector<8x128xf32>
      %132 = arith.addf %131, %20 : vector<8x128xf32>
      %133 = arith.mulf %130, %132 : vector<8x128xf32>
      %cst_33 = arith.constant dense<0.000000e+00> : vector<8xf32>
      %134 = vector.multi_reduction <add>, %133, %cst_33 [1] : vector<8x128xf32> to vector<8xf32>
      %135 = vector.shape_cast %134 : vector<8xf32> to vector<8x1xf32>
      %136 = vector.broadcast %135 : vector<8x1xf32> to vector<8x128xf32>
      %137 = arith.subf %132, %136 : vector<8x128xf32>
      %138 = arith.mulf %130, %137 : vector<8x128xf32>
      %139 = vector.broadcast %10 : f32 to vector<8x128xf32>
      %140 = arith.mulf %139, %138 : vector<8x128xf32>
      %141 = vector.broadcast %15 : f32 to vector<8x128xf32>
      %142 = arith.mulf %141, %140 : vector<8x128xf32>
      %143 = arith.addf %127, %142 : vector<8x128xf32>
      %c2_i32 = arith.constant 2 : i32
      %cst_34 = arith.constant dense<0.000000e+00> : vector<8x128xf32>
      %144 = tpu.matmul %143, %17, %cst_34 {dimension_numbers = #tpu.dot_dimension_numbers<[1], [0], [0], [1], [0, 0, 1, 1], [], []>} : vector<8x128xf32>, vector<128x128xf32>, vector<8x128xf32> -> vector<8x128xf32>
      %145 = arith.addf %144, %20 : vector<8x128xf32>
      %146 = arith.mulf %143, %145 : vector<8x128xf32>
      %cst_35 = arith.constant dense<0.000000e+00> : vector<8xf32>
      %147 = vector.multi_reduction <add>, %146, %cst_35 [1] : vector<8x128xf32> to vector<8xf32>
      %148 = vector.shape_cast %147 : vector<8xf32> to vector<8x1xf32>
      %149 = vector.broadcast %148 : vector<8x1xf32> to vector<8x128xf32>
      %150 = arith.subf %145, %149 : vector<8x128xf32>
      %151 = arith.mulf %143, %150 : vector<8x128xf32>
      %152 = vector.broadcast %10 : f32 to vector<8x128xf32>
      %153 = arith.mulf %152, %151 : vector<8x128xf32>
      %154 = vector.broadcast %15 : f32 to vector<8x128xf32>
      %155 = arith.mulf %154, %153 : vector<8x128xf32>
      %156 = arith.addf %143, %155 : vector<8x128xf32>
      %157 = vector.broadcast %14 : f32 to vector<8x128xf32>
      %158 = arith.mulf %157, %153 : vector<8x128xf32>
      %159 = arith.addf %143, %158 : vector<8x128xf32>
      %cst_36 = arith.constant dense<0.000000e+00> : vector<8x128xf32>
      %160 = tpu.matmul %159, %17, %cst_36 {dimension_numbers = #tpu.dot_dimension_numbers<[1], [0], [0], [1], [0, 0, 1, 1], [], []>} : vector<8x128xf32>, vector<128x128xf32>, vector<8x128xf32> -> vector<8x128xf32>
      %161 = arith.addf %160, %20 : vector<8x128xf32>
      %162 = arith.mulf %159, %161 : vector<8x128xf32>
      %cst_37 = arith.constant dense<0.000000e+00> : vector<8xf32>
      %163 = vector.multi_reduction <add>, %162, %cst_37 [1] : vector<8x128xf32> to vector<8xf32>
      %164 = vector.shape_cast %163 : vector<8xf32> to vector<8x1xf32>
      %165 = vector.broadcast %164 : vector<8x1xf32> to vector<8x128xf32>
      %166 = arith.subf %161, %165 : vector<8x128xf32>
      %167 = arith.mulf %159, %166 : vector<8x128xf32>
      %168 = vector.broadcast %10 : f32 to vector<8x128xf32>
      %169 = arith.mulf %168, %167 : vector<8x128xf32>
      %170 = vector.broadcast %16 : f32 to vector<8x128xf32>
      %171 = arith.mulf %170, %169 : vector<8x128xf32>
      %172 = arith.addf %156, %171 : vector<8x128xf32>
      %173 = vector.broadcast %14 : f32 to vector<8x128xf32>
      %174 = arith.mulf %173, %169 : vector<8x128xf32>
      %175 = arith.addf %143, %174 : vector<8x128xf32>
      %cst_38 = arith.constant dense<0.000000e+00> : vector<8x128xf32>
      %176 = tpu.matmul %175, %17, %cst_38 {dimension_numbers = #tpu.dot_dimension_numbers<[1], [0], [0], [1], [0, 0, 1, 1], [], []>} : vector<8x128xf32>, vector<128x128xf32>, vector<8x128xf32> -> vector<8x128xf32>
      %177 = arith.addf %176, %20 : vector<8x128xf32>
      %178 = arith.mulf %175, %177 : vector<8x128xf32>
      %cst_39 = arith.constant dense<0.000000e+00> : vector<8xf32>
      %179 = vector.multi_reduction <add>, %178, %cst_39 [1] : vector<8x128xf32> to vector<8xf32>
      %180 = vector.shape_cast %179 : vector<8xf32> to vector<8x1xf32>
      %181 = vector.broadcast %180 : vector<8x1xf32> to vector<8x128xf32>
      %182 = arith.subf %177, %181 : vector<8x128xf32>
      %183 = arith.mulf %175, %182 : vector<8x128xf32>
      %184 = vector.broadcast %10 : f32 to vector<8x128xf32>
      %185 = arith.mulf %184, %183 : vector<8x128xf32>
      %186 = vector.broadcast %16 : f32 to vector<8x128xf32>
      %187 = arith.mulf %186, %185 : vector<8x128xf32>
      %188 = arith.addf %172, %187 : vector<8x128xf32>
      %189 = vector.broadcast %13 : f32 to vector<8x128xf32>
      %190 = arith.mulf %189, %185 : vector<8x128xf32>
      %191 = arith.addf %143, %190 : vector<8x128xf32>
      %cst_40 = arith.constant dense<0.000000e+00> : vector<8x128xf32>
      %192 = tpu.matmul %191, %17, %cst_40 {dimension_numbers = #tpu.dot_dimension_numbers<[1], [0], [0], [1], [0, 0, 1, 1], [], []>} : vector<8x128xf32>, vector<128x128xf32>, vector<8x128xf32> -> vector<8x128xf32>
      %193 = arith.addf %192, %20 : vector<8x128xf32>
      %194 = arith.mulf %191, %193 : vector<8x128xf32>
      %cst_41 = arith.constant dense<0.000000e+00> : vector<8xf32>
      %195 = vector.multi_reduction <add>, %194, %cst_41 [1] : vector<8x128xf32> to vector<8xf32>
      %196 = vector.shape_cast %195 : vector<8xf32> to vector<8x1xf32>
      %197 = vector.broadcast %196 : vector<8x1xf32> to vector<8x128xf32>
      %198 = arith.subf %193, %197 : vector<8x128xf32>
      %199 = arith.mulf %191, %198 : vector<8x128xf32>
      %200 = vector.broadcast %10 : f32 to vector<8x128xf32>
      %201 = arith.mulf %200, %199 : vector<8x128xf32>
      %202 = vector.broadcast %15 : f32 to vector<8x128xf32>
      %203 = arith.mulf %202, %201 : vector<8x128xf32>
      %204 = arith.addf %188, %203 : vector<8x128xf32>
      %c3_i32 = arith.constant 3 : i32
      %cst_42 = arith.constant dense<0.000000e+00> : vector<8x128xf32>
      %205 = tpu.matmul %204, %17, %cst_42 {dimension_numbers = #tpu.dot_dimension_numbers<[1], [0], [0], [1], [0, 0, 1, 1], [], []>} : vector<8x128xf32>, vector<128x128xf32>, vector<8x128xf32> -> vector<8x128xf32>
      %206 = arith.addf %205, %20 : vector<8x128xf32>
      %207 = arith.mulf %204, %206 : vector<8x128xf32>
      %cst_43 = arith.constant dense<0.000000e+00> : vector<8xf32>
      %208 = vector.multi_reduction <add>, %207, %cst_43 [1] : vector<8x128xf32> to vector<8xf32>
      %209 = vector.shape_cast %208 : vector<8xf32> to vector<8x1xf32>
      %210 = vector.broadcast %209 : vector<8x1xf32> to vector<8x128xf32>
      %211 = arith.subf %206, %210 : vector<8x128xf32>
      %212 = arith.mulf %204, %211 : vector<8x128xf32>
      %213 = vector.broadcast %10 : f32 to vector<8x128xf32>
      %214 = arith.mulf %213, %212 : vector<8x128xf32>
      %215 = vector.broadcast %15 : f32 to vector<8x128xf32>
      %216 = arith.mulf %215, %214 : vector<8x128xf32>
      %217 = arith.addf %204, %216 : vector<8x128xf32>
      %218 = vector.broadcast %14 : f32 to vector<8x128xf32>
      %219 = arith.mulf %218, %214 : vector<8x128xf32>
      %220 = arith.addf %204, %219 : vector<8x128xf32>
      %cst_44 = arith.constant dense<0.000000e+00> : vector<8x128xf32>
      %221 = tpu.matmul %220, %17, %cst_44 {dimension_numbers = #tpu.dot_dimension_numbers<[1], [0], [0], [1], [0, 0, 1, 1], [], []>} : vector<8x128xf32>, vector<128x128xf32>, vector<8x128xf32> -> vector<8x128xf32>
      %222 = arith.addf %221, %20 : vector<8x128xf32>
      %223 = arith.mulf %220, %222 : vector<8x128xf32>
      %cst_45 = arith.constant dense<0.000000e+00> : vector<8xf32>
      %224 = vector.multi_reduction <add>, %223, %cst_45 [1] : vector<8x128xf32> to vector<8xf32>
      %225 = vector.shape_cast %224 : vector<8xf32> to vector<8x1xf32>
      %226 = vector.broadcast %225 : vector<8x1xf32> to vector<8x128xf32>
      %227 = arith.subf %222, %226 : vector<8x128xf32>
      %228 = arith.mulf %220, %227 : vector<8x128xf32>
      %229 = vector.broadcast %10 : f32 to vector<8x128xf32>
      %230 = arith.mulf %229, %228 : vector<8x128xf32>
      %231 = vector.broadcast %16 : f32 to vector<8x128xf32>
      %232 = arith.mulf %231, %230 : vector<8x128xf32>
      %233 = arith.addf %217, %232 : vector<8x128xf32>
      %234 = vector.broadcast %14 : f32 to vector<8x128xf32>
      %235 = arith.mulf %234, %230 : vector<8x128xf32>
      %236 = arith.addf %204, %235 : vector<8x128xf32>
      %cst_46 = arith.constant dense<0.000000e+00> : vector<8x128xf32>
      %237 = tpu.matmul %236, %17, %cst_46 {dimension_numbers = #tpu.dot_dimension_numbers<[1], [0], [0], [1], [0, 0, 1, 1], [], []>} : vector<8x128xf32>, vector<128x128xf32>, vector<8x128xf32> -> vector<8x128xf32>
      %238 = arith.addf %237, %20 : vector<8x128xf32>
      %239 = arith.mulf %236, %238 : vector<8x128xf32>
      %cst_47 = arith.constant dense<0.000000e+00> : vector<8xf32>
      %240 = vector.multi_reduction <add>, %239, %cst_47 [1] : vector<8x128xf32> to vector<8xf32>
      %241 = vector.shape_cast %240 : vector<8xf32> to vector<8x1xf32>
      %242 = vector.broadcast %241 : vector<8x1xf32> to vector<8x128xf32>
      %243 = arith.subf %238, %242 : vector<8x128xf32>
      %244 = arith.mulf %236, %243 : vector<8x128xf32>
      %245 = vector.broadcast %10 : f32 to vector<8x128xf32>
      %246 = arith.mulf %245, %244 : vector<8x128xf32>
      %247 = vector.broadcast %16 : f32 to vector<8x128xf32>
      %248 = arith.mulf %247, %246 : vector<8x128xf32>
      %249 = arith.addf %233, %248 : vector<8x128xf32>
      %250 = vector.broadcast %13 : f32 to vector<8x128xf32>
      %251 = arith.mulf %250, %246 : vector<8x128xf32>
      %252 = arith.addf %204, %251 : vector<8x128xf32>
      %cst_48 = arith.constant dense<0.000000e+00> : vector<8x128xf32>
      %253 = tpu.matmul %252, %17, %cst_48 {dimension_numbers = #tpu.dot_dimension_numbers<[1], [0], [0], [1], [0, 0, 1, 1], [], []>} : vector<8x128xf32>, vector<128x128xf32>, vector<8x128xf32> -> vector<8x128xf32>
      %254 = arith.addf %253, %20 : vector<8x128xf32>
      %255 = arith.mulf %252, %254 : vector<8x128xf32>
      %cst_49 = arith.constant dense<0.000000e+00> : vector<8xf32>
      %256 = vector.multi_reduction <add>, %255, %cst_49 [1] : vector<8x128xf32> to vector<8xf32>
      %257 = vector.shape_cast %256 : vector<8xf32> to vector<8x1xf32>
      %258 = vector.broadcast %257 : vector<8x1xf32> to vector<8x128xf32>
      %259 = arith.subf %254, %258 : vector<8x128xf32>
      %260 = arith.mulf %252, %259 : vector<8x128xf32>
      %261 = vector.broadcast %10 : f32 to vector<8x128xf32>
      %262 = arith.mulf %261, %260 : vector<8x128xf32>
      %263 = vector.broadcast %15 : f32 to vector<8x128xf32>
      %264 = arith.mulf %263, %262 : vector<8x128xf32>
      %265 = arith.addf %249, %264 : vector<8x128xf32>
      %c4_i32 = arith.constant 4 : i32
      %cst_50 = arith.constant dense<0.000000e+00> : vector<8x128xf32>
      %266 = tpu.matmul %265, %17, %cst_50 {dimension_numbers = #tpu.dot_dimension_numbers<[1], [0], [0], [1], [0, 0, 1, 1], [], []>} : vector<8x128xf32>, vector<128x128xf32>, vector<8x128xf32> -> vector<8x128xf32>
      %267 = arith.addf %266, %20 : vector<8x128xf32>
      %268 = arith.mulf %265, %267 : vector<8x128xf32>
      %cst_51 = arith.constant dense<0.000000e+00> : vector<8xf32>
      %269 = vector.multi_reduction <add>, %268, %cst_51 [1] : vector<8x128xf32> to vector<8xf32>
      %270 = vector.shape_cast %269 : vector<8xf32> to vector<8x1xf32>
      %271 = vector.broadcast %270 : vector<8x1xf32> to vector<8x128xf32>
      %272 = arith.subf %267, %271 : vector<8x128xf32>
      %273 = arith.mulf %265, %272 : vector<8x128xf32>
      %274 = vector.broadcast %10 : f32 to vector<8x128xf32>
      %275 = arith.mulf %274, %273 : vector<8x128xf32>
      %276 = vector.broadcast %15 : f32 to vector<8x128xf32>
      %277 = arith.mulf %276, %275 : vector<8x128xf32>
      %278 = arith.addf %265, %277 : vector<8x128xf32>
      %279 = vector.broadcast %14 : f32 to vector<8x128xf32>
      %280 = arith.mulf %279, %275 : vector<8x128xf32>
      %281 = arith.addf %265, %280 : vector<8x128xf32>
      %cst_52 = arith.constant dense<0.000000e+00> : vector<8x128xf32>
      %282 = tpu.matmul %281, %17, %cst_52 {dimension_numbers = #tpu.dot_dimension_numbers<[1], [0], [0], [1], [0, 0, 1, 1], [], []>} : vector<8x128xf32>, vector<128x128xf32>, vector<8x128xf32> -> vector<8x128xf32>
      %283 = arith.addf %282, %20 : vector<8x128xf32>
      %284 = arith.mulf %281, %283 : vector<8x128xf32>
      %cst_53 = arith.constant dense<0.000000e+00> : vector<8xf32>
      %285 = vector.multi_reduction <add>, %284, %cst_53 [1] : vector<8x128xf32> to vector<8xf32>
      %286 = vector.shape_cast %285 : vector<8xf32> to vector<8x1xf32>
      %287 = vector.broadcast %286 : vector<8x1xf32> to vector<8x128xf32>
      %288 = arith.subf %283, %287 : vector<8x128xf32>
      %289 = arith.mulf %281, %288 : vector<8x128xf32>
      %290 = vector.broadcast %10 : f32 to vector<8x128xf32>
      %291 = arith.mulf %290, %289 : vector<8x128xf32>
      %292 = vector.broadcast %16 : f32 to vector<8x128xf32>
      %293 = arith.mulf %292, %291 : vector<8x128xf32>
      %294 = arith.addf %278, %293 : vector<8x128xf32>
      %295 = vector.broadcast %14 : f32 to vector<8x128xf32>
      %296 = arith.mulf %295, %291 : vector<8x128xf32>
      %297 = arith.addf %265, %296 : vector<8x128xf32>
      %cst_54 = arith.constant dense<0.000000e+00> : vector<8x128xf32>
      %298 = tpu.matmul %297, %17, %cst_54 {dimension_numbers = #tpu.dot_dimension_numbers<[1], [0], [0], [1], [0, 0, 1, 1], [], []>} : vector<8x128xf32>, vector<128x128xf32>, vector<8x128xf32> -> vector<8x128xf32>
      %299 = arith.addf %298, %20 : vector<8x128xf32>
      %300 = arith.mulf %297, %299 : vector<8x128xf32>
      %cst_55 = arith.constant dense<0.000000e+00> : vector<8xf32>
      %301 = vector.multi_reduction <add>, %300, %cst_55 [1] : vector<8x128xf32> to vector<8xf32>
      %302 = vector.shape_cast %301 : vector<8xf32> to vector<8x1xf32>
      %303 = vector.broadcast %302 : vector<8x1xf32> to vector<8x128xf32>
      %304 = arith.subf %299, %303 : vector<8x128xf32>
      %305 = arith.mulf %297, %304 : vector<8x128xf32>
      %306 = vector.broadcast %10 : f32 to vector<8x128xf32>
      %307 = arith.mulf %306, %305 : vector<8x128xf32>
      %308 = vector.broadcast %16 : f32 to vector<8x128xf32>
      %309 = arith.mulf %308, %307 : vector<8x128xf32>
      %310 = arith.addf %294, %309 : vector<8x128xf32>
      %311 = vector.broadcast %13 : f32 to vector<8x128xf32>
      %312 = arith.mulf %311, %307 : vector<8x128xf32>
      %313 = arith.addf %265, %312 : vector<8x128xf32>
      %cst_56 = arith.constant dense<0.000000e+00> : vector<8x128xf32>
      %314 = tpu.matmul %313, %17, %cst_56 {dimension_numbers = #tpu.dot_dimension_numbers<[1], [0], [0], [1], [0, 0, 1, 1], [], []>} : vector<8x128xf32>, vector<128x128xf32>, vector<8x128xf32> -> vector<8x128xf32>
      %315 = arith.addf %314, %20 : vector<8x128xf32>
      %316 = arith.mulf %313, %315 : vector<8x128xf32>
      %cst_57 = arith.constant dense<0.000000e+00> : vector<8xf32>
      %317 = vector.multi_reduction <add>, %316, %cst_57 [1] : vector<8x128xf32> to vector<8xf32>
      %318 = vector.shape_cast %317 : vector<8xf32> to vector<8x1xf32>
      %319 = vector.broadcast %318 : vector<8x1xf32> to vector<8x128xf32>
      %320 = arith.subf %315, %319 : vector<8x128xf32>
      %321 = arith.mulf %313, %320 : vector<8x128xf32>
      %322 = vector.broadcast %10 : f32 to vector<8x128xf32>
      %323 = arith.mulf %322, %321 : vector<8x128xf32>
      %324 = vector.broadcast %15 : f32 to vector<8x128xf32>
      %325 = arith.mulf %324, %323 : vector<8x128xf32>
      %326 = arith.addf %310, %325 : vector<8x128xf32>
      %c5_i32 = arith.constant 5 : i32
      %cst_58 = arith.constant dense<0.000000e+00> : vector<8x128xf32>
      %327 = tpu.matmul %326, %17, %cst_58 {dimension_numbers = #tpu.dot_dimension_numbers<[1], [0], [0], [1], [0, 0, 1, 1], [], []>} : vector<8x128xf32>, vector<128x128xf32>, vector<8x128xf32> -> vector<8x128xf32>
      %328 = arith.addf %327, %20 : vector<8x128xf32>
      %329 = arith.mulf %326, %328 : vector<8x128xf32>
      %cst_59 = arith.constant dense<0.000000e+00> : vector<8xf32>
      %330 = vector.multi_reduction <add>, %329, %cst_59 [1] : vector<8x128xf32> to vector<8xf32>
      %331 = vector.shape_cast %330 : vector<8xf32> to vector<8x1xf32>
      %332 = vector.broadcast %331 : vector<8x1xf32> to vector<8x128xf32>
      %333 = arith.subf %328, %332 : vector<8x128xf32>
      %334 = arith.mulf %326, %333 : vector<8x128xf32>
      %335 = vector.broadcast %10 : f32 to vector<8x128xf32>
      %336 = arith.mulf %335, %334 : vector<8x128xf32>
      %337 = vector.broadcast %15 : f32 to vector<8x128xf32>
      %338 = arith.mulf %337, %336 : vector<8x128xf32>
      %339 = arith.addf %326, %338 : vector<8x128xf32>
      %340 = vector.broadcast %14 : f32 to vector<8x128xf32>
      %341 = arith.mulf %340, %336 : vector<8x128xf32>
      %342 = arith.addf %326, %341 : vector<8x128xf32>
      %cst_60 = arith.constant dense<0.000000e+00> : vector<8x128xf32>
      %343 = tpu.matmul %342, %17, %cst_60 {dimension_numbers = #tpu.dot_dimension_numbers<[1], [0], [0], [1], [0, 0, 1, 1], [], []>} : vector<8x128xf32>, vector<128x128xf32>, vector<8x128xf32> -> vector<8x128xf32>
      %344 = arith.addf %343, %20 : vector<8x128xf32>
      %345 = arith.mulf %342, %344 : vector<8x128xf32>
      %cst_61 = arith.constant dense<0.000000e+00> : vector<8xf32>
      %346 = vector.multi_reduction <add>, %345, %cst_61 [1] : vector<8x128xf32> to vector<8xf32>
      %347 = vector.shape_cast %346 : vector<8xf32> to vector<8x1xf32>
      %348 = vector.broadcast %347 : vector<8x1xf32> to vector<8x128xf32>
      %349 = arith.subf %344, %348 : vector<8x128xf32>
      %350 = arith.mulf %342, %349 : vector<8x128xf32>
      %351 = vector.broadcast %10 : f32 to vector<8x128xf32>
      %352 = arith.mulf %351, %350 : vector<8x128xf32>
      %353 = vector.broadcast %16 : f32 to vector<8x128xf32>
      %354 = arith.mulf %353, %352 : vector<8x128xf32>
      %355 = arith.addf %339, %354 : vector<8x128xf32>
      %356 = vector.broadcast %14 : f32 to vector<8x128xf32>
      %357 = arith.mulf %356, %352 : vector<8x128xf32>
      %358 = arith.addf %326, %357 : vector<8x128xf32>
      %cst_62 = arith.constant dense<0.000000e+00> : vector<8x128xf32>
      %359 = tpu.matmul %358, %17, %cst_62 {dimension_numbers = #tpu.dot_dimension_numbers<[1], [0], [0], [1], [0, 0, 1, 1], [], []>} : vector<8x128xf32>, vector<128x128xf32>, vector<8x128xf32> -> vector<8x128xf32>
      %360 = arith.addf %359, %20 : vector<8x128xf32>
      %361 = arith.mulf %358, %360 : vector<8x128xf32>
      %cst_63 = arith.constant dense<0.000000e+00> : vector<8xf32>
      %362 = vector.multi_reduction <add>, %361, %cst_63 [1] : vector<8x128xf32> to vector<8xf32>
      %363 = vector.shape_cast %362 : vector<8xf32> to vector<8x1xf32>
      %364 = vector.broadcast %363 : vector<8x1xf32> to vector<8x128xf32>
      %365 = arith.subf %360, %364 : vector<8x128xf32>
      %366 = arith.mulf %358, %365 : vector<8x128xf32>
      %367 = vector.broadcast %10 : f32 to vector<8x128xf32>
      %368 = arith.mulf %367, %366 : vector<8x128xf32>
      %369 = vector.broadcast %16 : f32 to vector<8x128xf32>
      %370 = arith.mulf %369, %368 : vector<8x128xf32>
      %371 = arith.addf %355, %370 : vector<8x128xf32>
      %372 = vector.broadcast %13 : f32 to vector<8x128xf32>
      %373 = arith.mulf %372, %368 : vector<8x128xf32>
      %374 = arith.addf %326, %373 : vector<8x128xf32>
      %cst_64 = arith.constant dense<0.000000e+00> : vector<8x128xf32>
      %375 = tpu.matmul %374, %17, %cst_64 {dimension_numbers = #tpu.dot_dimension_numbers<[1], [0], [0], [1], [0, 0, 1, 1], [], []>} : vector<8x128xf32>, vector<128x128xf32>, vector<8x128xf32> -> vector<8x128xf32>
      %376 = arith.addf %375, %20 : vector<8x128xf32>
      %377 = arith.mulf %374, %376 : vector<8x128xf32>
      %cst_65 = arith.constant dense<0.000000e+00> : vector<8xf32>
      %378 = vector.multi_reduction <add>, %377, %cst_65 [1] : vector<8x128xf32> to vector<8xf32>
      %379 = vector.shape_cast %378 : vector<8xf32> to vector<8x1xf32>
      %380 = vector.broadcast %379 : vector<8x1xf32> to vector<8x128xf32>
      %381 = arith.subf %376, %380 : vector<8x128xf32>
      %382 = arith.mulf %374, %381 : vector<8x128xf32>
      %383 = vector.broadcast %10 : f32 to vector<8x128xf32>
      %384 = arith.mulf %383, %382 : vector<8x128xf32>
      %385 = vector.broadcast %15 : f32 to vector<8x128xf32>
      %386 = arith.mulf %385, %384 : vector<8x128xf32>
      %387 = arith.addf %371, %386 : vector<8x128xf32>
      %c6_i32 = arith.constant 6 : i32
      %cst_66 = arith.constant dense<0.000000e+00> : vector<8x128xf32>
      %388 = tpu.matmul %387, %17, %cst_66 {dimension_numbers = #tpu.dot_dimension_numbers<[1], [0], [0], [1], [0, 0, 1, 1], [], []>} : vector<8x128xf32>, vector<128x128xf32>, vector<8x128xf32> -> vector<8x128xf32>
      %389 = arith.addf %388, %20 : vector<8x128xf32>
      %390 = arith.mulf %387, %389 : vector<8x128xf32>
      %cst_67 = arith.constant dense<0.000000e+00> : vector<8xf32>
      %391 = vector.multi_reduction <add>, %390, %cst_67 [1] : vector<8x128xf32> to vector<8xf32>
      %392 = vector.shape_cast %391 : vector<8xf32> to vector<8x1xf32>
      %393 = vector.broadcast %392 : vector<8x1xf32> to vector<8x128xf32>
      %394 = arith.subf %389, %393 : vector<8x128xf32>
      %395 = arith.mulf %387, %394 : vector<8x128xf32>
      %396 = vector.broadcast %10 : f32 to vector<8x128xf32>
      %397 = arith.mulf %396, %395 : vector<8x128xf32>
      %398 = vector.broadcast %15 : f32 to vector<8x128xf32>
      %399 = arith.mulf %398, %397 : vector<8x128xf32>
      %400 = arith.addf %387, %399 : vector<8x128xf32>
      %401 = vector.broadcast %14 : f32 to vector<8x128xf32>
      %402 = arith.mulf %401, %397 : vector<8x128xf32>
      %403 = arith.addf %387, %402 : vector<8x128xf32>
      %cst_68 = arith.constant dense<0.000000e+00> : vector<8x128xf32>
      %404 = tpu.matmul %403, %17, %cst_68 {dimension_numbers = #tpu.dot_dimension_numbers<[1], [0], [0], [1], [0, 0, 1, 1], [], []>} : vector<8x128xf32>, vector<128x128xf32>, vector<8x128xf32> -> vector<8x128xf32>
      %405 = arith.addf %404, %20 : vector<8x128xf32>
      %406 = arith.mulf %403, %405 : vector<8x128xf32>
      %cst_69 = arith.constant dense<0.000000e+00> : vector<8xf32>
      %407 = vector.multi_reduction <add>, %406, %cst_69 [1] : vector<8x128xf32> to vector<8xf32>
      %408 = vector.shape_cast %407 : vector<8xf32> to vector<8x1xf32>
      %409 = vector.broadcast %408 : vector<8x1xf32> to vector<8x128xf32>
      %410 = arith.subf %405, %409 : vector<8x128xf32>
      %411 = arith.mulf %403, %410 : vector<8x128xf32>
      %412 = vector.broadcast %10 : f32 to vector<8x128xf32>
      %413 = arith.mulf %412, %411 : vector<8x128xf32>
      %414 = vector.broadcast %16 : f32 to vector<8x128xf32>
      %415 = arith.mulf %414, %413 : vector<8x128xf32>
      %416 = arith.addf %400, %415 : vector<8x128xf32>
      %417 = vector.broadcast %14 : f32 to vector<8x128xf32>
      %418 = arith.mulf %417, %413 : vector<8x128xf32>
      %419 = arith.addf %387, %418 : vector<8x128xf32>
      %cst_70 = arith.constant dense<0.000000e+00> : vector<8x128xf32>
      %420 = tpu.matmul %419, %17, %cst_70 {dimension_numbers = #tpu.dot_dimension_numbers<[1], [0], [0], [1], [0, 0, 1, 1], [], []>} : vector<8x128xf32>, vector<128x128xf32>, vector<8x128xf32> -> vector<8x128xf32>
      %421 = arith.addf %420, %20 : vector<8x128xf32>
      %422 = arith.mulf %419, %421 : vector<8x128xf32>
      %cst_71 = arith.constant dense<0.000000e+00> : vector<8xf32>
      %423 = vector.multi_reduction <add>, %422, %cst_71 [1] : vector<8x128xf32> to vector<8xf32>
      %424 = vector.shape_cast %423 : vector<8xf32> to vector<8x1xf32>
      %425 = vector.broadcast %424 : vector<8x1xf32> to vector<8x128xf32>
      %426 = arith.subf %421, %425 : vector<8x128xf32>
      %427 = arith.mulf %419, %426 : vector<8x128xf32>
      %428 = vector.broadcast %10 : f32 to vector<8x128xf32>
      %429 = arith.mulf %428, %427 : vector<8x128xf32>
      %430 = vector.broadcast %16 : f32 to vector<8x128xf32>
      %431 = arith.mulf %430, %429 : vector<8x128xf32>
      %432 = arith.addf %416, %431 : vector<8x128xf32>
      %433 = vector.broadcast %13 : f32 to vector<8x128xf32>
      %434 = arith.mulf %433, %429 : vector<8x128xf32>
      %435 = arith.addf %387, %434 : vector<8x128xf32>
      %cst_72 = arith.constant dense<0.000000e+00> : vector<8x128xf32>
      %436 = tpu.matmul %435, %17, %cst_72 {dimension_numbers = #tpu.dot_dimension_numbers<[1], [0], [0], [1], [0, 0, 1, 1], [], []>} : vector<8x128xf32>, vector<128x128xf32>, vector<8x128xf32> -> vector<8x128xf32>
      %437 = arith.addf %436, %20 : vector<8x128xf32>
      %438 = arith.mulf %435, %437 : vector<8x128xf32>
      %cst_73 = arith.constant dense<0.000000e+00> : vector<8xf32>
      %439 = vector.multi_reduction <add>, %438, %cst_73 [1] : vector<8x128xf32> to vector<8xf32>
      %440 = vector.shape_cast %439 : vector<8xf32> to vector<8x1xf32>
      %441 = vector.broadcast %440 : vector<8x1xf32> to vector<8x128xf32>
      %442 = arith.subf %437, %441 : vector<8x128xf32>
      %443 = arith.mulf %435, %442 : vector<8x128xf32>
      %444 = vector.broadcast %10 : f32 to vector<8x128xf32>
      %445 = arith.mulf %444, %443 : vector<8x128xf32>
      %446 = vector.broadcast %15 : f32 to vector<8x128xf32>
      %447 = arith.mulf %446, %445 : vector<8x128xf32>
      %448 = arith.addf %432, %447 : vector<8x128xf32>
      %c7_i32 = arith.constant 7 : i32
      %cst_74 = arith.constant dense<0.000000e+00> : vector<8x128xf32>
      %449 = tpu.matmul %448, %17, %cst_74 {dimension_numbers = #tpu.dot_dimension_numbers<[1], [0], [0], [1], [0, 0, 1, 1], [], []>} : vector<8x128xf32>, vector<128x128xf32>, vector<8x128xf32> -> vector<8x128xf32>
      %450 = arith.addf %449, %20 : vector<8x128xf32>
      %451 = arith.mulf %448, %450 : vector<8x128xf32>
      %cst_75 = arith.constant dense<0.000000e+00> : vector<8xf32>
      %452 = vector.multi_reduction <add>, %451, %cst_75 [1] : vector<8x128xf32> to vector<8xf32>
      %453 = vector.shape_cast %452 : vector<8xf32> to vector<8x1xf32>
      %454 = vector.broadcast %453 : vector<8x1xf32> to vector<8x128xf32>
      %455 = arith.subf %450, %454 : vector<8x128xf32>
      %456 = arith.mulf %448, %455 : vector<8x128xf32>
      %457 = vector.broadcast %10 : f32 to vector<8x128xf32>
      %458 = arith.mulf %457, %456 : vector<8x128xf32>
      %459 = vector.broadcast %15 : f32 to vector<8x128xf32>
      %460 = arith.mulf %459, %458 : vector<8x128xf32>
      %461 = arith.addf %448, %460 : vector<8x128xf32>
      %462 = vector.broadcast %14 : f32 to vector<8x128xf32>
      %463 = arith.mulf %462, %458 : vector<8x128xf32>
      %464 = arith.addf %448, %463 : vector<8x128xf32>
      %cst_76 = arith.constant dense<0.000000e+00> : vector<8x128xf32>
      %465 = tpu.matmul %464, %17, %cst_76 {dimension_numbers = #tpu.dot_dimension_numbers<[1], [0], [0], [1], [0, 0, 1, 1], [], []>} : vector<8x128xf32>, vector<128x128xf32>, vector<8x128xf32> -> vector<8x128xf32>
      %466 = arith.addf %465, %20 : vector<8x128xf32>
      %467 = arith.mulf %464, %466 : vector<8x128xf32>
      %cst_77 = arith.constant dense<0.000000e+00> : vector<8xf32>
      %468 = vector.multi_reduction <add>, %467, %cst_77 [1] : vector<8x128xf32> to vector<8xf32>
      %469 = vector.shape_cast %468 : vector<8xf32> to vector<8x1xf32>
      %470 = vector.broadcast %469 : vector<8x1xf32> to vector<8x128xf32>
      %471 = arith.subf %466, %470 : vector<8x128xf32>
      %472 = arith.mulf %464, %471 : vector<8x128xf32>
      %473 = vector.broadcast %10 : f32 to vector<8x128xf32>
      %474 = arith.mulf %473, %472 : vector<8x128xf32>
      %475 = vector.broadcast %16 : f32 to vector<8x128xf32>
      %476 = arith.mulf %475, %474 : vector<8x128xf32>
      %477 = arith.addf %461, %476 : vector<8x128xf32>
      %478 = vector.broadcast %14 : f32 to vector<8x128xf32>
      %479 = arith.mulf %478, %474 : vector<8x128xf32>
      %480 = arith.addf %448, %479 : vector<8x128xf32>
      %cst_78 = arith.constant dense<0.000000e+00> : vector<8x128xf32>
      %481 = tpu.matmul %480, %17, %cst_78 {dimension_numbers = #tpu.dot_dimension_numbers<[1], [0], [0], [1], [0, 0, 1, 1], [], []>} : vector<8x128xf32>, vector<128x128xf32>, vector<8x128xf32> -> vector<8x128xf32>
      %482 = arith.addf %481, %20 : vector<8x128xf32>
      %483 = arith.mulf %480, %482 : vector<8x128xf32>
      %cst_79 = arith.constant dense<0.000000e+00> : vector<8xf32>
      %484 = vector.multi_reduction <add>, %483, %cst_79 [1] : vector<8x128xf32> to vector<8xf32>
      %485 = vector.shape_cast %484 : vector<8xf32> to vector<8x1xf32>
      %486 = vector.broadcast %485 : vector<8x1xf32> to vector<8x128xf32>
      %487 = arith.subf %482, %486 : vector<8x128xf32>
      %488 = arith.mulf %480, %487 : vector<8x128xf32>
      %489 = vector.broadcast %10 : f32 to vector<8x128xf32>
      %490 = arith.mulf %489, %488 : vector<8x128xf32>
      %491 = vector.broadcast %16 : f32 to vector<8x128xf32>
      %492 = arith.mulf %491, %490 : vector<8x128xf32>
      %493 = arith.addf %477, %492 : vector<8x128xf32>
      %494 = vector.broadcast %13 : f32 to vector<8x128xf32>
      %495 = arith.mulf %494, %490 : vector<8x128xf32>
      %496 = arith.addf %448, %495 : vector<8x128xf32>
      %cst_80 = arith.constant dense<0.000000e+00> : vector<8x128xf32>
      %497 = tpu.matmul %496, %17, %cst_80 {dimension_numbers = #tpu.dot_dimension_numbers<[1], [0], [0], [1], [0, 0, 1, 1], [], []>} : vector<8x128xf32>, vector<128x128xf32>, vector<8x128xf32> -> vector<8x128xf32>
      %498 = arith.addf %497, %20 : vector<8x128xf32>
      %499 = arith.mulf %496, %498 : vector<8x128xf32>
      %cst_81 = arith.constant dense<0.000000e+00> : vector<8xf32>
      %500 = vector.multi_reduction <add>, %499, %cst_81 [1] : vector<8x128xf32> to vector<8xf32>
      %501 = vector.shape_cast %500 : vector<8xf32> to vector<8x1xf32>
      %502 = vector.broadcast %501 : vector<8x1xf32> to vector<8x128xf32>
      %503 = arith.subf %498, %502 : vector<8x128xf32>
      %504 = arith.mulf %496, %503 : vector<8x128xf32>
      %505 = vector.broadcast %10 : f32 to vector<8x128xf32>
      %506 = arith.mulf %505, %504 : vector<8x128xf32>
      %507 = vector.broadcast %15 : f32 to vector<8x128xf32>
      %508 = arith.mulf %507, %506 : vector<8x128xf32>
      %509 = arith.addf %493, %508 : vector<8x128xf32>
      %c0_82 = arith.constant 0 : index
      %c0_83 = arith.constant 0 : index
      %510 = vector.load %arg7[%c0_82, %c0_83] : memref<8x128xf32, #tpu.memory_space<vmem>>, vector<8x128xf32>
      tpu.vector_store %arg7[%c0_82, %c0_83], %509 {strides = array<i32>} : memref<8x128xf32, #tpu.memory_space<vmem>>, vector<8x128xf32>,
    } else {
    }
    %c0 = arith.constant 0 : index
    %c0_3 = arith.constant 0 : index
    %6 = vector.load %arg7[%c0, %c0_3] : memref<8x128xf32, #tpu.memory_space<vmem>>, vector<8x128xf32>
    %c0_4 = arith.constant 0 : index
    %c0_5 = arith.constant 0 : index
    %c0_6 = arith.constant 0 : index
    %7 = vector.load %arg6[%c0_4, %c0_5, %c0_6] : memref<1x8x128xf32, #tpu.memory_space<vmem>>, vector<1x8x128xf32>
    %8 = vector.shape_cast %7 : vector<1x8x128xf32> to vector<8x128xf32>
    %9 = vector.shape_cast %6 : vector<8x128xf32> to vector<1x8x128xf32>
    tpu.vector_store %arg6[%c0_4, %c0_5, %c0_6], %9 {strides = array<i32>} : memref<1x8x128xf32, #tpu.memory_space<vmem>>, vector<1x8x128xf32>,
    return
  }
  func.func @transform_0(%arg0: i32, %arg1: i32) -> i32 {
    %c0_i32 = arith.constant 0 : i32
    %c0_i32_0 = arith.constant 0 : i32
    return %c0_i32 : i32
  }
  func.func @transform_1(%arg0: i32, %arg1: i32) -> (i32, i32) {
    %c0_i32 = arith.constant 0 : i32
    %c0_i32_0 = arith.constant 0 : i32
    return %arg0, %c0_i32 : i32, i32
  }
  func.func @transform_2(%arg0: i32, %arg1: i32) -> (i32, i32) {
    %c0_i32 = arith.constant 0 : i32
    %c0_i32_0 = arith.constant 0 : i32
    %c0_i32_1 = arith.constant 0 : i32
    return %c0_i32, %c0_i32_0 : i32, i32
  }
  func.func @transform_3(%arg0: i32, %arg1: i32) -> (i32, i32) {
    %c0_i32 = arith.constant 0 : i32
    %c0_i32_0 = arith.constant 0 : i32
    %c0_i32_1 = arith.constant 0 : i32
    return %c0_i32, %c0_i32_0 : i32, i32
  }
  func.func @transform_4(%arg0: i32, %arg1: i32) -> (i32, i32, i32) {
    %c0_i32 = arith.constant 0 : i32
    %c0_i32_0 = arith.constant 0 : i32
    return %arg1, %arg0, %c0_i32 : i32, i32, i32
  }
}

</mosaic_0001>

<bundles_post_ra>
// kernel: tpu_custom_call.1
= control target key start
LH: loop header
LB: loop body
LE: loop exit
PB: predicated region body
PF: predicated region fallthrough
CT: control target
= control target key end

     0   :  { %9 = vsyncpa [#allocation6], 0  ;;  %s6498_s0 = inlined_call_operand.hbm [shape: f32[5], index: 0, kind: input, shape index: {}]   ;;  %s6499_s1 = inlined_call_operand.hbm [shape: f32[8,128], index: 1, kind: input, shape index: {}]   ;;  %s6500_s2 = inlined_call_operand.hbm [shape: f32[128,128], index: 2, kind: input, shape index: {}]   ;;  %s6501_s3 = inlined_call_operand.vmem [shape: f32[1,128], index: 3, kind: input, shape index: {}]   ;;  %s6502_s4 = inlined_call_operand.hbm [shape: f32[5,8,128], index: 4, kind: output, shape index: {}]  }
   0x1   :  { %10 = vsyncpa [#allocation4], 0 }
   0x2   :  { %11 = vsyncpa [#allocation9], 0 }
   0x3   :  { %12 = vsyncpa [#allocation5], 0 }
   0x4   :  { %14 = vsyncpa [#allocation5 + $0x1], 0  ;;  %s4930_s15 = smov 0   ;;  %s4932_s16 = smov 0  }
   0x5   :  { %s4934_s17 = smov 0   ;;  %s4936_s18 = smov 0  }
   0x6   :  { %s4938_s19 = smov 0   ;;  %s4940_s20 = smov 0  }
   0x7 LB: > { %s2938_s21 = sadd.s32 4294967295, %s4895_s20   ;;  %s2939_s22 = sadd.s32 4294967294, %s4895_s20   ;;  %s4895_s20 = sphi %s4940_s20, %s20_s20   ;;  %s4891_s19 = sphi %s4938_s19, %s6520_s19   ;;  %s4887_s18 = sphi %s4936_s18, %s6519_s18   ;;  %s4883_s17 = sphi %s4934_s17, %s6518_s17   ;;  %s4879_s16 = sphi %s4932_s16, %s6517_s16   ;;  %s4875_s15 = sphi %s4930_s15, %s6516_s15  }
   0x8   : > { %s29_s23 = sadd.s32 1, %s4891_s19  ;;  %s130_s24 = sadd.s32 1, %s4883_s17 }
   0x9   : > { %p30_p0 = scmp.ge.s32.totalorder %s29_s23, 5  ;;  %p140_p1 = scmp.ne.s32.totalorder %s4883_s17, %s4879_s16 }
   0xa   : > { %p141_p2 = scmp.eq.s32.totalorder %s2938_s21, 4  ;;  %p146_p3 = scmp.ne.s32.totalorder %s4879_s16, %s4875_s15 }
   0xb   : > { %s6522_s23 = smov (%p30_p0, %s29_s23), 0  ;;  %p147_p5 = scmp.eq.s32.totalorder %s2939_s22, 4 }
   0xc   : > { %p4970_p4 = por %p141_p2, %p140_p1  ;;  %s125_s26 = ssub.s32 %s4891_s19, %s6522_s23 }
   0xd   : > { %p2940_p6 = scmp.ge.s32.totalorder %s4895_s20, 1  ;;  %p128_p7 = scmp.eq.s32.totalorder %s125_s26, 0 }
   0xe   : > { %s6507_s25 = scalar_select %p4970_p4, 1, 0 }
   0xf   : > { %p4977_p8 = por %p147_p5, %p146_p3  ;;  %p154_p9 = scmp.lt.s32.totalorder %s4895_s20, 6 }
  0x10   : > { %s4983_s28 = scalar_select %p128_p7, %s4883_s17, %s130_s24  }
  0x11   : > { %s6508_s27 = scalar_select %p4977_p8, 1, 0 }
  0x12   : > { %p4985_p10 = pnand %p2940_p6, %p154_p9  ;;  %p4989_p11 = scmp.eq.s32.totalorder %s2938_s21, 0 }
  0x13   : > { %s4897_s5 = smov [#allocation7]   ;;  %s4898_s8 = smov [#allocation8]  }
  0x14   : > { %s6509_s29 = scalar_select %p4985_p10, 1, 0 }
  0x15   : > { %s6510_s30 = scalar_select %p4989_p11, 1, 0 }
  0x16   : > { %p4634_p12 = pneg %p4985_p10  ;;  %s178_s6 = sshll.u32 %s4897_s5, 4  ;;  %s179_s6 = int_to_ptr.vmem [resolvable:$true] %s178_s6 }
  0x17   : > { %s188_s9 = sshll.u32 %s4898_s8, 4  ;;  %s4899_s10 = smov [#allocation3]   ;;  %s189_s9 = int_to_ptr.vmem [resolvable:$true] %s188_s9 }
  0x18   : > { %p4997_p13 = pnand %p4989_p11, %p4634_p12  ;;  %s4766_s13 = scalar_lea.vmem %s179_s6, 128 }
  0x19   : > { %p4767_p1 = scmp.ne.s32.totalorder %s179_s6, %s4766_s13  ;;  %p4774_p5 = scmp.lt.s32.totalorder %s179_s6, %s179_s6 }
  0x1a   : > { %4637 = dma.hbm_to_smem (!%p4997_p13), %s6498_s0, 16, %s4899_s10, [#allocation6]  }
  0x1b   : > { %p4757_p0 = pneg %p4997_p13  ;;  %p4775_p6 = scmp.lt.s32.totalorder %s4766_s13, %s4766_s13 }
  0x1d   : > { %p4769_p2 = pnand %p4767_p1, %p4757_p0  ;;  %p4776_p7 = por %p4775_p6, %p4774_p5 }
  0x1f   : > { %p4770_p3 = pneg %p4769_p2 }
  0x21   : > { %p4777_p9 = pnand %p4776_p7, %p4770_p3 }
  0x23   : > { %4780 = shalt.err (!%p4777_p9)
}
  0x24   : > { %4640 = dma.hbm_to_vmem [thread:$0]  (!%p4997_p13), %s6499_s1, 128, %s179_s6, [#allocation4]  }
  0x25   : > { %s4792_s22 = scalar_lea.vmem %s189_s9, 2048  ;;  %p4800_p1 = scmp.lt.s32.totalorder %s189_s9, %s189_s9 }
  0x26   : > { %p4793_p12 = scmp.ne.s32.totalorder %s189_s9, %s4792_s22  ;;  %p4801_p2 = scmp.lt.s32.totalorder %s4792_s22, %s4792_s22 }
  0x28   : > { %p4795_p8 = pnand %p4793_p12, %p4757_p0  ;;  %p4802_p11 = por %p4801_p2, %p4800_p1 }
  0x2a   : > { %p4796_p4 = pneg %p4795_p8 }
  0x2c   : > { %p4803_p10 = pnand %p4802_p11, %p4796_p4 }
  0x2e   : > { %4806 = shalt.err (!%p4803_p10)
}
  0x2f   : > { %s4900_s24 = smov 128   ;;  %s4901_s26 = smov 8  }
  0x30   : > { %4643 = dma.hbm_to_vmem [thread:$0]  (!%p4997_p13), %s6500_s2, 2048, %s189_s9, [#allocation9], %s4900_s24, %s4900_s24, %s4901_s26  }
  0x31   : > { %p6512_p3 = scmp.ne.s32.totalorder %s6509_s29, 0 }
  0x32   : > { %p6513_p5 = scmp.ne.s32.totalorder (!%p6512_p3), %s6510_s30, 0 }
  0x33   : > { %207 = sbr.rel (%p6512_p3) target bundleno = 11177 (0x2ba9), region = 36 }
  0x38   : > { %4858 = dma.done.wait (%p6513_p5), [#allocation6], 16  }
  0x39   : > { %4860 = vsyncadd (%p6513_p5), [#allocation6], 4294967280 }
  0x3a   : > { %4862 = dma.done.wait (%p6513_p5), [#allocation4], 128  }
  0x3b   : > { %4864 = vsyncadd (%p6513_p5), [#allocation4], 4294967168 }
  0x3c   : > { %4866 = dma.done.wait (%p6513_p5), [#allocation9], 2048  }
  0x3d   : > { %4868 = vsyncadd (%p6513_p5), [#allocation9], 4294965248 }
  0x3e   : > { %221 = sfence }
  0x3f   : > { %s234_s29 = sand.u32 1, %s4879_s16   ;;  %p2949_p4 = scmp.ne.s32.totalorder %s4887_s18, 0 }
  0x40   : > { %s5041_s6 = sshll.u32 %s234_s29, 3 }
  0x41   : > { %s236_s7 = scalar_lea.vmem [#allocation10], %s5041_s6  ;;  %240 = sbr.rel (%p2949_p4) target bundleno = 72 (0x48), region = 52 }
  0x46   : > { %v241_v0 = vld [vmem:[#allocation7] sm:$0xff] }
  0x47   : > { %242 = vst [vmem:[#allocation2] sm:$0xff] %v241_v0 }
  0x48 PF: > { %p2950_p8 = scmp.le.s32.totalorder %s4887_s18, 0 }
  0x49   : > { %s248_s10 = sld [smem:[#allocation3 + %s4887_s18]] (!%p2950_p8) }
  0x4a   : > { %246 = sbr.rel (%p2950_p8) target bundleno = 11153 (0x2b91), region = 56  ;;  %s247_s11 = sld [smem:[#allocation3]] (!%p2950_p8) }
  0x4f   : > { %v5046_v1 = vld [vmem:[#allocation8 + $0x78] sm:$0xff]  ;;  %v4902_v2 = vmov 0.0   ;;  %v5049_v3 = vld [vmem:[#allocation8 + $0x70] sm:$0xff]  ;;  %vm4903_vm0 = vmmov 0   ;;  %v5056_v4 = vld [vmem:[#allocation8 + $0x68] sm:$0xff]  ;;  %s5193_s12 = smul.f32 0.125, %s248_s10 }
  0x50   : > { %3500 = vmatprep.subr.mxu0 %v4902_v2  ;;  %3532 = vmatprep.mubr.msk.f32.mxu0 %vm4903_vm0, %v4902_v2  ;;  %v5062_v5 = vld [vmem:[#allocation8 + $0x60] sm:$0xff]  ;;  %v5068_v6 = vld [vmem:[#allocation8 + $0x58] sm:$0xff]  ;;  %v5074_v7 = vld [vmem:[#allocation8 + $0x50] sm:$0xff]  ;;  %v5196_v26 = vstv %s247_s11 }
  0x51   : > { %3501 = vmatpush3.msra.mxu0 %v5046_v1  ;;  %3535 = vmatprep.subr.mxu1 %v4902_v2  ;;  %v5080_v8 = vld [vmem:[#allocation8 + $0x48] sm:$0xff]  ;;  %v5086_v9 = vld [vmem:[#allocation8 + $0x40] sm:$0xff]  ;;  %v5092_v10 = vld [vmem:[#allocation8 + $0x38] sm:$0xff]  ;;  %s252_s13 = smul.f32 0.5, %s5193_s12  ;;  %v5287_v55 = vstv %s5193_s12 }
  0x52   : > { %3502 = vmatprep.subr.mxu0 %v4902_v2  ;;  %3536 = vmatpush3.msra.mxu1 %v5046_v1  ;;  %v5098_v11 = vld [vmem:[#allocation8 + $0x30] sm:$0xff]  ;;  %v5104_v12 = vld [vmem:[#allocation8 + $0x28] sm:$0xff]  ;;  %v5110_v13 = vld [vmem:[#allocation8 + $0x20] sm:$0xff]  ;;  %s253_s14 = smul.f32 0.16666667, %s5193_s12 }
  0x53   : > { %3503 = vmatpush3.msra.mxu0 %v5049_v3  ;;  %3537 = vmatprep.subr.mxu1 %v4902_v2  ;;  %v5116_v14 = vld [vmem:[#allocation8 + $0x18] sm:$0xff]  ;;  %v5122_v15 = vld [vmem:[#allocation8 + $0x10] sm:$0xff]  ;;  %v5128_v16 = vld [vmem:[#allocation8 + $0x8] sm:$0xff]  ;;  %v5199_v28 = vstv %s252_s13  ;;  %s254_s21 = smul.f32 0.33333334, %s5193_s12 }
  0x54   : > { %3504 = vmatprep.subr.mxu0 %v4902_v2  ;;  %3538 = vmatpush3.msra.mxu1 %v5049_v3  ;;  %v5134_v17 = vld [vmem:[#allocation8] sm:$0xff]  ;;  %v5138_v18 = vld [vmem:[#allocation2] sm:$0xff]  ;;  %v5240_v36 = vstv %s253_s14 }
  0x55   : > { %3505 = vmatpush3.msra.mxu0 %v5056_v4  ;;  %3539 = vmatprep.subr.mxu1 %v4902_v2  ;;  %v5188_v19 = vld [vmem:[%s6501_s3] ss:$0 sm:$0xff]  ;;  %v5244_v41 = vstv %s254_s21 }
  0x56   : > { %3506 = vmatprep.subr.mxu0 %v4902_v2  ;;  %3540 = vmatpush3.msra.mxu1 %v5056_v4 }
  0x57   : > { %3507 = vmatpush3.msra.mxu0 %v5062_v5  ;;  %3541 = vmatprep.subr.mxu1 %v4902_v2 }
  0x58   : > { %3508 = vmatprep.subr.mxu0 %v4902_v2  ;;  %3542 = vmatpush3.msra.mxu1 %v5062_v5 }
  0x59   : > { %3509 = vmatpush3.msra.mxu0 %v5068_v6  ;;  %3543 = vmatprep.subr.mxu1 %v4902_v2 }
  0x5a   : > { %3510 = vmatprep.subr.mxu0 %v4902_v2  ;;  %3544 = vmatpush3.msra.mxu1 %v5068_v6 }
  0x5b   : > { %3511 = vmatpush3.msra.mxu0 %v5074_v7  ;;  %3545 = vmatprep.subr.mxu1 %v4902_v2 }
  0x5c   : > { %3512 = vmatprep.subr.mxu0 %v4902_v2  ;;  %3546 = vmatpush3.msra.mxu1 %v5074_v7 }
  0x5d   : > { %3513 = vmatpush3.msra.mxu0 %v5080_v8  ;;  %3547 = vmatprep.subr.mxu1 %v4902_v2 }
  0x5e   : > { %3514 = vmatprep.subr.mxu0 %v4902_v2  ;;  %3548 = vmatpush3.msra.mxu1 %v5080_v8 }
  0x5f   : > { %3515 = vmatpush3.msra.mxu0 %v5086_v9  ;;  %3549 = vmatprep.subr.mxu1 %v4902_v2 }
  0x60   : > { %3516 = vmatprep.subr.mxu0 %v4902_v2  ;;  %3550 = vmatpush3.msra.mxu1 %v5086_v9 }
  0x61   : > { %3517 = vmatpush3.msra.mxu0 %v5092_v10  ;;  %3551 = vmatprep.subr.mxu1 %v4902_v2 }
  0x62   : > { %3518 = vmatprep.subr.mxu0 %v4902_v2  ;;  %3552 = vmatpush3.msra.mxu1 %v5092_v10 }
  0x63   : > { %3519 = vmatpush3.msra.mxu0 %v5098_v11  ;;  %3553 = vmatprep.subr.mxu1 %v4902_v2 }
  0x64   : > { %3520 = vmatprep.subr.mxu0 %v4902_v2  ;;  %3554 = vmatpush3.msra.mxu1 %v5098_v11 }
  0x65   : > { %3521 = vmatpush3.msra.mxu0 %v5104_v12  ;;  %3555 = vmatprep.subr.mxu1 %v4902_v2 }
  0x66   : > { %3522 = vmatprep.subr.mxu0 %v4902_v2  ;;  %3556 = vmatpush3.msra.mxu1 %v5104_v12 }
  0x67   : > { %3523 = vmatpush3.msra.mxu0 %v5110_v13  ;;  %3557 = vmatprep.subr.mxu1 %v4902_v2 }
  0x68   : > { %3524 = vmatprep.subr.mxu0 %v4902_v2  ;;  %3558 = vmatpush3.msra.mxu1 %v5110_v13 }
  0x69   : > { %3525 = vmatpush3.msra.mxu0 %v5116_v14  ;;  %3559 = vmatprep.subr.mxu1 %v4902_v2 }
  0x6a   : > { %3526 = vmatprep.subr.mxu0 %v4902_v2  ;;  %3560 = vmatpush3.msra.mxu1 %v5116_v14 }
  0x6b   : > { %3527 = vmatpush3.msra.mxu0 %v5122_v15  ;;  %3561 = vmatprep.subr.mxu1 %v4902_v2 }
  0x6c   : > { %3528 = vmatprep.subr.mxu0 %v4902_v2  ;;  %3562 = vmatpush3.msra.mxu1 %v5122_v15 }
  0x6d   : > { %3529 = vmatpush3.msra.mxu0 %v5128_v16  ;;  %3563 = vmatprep.subr.mxu1 %v4902_v2 }
  0x6e   : > { %3530 = vmatprep.subr.mxu0 %v4902_v2  ;;  %3564 = vmatpush3.msra.mxu1 %v5128_v16 }
  0x6f   : > { %3531 = vmatpush3.msra.mxu0 %v5134_v17  ;;  %3565 = vmatprep.subr.mxu1 %v4902_v2 }
  0x70   : > { %3533 = vmatmul.mubr.f32.vlgmr.msra.gmra.mxu0 %v5138_v18  ;;  %3566 = vmatpush3.msra.mxu1 %v5134_v17 }
  0x71   : > { %3567 = vmatprep.mubr.msk.f32.mxu1 %vm4903_vm0, %v4902_v2  ;;  %3570 = vmatprep.subr.mxu0 %v4902_v2 }
  0x72   : > { %3571 = vmatpush3.msra.mxu0 %v5046_v1  ;;  %3602 = vmatprep.mubr.msk.f32.mxu0 %vm4903_vm0, %v4902_v2 }
  0x73   : > { %3572 = vmatprep.subr.mxu0 %v4902_v2  ;;  %3605 = vmatprep.subr.mxu1 %v4902_v2 }
  0x74   : > { %3573 = vmatpush3.msra.mxu0 %v5049_v3 }
  0x75   : > { %3574 = vmatprep.subr.mxu0 %v4902_v2 }
  0x76   : > { %3575 = vmatpush3.msra.mxu0 %v5056_v4 }
  0x77   : > { %3576 = vmatprep.subr.mxu0 %v4902_v2 }
  0x78   : > { %3577 = vmatpush3.msra.mxu0 %v5062_v5 }
  0x79   : > { %3578 = vmatprep.subr.mxu0 %v4902_v2 }
  0x7a   : > { %3579 = vmatpush3.msra.mxu0 %v5068_v6 }
  0x7b   : > { %3580 = vmatprep.subr.mxu0 %v4902_v2 }
  0x7c   : > { %3581 = vmatpush3.msra.mxu0 %v5074_v7 }
  0x7d   : > { %3582 = vmatprep.subr.mxu0 %v4902_v2 }
  0x7e   : > { %3583 = vmatpush3.msra.mxu0 %v5080_v8 }
  0x7f   : > { %3584 = vmatprep.subr.mxu0 %v4902_v2 }
  0x80   : > { %3585 = vmatpush3.msra.mxu0 %v5086_v9 }
  0x81   : > { %3586 = vmatprep.subr.mxu0 %v4902_v2 }
  0x82   : > { %3587 = vmatpush3.msra.mxu0 %v5092_v10 }
  0x83   : > { %3588 = vmatprep.subr.mxu0 %v4902_v2 }
  0x84   : > { %3589 = vmatpush3.msra.mxu0 %v5098_v11 }
  0x85   : > { %3590 = vmatprep.subr.mxu0 %v4902_v2 }
  0x86   : > { %3591 = vmatpush3.msra.mxu0 %v5104_v12 }
  0x87   : > { %3592 = vmatprep.subr.mxu0 %v4902_v2 }
  0x88   : > { %3593 = vmatpush3.msra.mxu0 %v5110_v13 }
  0x89   : > { %3594 = vmatprep.subr.mxu0 %v4902_v2 }
  0x8a   : > { %3595 = vmatpush3.msra.mxu0 %v5116_v14 }
  0x8b   : > { %3596 = vmatprep.subr.mxu0 %v4902_v2 }
  0x8c   : > { %3597 = vmatpush3.msra.mxu0 %v5122_v15 }
  0x8d   : > { %3598 = vmatprep.subr.mxu0 %v4902_v2 }
  0x8e   : > { %3599 = vmatpush3.msra.mxu0 %v5128_v16 }
  0x8f   : > { %3600 = vmatprep.subr.mxu0 %v4902_v2 }
  0x90   : > { %3601 = vmatpush3.msra.mxu0 %v5134_v17 }
  0x91   : > { %3640 = vmatprep.subr.mxu0 %v4902_v2 }
 0x130   : > { %v345_v20 = vpop.f32.mrf.mxu0 }
 0x131   : > { %v346_v21 = vadd.f32 %v5188_v19, %v345_v20 }
 0x132   : > { %v3534_v22 = vpop.f32.mrf.mxu0 }
 0x133   : > { %v349_v23 = vmul.f32 %v346_v21, %v5138_v18 }
 0x135   : > { %350 = vadd.xlane.f32.xlu0 %v349_v23 }
 0x1be   : > { %v351_v24 = vpop.xlane.xlu0 %350 }
 0x1bf   : > { %v352_v25 = vsub.f32 %v346_v21, %v351_v24 }
 0x1c1   : > { %v353_v27 = vmul.f32 %v352_v25, %v5138_v18 }
 0x1c3   : > { %v355_v29 = vmul.f32 %v5196_v26, %v353_v27 }
 0x1c5   : > { %v360_v30 = vmul.f32 %v5199_v28, %v355_v29  ;;  %v357_v39 = vmul.f32 %v5240_v36, %v355_v29 }
 0x1c7   : > { %v361_v31 = vadd.f32 %v360_v30, %v5138_v18  ;;  %v358_v43 = vadd.f32 %v357_v39, %v5138_v18 }
 0x1c9   : > { %3568 = vmatmul.mubr.f32.vlgmr.msra.gmra.mxu1 %v361_v31 }
 0x1ca   : > { %3606 = vmatpush3.msra.mxu1 %v5046_v1  ;;  %3637 = vmatprep.mubr.msk.f32.mxu1 %vm4903_vm0, %v4902_v2 }
 0x1cb   : > { %3607 = vmatprep.subr.mxu1 %v4902_v2 }
 0x1cc   : > { %3608 = vmatpush3.msra.mxu1 %v5049_v3 }
 0x1cd   : > { %3609 = vmatprep.subr.mxu1 %v4902_v2 }
 0x1ce   : > { %3610 = vmatpush3.msra.mxu1 %v5056_v4 }
 0x1cf   : > { %3611 = vmatprep.subr.mxu1 %v4902_v2 }
 0x1d0   : > { %3612 = vmatpush3.msra.mxu1 %v5062_v5 }
 0x1d1   : > { %3613 = vmatprep.subr.mxu1 %v4902_v2 }
 0x1d2   : > { %3614 = vmatpush3.msra.mxu1 %v5068_v6 }
 0x1d3   : > { %3615 = vmatprep.subr.mxu1 %v4902_v2 }
 0x1d4   : > { %3616 = vmatpush3.msra.mxu1 %v5074_v7 }
 0x1d5   : > { %3617 = vmatprep.subr.mxu1 %v4902_v2 }
 0x1d6   : > { %3618 = vmatpush3.msra.mxu1 %v5080_v8 }
 0x1d7   : > { %3619 = vmatprep.subr.mxu1 %v4902_v2 }
 0x1d8   : > { %3620 = vmatpush3.msra.mxu1 %v5086_v9 }
 0x1d9   : > { %3621 = vmatprep.subr.mxu1 %v4902_v2 }
 0x1da   : > { %3622 = vmatpush3.msra.mxu1 %v5092_v10 }
 0x1db   : > { %3623 = vmatprep.subr.mxu1 %v4902_v2 }
 0x1dc   : > { %3624 = vmatpush3.msra.mxu1 %v5098_v11 }
 0x1dd   : > { %3625 = vmatprep.subr.mxu1 %v4902_v2 }
 0x1de   : > { %3626 = vmatpush3.msra.mxu1 %v5104_v12 }
 0x1df   : > { %3627 = vmatprep.subr.mxu1 %v4902_v2 }
 0x1e0   : > { %3628 = vmatpush3.msra.mxu1 %v5110_v13 }
 0x1e1   : > { %3629 = vmatprep.subr.mxu1 %v4902_v2 }
 0x1e2   : > { %3630 = vmatpush3.msra.mxu1 %v5116_v14 }
 0x1e3   : > { %3631 = vmatprep.subr.mxu1 %v4902_v2 }
 0x1e4   : > { %3632 = vmatpush3.msra.mxu1 %v5122_v15 }
 0x1e5   : > { %3633 = vmatprep.subr.mxu1 %v4902_v2 }
 0x1e6   : > { %3634 = vmatpush3.msra.mxu1 %v5128_v16 }
 0x1e7   : > { %3635 = vmatprep.subr.mxu1 %v4902_v2 }
 0x1e8   : > { %3636 = vmatpush3.msra.mxu1 %v5134_v17 }
 0x1e9   : > { %3675 = vmatprep.subr.mxu1 %v4902_v2 }
 0x289   : > { %v428_v32 = vpop.f32.mrf.mxu1 }
 0x28a   : > { %v429_v33 = vadd.f32 %v5188_v19, %v428_v32 }
 0x28b   : > { %v3569_v34 = vpop.f32.mrf.mxu1 }
 0x28c   : > { %v432_v35 = vmul.f32 %v429_v33, %v361_v31 }
 0x28e   : > { %433 = vadd.xlane.f32.xlu0 %v432_v35 }
 0x317   : > { %v434_v37 = vpop.xlane.xlu0 %433 }
 0x318   : > { %v435_v38 = vsub.f32 %v429_v33, %v434_v37 }
 0x31a   : > { %v436_v40 = vmul.f32 %v435_v38, %v361_v31 }
 0x31c   : > { %v437_v42 = vmul.f32 %v436_v40, %v5196_v26 }
 0x31e   : > { %v439_v44 = vmul.f32 %v5244_v41, %v437_v42  ;;  %v441_v45 = vmul.f32 %v437_v42, %v5199_v28 }
 0x320   : > { %v440_v46 = vadd.f32 %v439_v44, %v358_v43  ;;  %v442_v47 = vadd.f32 %v441_v45, %v5138_v18 }
 0x322   : > { %3603 = vmatmul.mubr.f32.vlgmr.msra.gmra.mxu0 %v442_v47 }
 0x323   : > { %3641 = vmatpush3.msra.mxu0 %v5046_v1  ;;  %3672 = vmatprep.mubr.msk.f32.mxu0 %vm4903_vm0, %v4902_v2 }
 0x324   : > { %3642 = vmatprep.subr.mxu0 %v4902_v2 }
 0x325   : > { %3643 = vmatpush3.msra.mxu0 %v5049_v3 }
 0x326   : > { %3644 = vmatprep.subr.mxu0 %v4902_v2 }
 0x327   : > { %3645 = vmatpush3.msra.mxu0 %v5056_v4 }
 0x328   : > { %3646 = vmatprep.subr.mxu0 %v4902_v2 }
 0x329   : > { %3647 = vmatpush3.msra.mxu0 %v5062_v5 }
 0x32a   : > { %3648 = vmatprep.subr.mxu0 %v4902_v2 }
 0x32b   : > { %3649 = vmatpush3.msra.mxu0 %v5068_v6 }
 0x32c   : > { %3650 = vmatprep.subr.mxu0 %v4902_v2 }
 0x32d   : > { %3651 = vmatpush3.msra.mxu0 %v5074_v7 }
 0x32e   : > { %3652 = vmatprep.subr.mxu0 %v4902_v2 }
 0x32f   : > { %3653 = vmatpush3.msra.mxu0 %v5080_v8 }
 0x330   : > { %3654 = vmatprep.subr.mxu0 %v4902_v2 }
 0x331   : > { %3655 = vmatpush3.msra.mxu0 %v5086_v9 }
 0x332   : > { %3656 = vmatprep.subr.mxu0 %v4902_v2 }
 0x333   : > { %3657 = vmatpush3.msra.mxu0 %v5092_v10 }
 0x334   : > { %3658 = vmatprep.subr.mxu0 %v4902_v2 }
 0x335   : > { %3659 = vmatpush3.msra.mxu0 %v5098_v11 }
 0x336   : > { %3660 = vmatprep.subr.mxu0 %v4902_v2 }
 0x337   : > { %3661 = vmatpush3.msra.mxu0 %v5104_v12 }
 0x338   : > { %3662 = vmatprep.subr.mxu0 %v4902_v2 }
 0x339   : > { %3663 = vmatpush3.msra.mxu0 %v5110_v13 }
 0x33a   : > { %3664 = vmatprep.subr.mxu0 %v4902_v2 }
 0x33b   : > { %3665 = vmatpush3.msra.mxu0 %v5116_v14 }
 0x33c   : > { %3666 = vmatprep.subr.mxu0 %v4902_v2 }
 0x33d   : > { %3667 = vmatpush3.msra.mxu0 %v5122_v15 }
 0x33e   : > { %3668 = vmatprep.subr.mxu0 %v4902_v2 }
 0x33f   : > { %3669 = vmatpush3.msra.mxu0 %v5128_v16 }
 0x340   : > { %3670 = vmatprep.subr.mxu0 %v4902_v2 }
 0x341   : > { %3671 = vmatpush3.msra.mxu0 %v5134_v17 }
 0x342   : > { %3710 = vmatprep.subr.mxu0 %v4902_v2 }
 0x3e2   : > { %v509_v48 = vpop.f32.mrf.mxu0 }
 0x3e3   : > { %v510_v49 = vadd.f32 %v5188_v19, %v509_v48 }
 0x3e4   : > { %v3604_v50 = vpop.f32.mrf.mxu0 }
 0x3e5   : > { %v513_v51 = vmul.f32 %v510_v49, %v442_v47 }
 0x3e7   : > { %514 = vadd.xlane.f32.xlu1 %v513_v51 }
 0x470   : > { %v515_v52 = vpop.xlane.xlu1 %514 }
 0x471   : > { %v516_v53 = vsub.f32 %v510_v49, %v515_v52 }
 0x473   : > { %v517_v54 = vmul.f32 %v516_v53, %v442_v47 }
 0x475   : > { %v518_v56 = vmul.f32 %v517_v54, %v5196_v26 }
 0x477   : > { %v519_v57 = vmul.f32 %v518_v56, %v5244_v41  ;;  %v522_v58 = vmul.f32 %v5287_v55, %v518_v56 }
 0x479   : > { %v520_v59 = vadd.f32 %v519_v57, %v440_v46  ;;  %v523_v60 = vadd.f32 %v522_v58, %v5138_v18 }
 0x47b   : > { %3638 = vmatmul.mubr.f32.vlgmr.msra.gmra.mxu1 %v523_v60 }
 0x47c   : > { %3676 = vmatpush3.msra.mxu1 %v5046_v1  ;;  %3707 = vmatprep.mubr.msk.f32.mxu1 %vm4903_vm0, %v4902_v2 }
 0x47d   : > { %3677 = vmatprep.subr.mxu1 %v4902_v2 }
 0x47e   : > { %3678 = vmatpush3.msra.mxu1 %v5049_v3 }
 0x47f   : > { %3679 = vmatprep.subr.mxu1 %v4902_v2 }
 0x480   : > { %3680 = vmatpush3.msra.mxu1 %v5056_v4 }
 0x481   : > { %3681 = vmatprep.subr.mxu1 %v4902_v2 }
 0x482   : > { %3682 = vmatpush3.msra.mxu1 %v5062_v5 }
 0x483   : > { %3683 = vmatprep.subr.mxu1 %v4902_v2 }
 0x484   : > { %3684 = vmatpush3.msra.mxu1 %v5068_v6 }
 0x485   : > { %3685 = vmatprep.subr.mxu1 %v4902_v2 }
 0x486   : > { %3686 = vmatpush3.msra.mxu1 %v5074_v7 }
 0x487   : > { %3687 = vmatprep.subr.mxu1 %v4902_v2 }
 0x488   : > { %3688 = vmatpush3.msra.mxu1 %v5080_v8 }
 0x489   : > { %3689 = vmatprep.subr.mxu1 %v4902_v2 }
 0x48a   : > { %3690 = vmatpush3.msra.mxu1 %v5086_v9 }
 0x48b   : > { %3691 = vmatprep.subr.mxu1 %v4902_v2 }
 0x48c   : > { %3692 = vmatpush3.msra.mxu1 %v5092_v10 }
 0x48d   : > { %3693 = vmatprep.subr.mxu1 %v4902_v2 }
 0x48e   : > { %3694 = vmatpush3.msra.mxu1 %v5098_v11 }
 0x48f   : > { %3695 = vmatprep.subr.mxu1 %v4902_v2 }
 0x490   : > { %3696 = vmatpush3.msra.mxu1 %v5104_v12 }
 0x491   : > { %3697 = vmatprep.subr.mxu1 %v4902_v2 }
 0x492   : > { %3698 = vmatpush3.msra.mxu1 %v5110_v13 }
 0x493   : > { %3699 = vmatprep.subr.mxu1 %v4902_v2 }
 0x494   : > { %3700 = vmatpush3.msra.mxu1 %v5116_v14 }
 0x495   : > { %3701 = vmatprep.subr.mxu1 %v4902_v2 }
 0x496   : > { %3702 = vmatpush3.msra.mxu1 %v5122_v15 }
 0x497   : > { %3703 = vmatprep.subr.mxu1 %v4902_v2 }
 0x498   : > { %3704 = vmatpush3.msra.mxu1 %v5128_v16 }
 0x499   : > { %3705 = vmatprep.subr.mxu1 %v4902_v2 }
 0x49a   : > { %3706 = vmatpush3.msra.mxu1 %v5134_v17 }
 0x49b   : > { %3745 = vmatprep.subr.mxu1 %v4902_v2 }
 0x53b   : > { %v590_v61 = vpop.f32.mrf.mxu1 }
 0x53c   : > { %v591_v62 = vadd.f32 %v5188_v19, %v590_v61 }
 0x53d   : > { %v3639_v63 = vpop.f32.mrf.mxu1 }
 0x53e   : > { %v594_v0 = vmul.f32 %v591_v62, %v523_v60 }
 0x540   : > { %595 = vadd.xlane.f32.xlu1 %v594_v0 }
 0x5c9   : > { %v596_v18 = vpop.xlane.xlu1 %595 }
 0x5ca   : > { %v597_v20 = vsub.f32 %v591_v62, %v596_v18 }
 0x5cc   : > { %v598_v21 = vmul.f32 %v597_v20, %v523_v60 }
 0x5ce   : > { %v599_v22 = vmul.f32 %v598_v21, %v5196_v26 }
 0x5d0   : > { %v600_v23 = vmul.f32 %v599_v22, %v5240_v36 }
 0x5d2   : > { %v5330_v24 = vadd.f32 %v600_v23, %v520_v59 }
 0x5d4   : > { %3673 = vmatmul.mubr.f32.vlgmr.msra.gmra.mxu0 %v5330_v24 }
 0x5d5   : > { %3711 = vmatpush3.msra.mxu0 %v5046_v1  ;;  %3742 = vmatprep.mubr.msk.f32.mxu0 %vm4903_vm0, %v4902_v2 }
 0x5d6   : > { %3712 = vmatprep.subr.mxu0 %v4902_v2 }
 0x5d7   : > { %3713 = vmatpush3.msra.mxu0 %v5049_v3 }
 0x5d8   : > { %3714 = vmatprep.subr.mxu0 %v4902_v2 }
 0x5d9   : > { %3715 = vmatpush3.msra.mxu0 %v5056_v4 }
 0x5da   : > { %3716 = vmatprep.subr.mxu0 %v4902_v2 }
 0x5db   : > { %3717 = vmatpush3.msra.mxu0 %v5062_v5 }
 0x5dc   : > { %3718 = vmatprep.subr.mxu0 %v4902_v2 }
 0x5dd   : > { %3719 = vmatpush3.msra.mxu0 %v5068_v6 }
 0x5de   : > { %3720 = vmatprep.subr.mxu0 %v4902_v2 }
 0x5df   : > { %3721 = vmatpush3.msra.mxu0 %v5074_v7 }
 0x5e0   : > { %3722 = vmatprep.subr.mxu0 %v4902_v2 }
 0x5e1   : > { %3723 = vmatpush3.msra.mxu0 %v5080_v8 }
 0x5e2   : > { %3724 = vmatprep.subr.mxu0 %v4902_v2 }
 0x5e3   : > { %3725 = vmatpush3.msra.mxu0 %v5086_v9 }
 0x5e4   : > { %3726 = vmatprep.subr.mxu0 %v4902_v2 }
 0x5e5   : > { %3727 = vmatpush3.msra.mxu0 %v5092_v10 }
 0x5e6   : > { %3728 = vmatprep.subr.mxu0 %v4902_v2 }
 0x5e7   : > { %3729 = vmatpush3.msra.mxu0 %v5098_v11 }
 0x5e8   : > { %3730 = vmatprep.subr.mxu0 %v4902_v2 }
 0x5e9   : > { %3731 = vmatpush3.msra.mxu0 %v5104_v12 }
 0x5ea   : > { %3732 = vmatprep.subr.mxu0 %v4902_v2 }
 0x5eb   : > { %3733 = vmatpush3.msra.mxu0 %v5110_v13 }
 0x5ec   : > { %3734 = vmatprep.subr.mxu0 %v4902_v2 }
 0x5ed   : > { %3735 = vmatpush3.msra.mxu0 %v5116_v14 }
 0x5ee   : > { %3736 = vmatprep.subr.mxu0 %v4902_v2 }
 0x5ef   : > { %3737 = vmatpush3.msra.mxu0 %v5122_v15 }
 0x5f0   : > { %3738 = vmatprep.subr.mxu0 %v4902_v2 }
 0x5f1   : > { %3739 = vmatpush3.msra.mxu0 %v5128_v16 }
 0x5f2   : > { %3740 = vmatprep.subr.mxu0 %v4902_v2 }
 0x5f3   : > { %3741 = vmatpush3.msra.mxu0 %v5134_v17 }
 0x5f4   : > { %3780 = vmatprep.subr.mxu0 %v4902_v2 }
 0x694   : > { %v668_v25 = vpop.f32.mrf.mxu0 }
 0x695   : > { %v669_v27 = vadd.f32 %v5188_v19, %v668_v25 }
 0x696   : > { %v3674_v29 = vpop.f32.mrf.mxu0 }
 0x697   : > { %v672_v30 = vmul.f32 %v669_v27, %v5330_v24 }
 0x699   : > { %673 = vadd.xlane.f32.xlu0 %v672_v30 }
 0x722   : > { %v674_v31 = vpop.xlane.xlu0 %673 }
 0x723   : > { %v675_v32 = vsub.f32 %v669_v27, %v674_v31 }
 0x725   : > { %v676_v33 = vmul.f32 %v675_v32, %v5330_v24 }
 0x727   : > { %v677_v34 = vmul.f32 %v676_v33, %v5196_v26 }
 0x729   : > { %v680_v35 = vmul.f32 %v677_v34, %v5199_v28  ;;  %v678_v45 = vmul.f32 %v677_v34, %v5240_v36 }
 0x72b   : > { %v681_v37 = vadd.f32 %v680_v35, %v5330_v24  ;;  %v679_v48 = vadd.f32 %v678_v45, %v5330_v24  ;;  %v5588_v45 = vld [vmem:[#allocation8 + $0x60] sm:$0xff] }
 0x72d   : > { %3708 = vmatmul.mubr.f32.vlgmr.msra.gmra.mxu1 %v681_v37 }
 0x72e   : > { %3746 = vmatpush3.msra.mxu1 %v5046_v1  ;;  %3777 = vmatprep.mubr.msk.f32.mxu1 %vm4903_vm0, %v4902_v2 }
 0x72f   : > { %3747 = vmatprep.subr.mxu1 %v4902_v2 }
 0x730   : > { %3748 = vmatpush3.msra.mxu1 %v5049_v3 }
 0x731   : > { %3749 = vmatprep.subr.mxu1 %v4902_v2 }
 0x732   : > { %3750 = vmatpush3.msra.mxu1 %v5056_v4 }
 0x733   : > { %3751 = vmatprep.subr.mxu1 %v4902_v2 }
 0x734   : > { %3752 = vmatpush3.msra.mxu1 %v5062_v5 }
 0x735   : > { %3753 = vmatprep.subr.mxu1 %v4902_v2 }
 0x736   : > { %3754 = vmatpush3.msra.mxu1 %v5068_v6 }
 0x737   : > { %3755 = vmatprep.subr.mxu1 %v4902_v2 }
 0x738   : > { %3756 = vmatpush3.msra.mxu1 %v5074_v7 }
 0x739   : > { %3757 = vmatprep.subr.mxu1 %v4902_v2 }
 0x73a   : > { %3758 = vmatpush3.msra.mxu1 %v5080_v8 }
 0x73b   : > { %3759 = vmatprep.subr.mxu1 %v4902_v2 }
 0x73c   : > { %3760 = vmatpush3.msra.mxu1 %v5086_v9 }
 0x73d   : > { %3761 = vmatprep.subr.mxu1 %v4902_v2 }
 0x73e   : > { %3762 = vmatpush3.msra.mxu1 %v5092_v10 }
 0x73f   : > { %3763 = vmatprep.subr.mxu1 %v4902_v2 }
 0x740   : > { %3764 = vmatpush3.msra.mxu1 %v5098_v11 }
 0x741   : > { %3765 = vmatprep.subr.mxu1 %v4902_v2 }
 0x742   : > { %3766 = vmatpush3.msra.mxu1 %v5104_v12 }
 0x743   : > { %3767 = vmatprep.subr.mxu1 %v4902_v2 }
 0x744   : > { %3768 = vmatpush3.msra.mxu1 %v5110_v13 }
 0x745   : > { %3769 = vmatprep.subr.mxu1 %v4902_v2 }
 0x746   : > { %3770 = vmatpush3.msra.mxu1 %v5116_v14 }
 0x747   : > { %3771 = vmatprep.subr.mxu1 %v4902_v2 }
 0x748   : > { %3772 = vmatpush3.msra.mxu1 %v5122_v15 }
 0x749   : > { %3773 = vmatprep.subr.mxu1 %v4902_v2 }
 0x74a   : > { %3774 = vmatpush3.msra.mxu1 %v5128_v16 }
 0x74b   : > { %3775 = vmatprep.subr.mxu1 %v4902_v2 }
 0x74c   : > { %3776 = vmatpush3.msra.mxu1 %v5134_v17 }
 0x74d   : > { %3815 = vmatprep.subr.mxu1 %v4902_v2 }
 0x7ed   : > { %v748_v38 = vpop.f32.mrf.mxu1 }
 0x7ee   : > { %v749_v39 = vadd.f32 %v5188_v19, %v748_v38 }
 0x7ef   : > { %v3709_v40 = vpop.f32.mrf.mxu1 }
 0x7f0   : > { %v752_v42 = vmul.f32 %v749_v39, %v681_v37  ;;  %v5533_v40 = vld [vmem:[#allocation8 + $0x78] sm:$0xff] }
 0x7f2   : > { %753 = vadd.xlane.f32.xlu1 %v752_v42  ;;  %v5539_v42 = vld [vmem:[#allocation8 + $0x70] sm:$0xff] }
 0x87b   : > { %v754_v43 = vpop.xlane.xlu1 %753 }
 0x87c   : > { %v755_v44 = vsub.f32 %v749_v39, %v754_v43  ;;  %v5543_v43 = vld [vmem:[#allocation8 + $0x68] sm:$0xff] }
 0x87e   : > { %v756_v46 = vmul.f32 %v755_v44, %v681_v37 }
 0x880   : > { %v757_v47 = vmul.f32 %v756_v46, %v5196_v26  ;;  %v5592_v46 = vld [vmem:[#allocation8 + $0x58] sm:$0xff] }
 0x882   : > { %v758_v49 = vmul.f32 %v757_v47, %v5244_v41  ;;  %v760_v50 = vmul.f32 %v757_v47, %v5199_v28  ;;  %v5596_v47 = vld [vmem:[#allocation8 + $0x50] sm:$0xff] }
 0x884   : > { %v759_v51 = vadd.f32 %v758_v49, %v679_v48  ;;  %v761_v52 = vadd.f32 %v760_v50, %v5330_v24  ;;  %v5600_v48 = vld [vmem:[#allocation8 + $0x48] sm:$0xff]  ;;  %v5604_v49 = vld [vmem:[#allocation8 + $0x40] sm:$0xff]  ;;  %v5608_v50 = vld [vmem:[#allocation8 + $0x38] sm:$0xff] }
 0x886   : > { %3743 = vmatmul.mubr.f32.vlgmr.msra.gmra.mxu0 %v761_v52 }
 0x887   : > { %3781 = vmatpush3.msra.mxu0 %v5046_v1  ;;  %3812 = vmatprep.mubr.msk.f32.mxu0 %vm4903_vm0, %v4902_v2 }
 0x888   : > { %3782 = vmatprep.subr.mxu0 %v4902_v2 }
 0x889   : > { %3783 = vmatpush3.msra.mxu0 %v5049_v3 }
 0x88a   : > { %3784 = vmatprep.subr.mxu0 %v4902_v2 }
 0x88b   : > { %3785 = vmatpush3.msra.mxu0 %v5056_v4 }
 0x88c   : > { %3786 = vmatprep.subr.mxu0 %v4902_v2 }
 0x88d   : > { %3787 = vmatpush3.msra.mxu0 %v5062_v5 }
 0x88e   : > { %3788 = vmatprep.subr.mxu0 %v4902_v2 }
 0x88f   : > { %3789 = vmatpush3.msra.mxu0 %v5068_v6 }
 0x890   : > { %3790 = vmatprep.subr.mxu0 %v4902_v2 }
 0x891   : > { %3791 = vmatpush3.msra.mxu0 %v5074_v7 }
 0x892   : > { %3792 = vmatprep.subr.mxu0 %v4902_v2 }
 0x893   : > { %3793 = vmatpush3.msra.mxu0 %v5080_v8 }
 0x894   : > { %3794 = vmatprep.subr.mxu0 %v4902_v2 }
 0x895   : > { %3795 = vmatpush3.msra.mxu0 %v5086_v9 }
 0x896   : > { %3796 = vmatprep.subr.mxu0 %v4902_v2 }
 0x897   : > { %3797 = vmatpush3.msra.mxu0 %v5092_v10 }
 0x898   : > { %3798 = vmatprep.subr.mxu0 %v4902_v2 }
 0x899   : > { %3799 = vmatpush3.msra.mxu0 %v5098_v11 }
 0x89a   : > { %3800 = vmatprep.subr.mxu0 %v4902_v2 }
 0x89b   : > { %3801 = vmatpush3.msra.mxu0 %v5104_v12 }
 0x89c   : > { %3802 = vmatprep.subr.mxu0 %v4902_v2 }
 0x89d   : > { %3803 = vmatpush3.msra.mxu0 %v5110_v13 }
 0x89e   : > { %3804 = vmatprep.subr.mxu0 %v4902_v2 }
 0x89f   : > { %3805 = vmatpush3.msra.mxu0 %v5116_v14 }
 0x8a0   : > { %3806 = vmatprep.subr.mxu0 %v4902_v2 }
 0x8a1   : > { %3807 = vmatpush3.msra.mxu0 %v5122_v15 }
 0x8a2   : > { %3808 = vmatprep.subr.mxu0 %v4902_v2 }
 0x8a3   : > { %3809 = vmatpush3.msra.mxu0 %v5128_v16 }
 0x8a4   : > { %3810 = vmatprep.subr.mxu0 %v4902_v2 }
 0x8a5   : > { %3811 = vmatpush3.msra.mxu0 %v5134_v17 }
 0x8a6   : > { %3850 = vmatprep.subr.mxu0 %v4902_v2 }
 0x946   : > { %v828_v53 = vpop.f32.mrf.mxu0 }
 0x947   : > { %v829_v54 = vadd.f32 %v5188_v19, %v828_v53  ;;  %v5620_v53 = vld [vmem:[#allocation8 + $0x20] sm:$0xff] }
 0x948   : > { %v3744_v56 = vpop.f32.mrf.mxu0 }
 0x949   : > { %v832_v57 = vmul.f32 %v829_v54, %v761_v52  ;;  %v5628_v56 = vld [vmem:[#allocation8 + $0x10] sm:$0xff] }
 0x94b   : > { %833 = vadd.xlane.f32.xlu0 %v832_v57  ;;  %v5632_v57 = vld [vmem:[#allocation8 + $0x8] sm:$0xff] }
 0x9d4   : > { %v834_v58 = vpop.xlane.xlu0 %833 }
 0x9d5   : > { %v835_v59 = vsub.f32 %v829_v54, %v834_v58  ;;  %v5624_v54 = vld [vmem:[#allocation8 + $0x18] sm:$0xff]  ;;  %v5636_v58 = vld [vmem:[#allocation8] sm:$0xff] }
 0x9d7   : > { %v836_v60 = vmul.f32 %v835_v59, %v761_v52  ;;  %v5616_v52 = vld [vmem:[#allocation8 + $0x28] sm:$0xff] }
 0x9d9   : > { %v837_v61 = vmul.f32 %v836_v60, %v5196_v26 }
 0x9db   : > { %v838_v62 = vmul.f32 %v837_v61, %v5244_v41  ;;  %v840_v63 = vmul.f32 %v837_v61, %v5287_v55 }
 0x9dd   : > { %v839_v0 = vadd.f32 %v838_v62, %v759_v51  ;;  %v841_v18 = vadd.f32 %v840_v63, %v5330_v24  ;;  %v5612_v51 = vld [vmem:[#allocation8 + $0x30] sm:$0xff] }
 0x9df   : > { %3778 = vmatmul.mubr.f32.vlgmr.msra.gmra.mxu1 %v841_v18 }
 0x9e0   : > { %3816 = vmatpush3.msra.mxu1 %v5046_v1  ;;  %3847 = vmatprep.mubr.msk.f32.mxu1 %vm4903_vm0, %v4902_v2 }
 0x9e1   : > { %3817 = vmatprep.subr.mxu1 %v4902_v2 }
 0x9e2   : > { %3818 = vmatpush3.msra.mxu1 %v5049_v3 }
 0x9e3   : > { %3819 = vmatprep.subr.mxu1 %v4902_v2 }
 0x9e4   : > { %3820 = vmatpush3.msra.mxu1 %v5056_v4 }
 0x9e5   : > { %3821 = vmatprep.subr.mxu1 %v4902_v2 }
 0x9e6   : > { %3822 = vmatpush3.msra.mxu1 %v5062_v5 }
 0x9e7   : > { %3823 = vmatprep.subr.mxu1 %v4902_v2 }
 0x9e8   : > { %3824 = vmatpush3.msra.mxu1 %v5068_v6 }
 0x9e9   : > { %3825 = vmatprep.subr.mxu1 %v4902_v2 }
 0x9ea   : > { %3826 = vmatpush3.msra.mxu1 %v5074_v7 }
 0x9eb   : > { %3827 = vmatprep.subr.mxu1 %v4902_v2 }
 0x9ec   : > { %3828 = vmatpush3.msra.mxu1 %v5080_v8 }
 0x9ed   : > { %3829 = vmatprep.subr.mxu1 %v4902_v2 }
 0x9ee   : > { %3830 = vmatpush3.msra.mxu1 %v5086_v9 }
 0x9ef   : > { %3831 = vmatprep.subr.mxu1 %v4902_v2 }
 0x9f0   : > { %3832 = vmatpush3.msra.mxu1 %v5092_v10 }
 0x9f1   : > { %3833 = vmatprep.subr.mxu1 %v4902_v2 }
 0x9f2   : > { %3834 = vmatpush3.msra.mxu1 %v5098_v11 }
 0x9f3   : > { %3835 = vmatprep.subr.mxu1 %v4902_v2 }
 0x9f4   : > { %3836 = vmatpush3.msra.mxu1 %v5104_v12 }
 0x9f5   : > { %3837 = vmatprep.subr.mxu1 %v4902_v2 }
 0x9f6   : > { %3838 = vmatpush3.msra.mxu1 %v5110_v13 }
 0x9f7   : > { %3839 = vmatprep.subr.mxu1 %v4902_v2 }
 0x9f8   : > { %3840 = vmatpush3.msra.mxu1 %v5116_v14 }
 0x9f9   : > { %3841 = vmatprep.subr.mxu1 %v4902_v2 }
 0x9fa   : > { %3842 = vmatpush3.msra.mxu1 %v5122_v15 }
 0x9fb   : > { %3843 = vmatprep.subr.mxu1 %v4902_v2 }
 0x9fc   : > { %3844 = vmatpush3.msra.mxu1 %v5128_v16 }
 0x9fd   : > { %3845 = vmatprep.subr.mxu1 %v4902_v2 }
 0x9fe   : > { %3846 = vmatpush3.msra.mxu1 %v5134_v17 }
 0x9ff   : > { %3885 = vmatprep.subr.mxu1 %v4902_v2 }
 0xa9f   : > { %v908_v20 = vpop.f32.mrf.mxu1 }
 0xaa0   : > { %v909_v21 = vadd.f32 %v5188_v19, %v908_v20 }
 0xaa1   : > { %v3779_v22 = vpop.f32.mrf.mxu1 }
 0xaa2   : > { %v912_v23 = vmul.f32 %v909_v21, %v841_v18 }
 0xaa4   : > { %913 = vadd.xlane.f32.xlu1 %v912_v23 }
 0xb2d   : > { %v914_v24 = vpop.xlane.xlu1 %913 }
 0xb2e   : > { %v915_v25 = vsub.f32 %v909_v21, %v914_v24 }
 0xb30   : > { %v916_v27 = vmul.f32 %v915_v25, %v841_v18  ;;  %v5682_v25 = vld [vmem:[%s6501_s3] ss:$0 sm:$0xff] }
 0xb32   : > { %v917_v29 = vmul.f32 %v916_v27, %v5196_v26 }
 0xb34   : > { %v918_v30 = vmul.f32 %v917_v29, %v5240_v36 }
 0xb36   : > { %v5490_v31 = vadd.f32 %v918_v30, %v839_v0 }
 0xb38   : > { %3813 = vmatmul.mubr.f32.vlgmr.msra.gmra.mxu0 %v5490_v31 }
 0xb39   : > { %3851 = vmatpush3.msra.mxu0 %v5046_v1  ;;  %3882 = vmatprep.mubr.msk.f32.mxu0 %vm4903_vm0, %v4902_v2 }
 0xb3a   : > { %3852 = vmatprep.subr.mxu0 %v4902_v2 }
 0xb3b   : > { %3853 = vmatpush3.msra.mxu0 %v5049_v3 }
 0xb3c   : > { %3854 = vmatprep.subr.mxu0 %v4902_v2 }
 0xb3d   : > { %3855 = vmatpush3.msra.mxu0 %v5056_v4 }
 0xb3e   : > { %3856 = vmatprep.subr.mxu0 %v4902_v2 }
 0xb3f   : > { %3857 = vmatpush3.msra.mxu0 %v5062_v5 }
 0xb40   : > { %3858 = vmatprep.subr.mxu0 %v4902_v2 }
 0xb41   : > { %3859 = vmatpush3.msra.mxu0 %v5068_v6 }
 0xb42   : > { %3860 = vmatprep.subr.mxu0 %v4902_v2 }
 0xb43   : > { %3861 = vmatpush3.msra.mxu0 %v5074_v7 }
 0xb44   : > { %3862 = vmatprep.subr.mxu0 %v4902_v2 }
 0xb45   : > { %3863 = vmatpush3.msra.mxu0 %v5080_v8 }
 0xb46   : > { %3864 = vmatprep.subr.mxu0 %v4902_v2 }
 0xb47   : > { %3865 = vmatpush3.msra.mxu0 %v5086_v9 }
 0xb48   : > { %3866 = vmatprep.subr.mxu0 %v4902_v2 }
 0xb49   : > { %3867 = vmatpush3.msra.mxu0 %v5092_v10 }
 0xb4a   : > { %3868 = vmatprep.subr.mxu0 %v4902_v2 }
 0xb4b   : > { %3869 = vmatpush3.msra.mxu0 %v5098_v11 }
 0xb4c   : > { %3870 = vmatprep.subr.mxu0 %v4902_v2 }
 0xb4d   : > { %3871 = vmatpush3.msra.mxu0 %v5104_v12 }
 0xb4e   : > { %3872 = vmatprep.subr.mxu0 %v4902_v2 }
 0xb4f   : > { %3873 = vmatpush3.msra.mxu0 %v5110_v13 }
 0xb50   : > { %3874 = vmatprep.subr.mxu0 %v4902_v2 }
 0xb51   : > { %3875 = vmatpush3.msra.mxu0 %v5116_v14 }
 0xb52   : > { %3876 = vmatprep.subr.mxu0 %v4902_v2 }
 0xb53   : > { %3877 = vmatpush3.msra.mxu0 %v5122_v15 }
 0xb54   : > { %3878 = vmatprep.subr.mxu0 %v4902_v2 }
 0xb55   : > { %3879 = vmatpush3.msra.mxu0 %v5128_v16 }
 0xb56   : > { %3880 = vmatprep.subr.mxu0 %v4902_v2 }
 0xb57   : > { %3881 = vmatpush3.msra.mxu0 %v5134_v17 }
 0xb58   : > { %3920 = vmatprep.subr.mxu0 %v4902_v2 }
 0xbf8   : > { %v986_v1 = vpop.f32.mrf.mxu0 }
 0xbf9   : > { %v987_v3 = vadd.f32 %v5188_v19, %v986_v1 }
 0xbfa   : > { %v3814_v4 = vpop.f32.mrf.mxu0 }
 0xbfb   : > { %v990_v32 = vmul.f32 %v987_v3, %v5490_v31 }
 0xbfd   : > { %991 = vadd.xlane.f32.xlu0 %v990_v32 }
 0xc86   : > { %v992_v33 = vpop.xlane.xlu0 %991 }
 0xc87   : > { %v993_v34 = vsub.f32 %v987_v3, %v992_v33 }
 0xc89   : > { %v994_v35 = vmul.f32 %v993_v34, %v5490_v31 }
 0xc8b   : > { %v995_v37 = vmul.f32 %v994_v35, %v5196_v26 }
 0xc8d   : > { %v998_v38 = vmul.f32 %v995_v37, %v5199_v28 }
 0xc8f   : > { %v999_v39 = vadd.f32 %v998_v38, %v5490_v31 }
 0xc91   : > { %3848 = vmatmul.mubr.f32.vlgmr.msra.gmra.mxu1 %v999_v39 }
 0xc92   : > { %3886 = vmatpush3.msra.mxu1 %v5533_v40  ;;  %3917 = vmatprep.mubr.msk.f32.mxu1 %vm4903_vm0, %v4902_v2 }
 0xc93   : > { %3887 = vmatprep.subr.mxu1 %v4902_v2 }
 0xc94   : > { %3888 = vmatpush3.msra.mxu1 %v5539_v42 }
 0xc95   : > { %3889 = vmatprep.subr.mxu1 %v4902_v2 }
 0xc96   : > { %3890 = vmatpush3.msra.mxu1 %v5543_v43 }
 0xc97   : > { %3891 = vmatprep.subr.mxu1 %v4902_v2 }
 0xc98   : > { %3892 = vmatpush3.msra.mxu1 %v5062_v5 }
 0xc99   : > { %3893 = vmatprep.subr.mxu1 %v4902_v2 }
 0xc9a   : > { %3894 = vmatpush3.msra.mxu1 %v5068_v6 }
 0xc9b   : > { %3895 = vmatprep.subr.mxu1 %v4902_v2 }
 0xc9c   : > { %3896 = vmatpush3.msra.mxu1 %v5074_v7 }
 0xc9d   : > { %3897 = vmatprep.subr.mxu1 %v4902_v2 }
 0xc9e   : > { %3898 = vmatpush3.msra.mxu1 %v5080_v8 }
 0xc9f   : > { %3899 = vmatprep.subr.mxu1 %v4902_v2 }
 0xca0   : > { %3900 = vmatpush3.msra.mxu1 %v5086_v9 }
 0xca1   : > { %3901 = vmatprep.subr.mxu1 %v4902_v2 }
 0xca2   : > { %3902 = vmatpush3.msra.mxu1 %v5092_v10 }
 0xca3   : > { %3903 = vmatprep.subr.mxu1 %v4902_v2 }
 0xca4   : > { %3904 = vmatpush3.msra.mxu1 %v5098_v11  ;;  %v996_v11 = vmul.f32 %v995_v37, %v5240_v36 }
 0xca5   : > { %3905 = vmatprep.subr.mxu1 %v4902_v2 }
 0xca6   : > { %3906 = vmatpush3.msra.mxu1 %v5104_v12 }
 0xca7   : > { %3907 = vmatprep.subr.mxu1 %v4902_v2 }
 0xca8   : > { %3908 = vmatpush3.msra.mxu1 %v5110_v13 }
 0xca9   : > { %3909 = vmatprep.subr.mxu1 %v4902_v2 }
 0xcaa   : > { %3910 = vmatpush3.msra.mxu1 %v5116_v14  ;;  %v997_v14 = vadd.f32 %v996_v11, %v5490_v31 }
 0xcab   : > { %3911 = vmatprep.subr.mxu1 %v4902_v2 }
 0xcac   : > { %3912 = vmatpush3.msra.mxu1 %v5122_v15 }
 0xcad   : > { %3913 = vmatprep.subr.mxu1 %v4902_v2 }
 0xcae   : > { %3914 = vmatpush3.msra.mxu1 %v5128_v16 }
 0xcaf   : > { %3915 = vmatprep.subr.mxu1 %v4902_v2 }
 0xcb0   : > { %3916 = vmatpush3.msra.mxu1 %v5134_v17 }
 0xcb1   : > { %3955 = vmatprep.subr.mxu1 %v4902_v2 }
 0xd51   : > { %v1066_v5 = vpop.f32.mrf.mxu1 }
 0xd52   : > { %v1067_v6 = vadd.f32 %v5188_v19, %v1066_v5 }
 0xd53   : > { %v3849_v7 = vpop.f32.mrf.mxu1 }
 0xd54   : > { %v1070_v8 = vmul.f32 %v1067_v6, %v999_v39 }
 0xd56   : > { %1071 = vadd.xlane.f32.xlu1 %v1070_v8 }
 0xddf   : > { %v1072_v9 = vpop.xlane.xlu1 %1071 }
 0xde0   : > { %v1073_v10 = vsub.f32 %v1067_v6, %v1072_v9 }
 0xde2   : > { %v1074_v12 = vmul.f32 %v1073_v10, %v999_v39 }
 0xde4   : > { %v1075_v13 = vmul.f32 %v1074_v12, %v5196_v26 }
 0xde6   : > { %v1076_v15 = vmul.f32 %v1075_v13, %v5244_v41  ;;  %v1078_v16 = vmul.f32 %v1075_v13, %v5199_v28 }
 0xde8   : > { %v1077_v17 = vadd.f32 %v1076_v15, %v997_v14  ;;  %v1079_v44 = vadd.f32 %v1078_v16, %v5490_v31 }
 0xdea   : > { %3883 = vmatmul.mubr.f32.vlgmr.msra.gmra.mxu0 %v1079_v44 }
 0xdeb   : > { %3921 = vmatpush3.msra.mxu0 %v5533_v40  ;;  %3952 = vmatprep.mubr.msk.f32.mxu0 %vm4903_vm0, %v4902_v2 }
 0xdec   : > { %3922 = vmatprep.subr.mxu0 %v4902_v2 }
 0xded   : > { %3923 = vmatpush3.msra.mxu0 %v5539_v42 }
 0xdee   : > { %3924 = vmatprep.subr.mxu0 %v4902_v2 }
 0xdef   : > { %3925 = vmatpush3.msra.mxu0 %v5543_v43 }
 0xdf0   : > { %3926 = vmatprep.subr.mxu0 %v4902_v2 }
 0xdf1   : > { %3927 = vmatpush3.msra.mxu0 %v5588_v45 }
 0xdf2   : > { %3928 = vmatprep.subr.mxu0 %v4902_v2 }
 0xdf3   : > { %3929 = vmatpush3.msra.mxu0 %v5592_v46 }
 0xdf4   : > { %3930 = vmatprep.subr.mxu0 %v4902_v2 }
 0xdf5   : > { %3931 = vmatpush3.msra.mxu0 %v5596_v47 }
 0xdf6   : > { %3932 = vmatprep.subr.mxu0 %v4902_v2 }
 0xdf7   : > { %3933 = vmatpush3.msra.mxu0 %v5600_v48 }
 0xdf8   : > { %3934 = vmatprep.subr.mxu0 %v4902_v2 }
 0xdf9   : > { %3935 = vmatpush3.msra.mxu0 %v5604_v49 }
 0xdfa   : > { %3936 = vmatprep.subr.mxu0 %v4902_v2 }
 0xdfb   : > { %3937 = vmatpush3.msra.mxu0 %v5608_v50 }
 0xdfc   : > { %3938 = vmatprep.subr.mxu0 %v4902_v2 }
 0xdfd   : > { %3939 = vmatpush3.msra.mxu0 %v5612_v51 }
 0xdfe   : > { %3940 = vmatprep.subr.mxu0 %v4902_v2 }
 0xdff   : > { %3941 = vmatpush3.msra.mxu0 %v5616_v52 }
 0xe00   : > { %3942 = vmatprep.subr.mxu0 %v4902_v2 }
 0xe01   : > { %3943 = vmatpush3.msra.mxu0 %v5620_v53 }
 0xe02   : > { %3944 = vmatprep.subr.mxu0 %v4902_v2 }
 0xe03   : > { %3945 = vmatpush3.msra.mxu0 %v5624_v54 }
 0xe04   : > { %3946 = vmatprep.subr.mxu0 %v4902_v2 }
 0xe05   : > { %3947 = vmatpush3.msra.mxu0 %v5628_v56 }
 0xe06   : > { %3948 = vmatprep.subr.mxu0 %v4902_v2 }
 0xe07   : > { %3949 = vmatpush3.msra.mxu0 %v5632_v57 }
 0xe08   : > { %3950 = vmatprep.subr.mxu0 %v4902_v2 }
 0xe09   : > { %3951 = vmatpush3.msra.mxu0 %v5636_v58 }
 0xe0a   : > { %3990 = vmatprep.subr.mxu0 %v4902_v2 }
 0xeaa   : > { %v1146_v59 = vpop.f32.mrf.mxu0 }
 0xeab   : > { %v1147_v60 = vadd.f32 %v5188_v19, %v1146_v59 }
 0xeac   : > { %v3884_v61 = vpop.f32.mrf.mxu0 }
 0xead   : > { %v1150_v62 = vmul.f32 %v1147_v60, %v1079_v44 }
 0xeaf   : > { %1151 = vadd.xlane.f32.xlu0 %v1150_v62 }
 0xf38   : > { %v1152_v63 = vpop.xlane.xlu0 %1151 }
 0xf39   : > { %v1153_v0 = vsub.f32 %v1147_v60, %v1152_v63 }
 0xf3b   : > { %v1154_v18 = vmul.f32 %v1153_v0, %v1079_v44 }
 0xf3d   : > { %v1155_v20 = vmul.f32 %v1154_v18, %v5196_v26 }
 0xf3f   : > { %v1156_v21 = vmul.f32 %v1155_v20, %v5244_v41  ;;  %v1158_v22 = vmul.f32 %v1155_v20, %v5287_v55 }
 0xf41   : > { %v1157_v23 = vadd.f32 %v1156_v21, %v1077_v17  ;;  %v1159_v24 = vadd.f32 %v1158_v22, %v5490_v31 }
 0xf43   : > { %3918 = vmatmul.mubr.f32.vlgmr.msra.gmra.mxu1 %v1159_v24 }
 0xf44   : > { %3956 = vmatpush3.msra.mxu1 %v5533_v40  ;;  %3987 = vmatprep.mubr.msk.f32.mxu1 %vm4903_vm0, %v4902_v2 }
 0xf45   : > { %3957 = vmatprep.subr.mxu1 %v4902_v2 }
 0xf46   : > { %3958 = vmatpush3.msra.mxu1 %v5539_v42 }
 0xf47   : > { %3959 = vmatprep.subr.mxu1 %v4902_v2 }
 0xf48   : > { %3960 = vmatpush3.msra.mxu1 %v5543_v43 }
 0xf49   : > { %3961 = vmatprep.subr.mxu1 %v4902_v2 }
 0xf4a   : > { %3962 = vmatpush3.msra.mxu1 %v5588_v45 }
 0xf4b   : > { %3963 = vmatprep.subr.mxu1 %v4902_v2 }
 0xf4c   : > { %3964 = vmatpush3.msra.mxu1 %v5592_v46 }
 0xf4d   : > { %3965 = vmatprep.subr.mxu1 %v4902_v2 }
 0xf4e   : > { %3966 = vmatpush3.msra.mxu1 %v5596_v47 }
 0xf4f   : > { %3967 = vmatprep.subr.mxu1 %v4902_v2 }
 0xf50   : > { %3968 = vmatpush3.msra.mxu1 %v5600_v48 }
 0xf51   : > { %3969 = vmatprep.subr.mxu1 %v4902_v2 }
 0xf52   : > { %3970 = vmatpush3.msra.mxu1 %v5604_v49 }
 0xf53   : > { %3971 = vmatprep.subr.mxu1 %v4902_v2 }
 0xf54   : > { %3972 = vmatpush3.msra.mxu1 %v5608_v50 }
 0xf55   : > { %3973 = vmatprep.subr.mxu1 %v4902_v2 }
 0xf56   : > { %3974 = vmatpush3.msra.mxu1 %v5612_v51 }
 0xf57   : > { %3975 = vmatprep.subr.mxu1 %v4902_v2 }
 0xf58   : > { %3976 = vmatpush3.msra.mxu1 %v5616_v52 }
 0xf59   : > { %3977 = vmatprep.subr.mxu1 %v4902_v2 }
 0xf5a   : > { %3978 = vmatpush3.msra.mxu1 %v5620_v53 }
 0xf5b   : > { %3979 = vmatprep.subr.mxu1 %v4902_v2 }
 0xf5c   : > { %3980 = vmatpush3.msra.mxu1 %v5624_v54 }
 0xf5d   : > { %3981 = vmatprep.subr.mxu1 %v4902_v2 }
 0xf5e   : > { %3982 = vmatpush3.msra.mxu1 %v5628_v56 }
 0xf5f   : > { %3983 = vmatprep.subr.mxu1 %v4902_v2 }
 0xf60   : > { %3984 = vmatpush3.msra.mxu1 %v5632_v57 }
 0xf61   : > { %3985 = vmatprep.subr.mxu1 %v4902_v2 }
 0xf62   : > { %3986 = vmatpush3.msra.mxu1 %v5636_v58 }
 0xf63   : > { %4025 = vmatprep.subr.mxu1 %v4902_v2 }
0x1003   : > { %v1226_v19 = vpop.f32.mrf.mxu1 }
0x1004   : > { %v1227_v27 = vadd.f32 %v5682_v25, %v1226_v19 }
0x1005   : > { %v3919_v29 = vpop.f32.mrf.mxu1 }
0x1006   : > { %v1230_v30 = vmul.f32 %v1227_v27, %v1159_v24 }
0x1008   : > { %1231 = vadd.xlane.f32.xlu1 %v1230_v30 }
0x1091   : > { %v1232_v31 = vpop.xlane.xlu1 %1231 }
0x1092   : > { %v1233_v1 = vsub.f32 %v1227_v27, %v1232_v31 }
0x1094   : > { %v1234_v3 = vmul.f32 %v1233_v1, %v1159_v24 }
0x1096   : > { %v1235_v4 = vmul.f32 %v1234_v3, %v5196_v26 }
0x1098   : > { %v1236_v32 = vmul.f32 %v1235_v4, %v5240_v36 }
0x109a   : > { %v5687_v33 = vadd.f32 %v1236_v32, %v1157_v23 }
0x109c   : > { %3953 = vmatmul.mubr.f32.vlgmr.msra.gmra.mxu0 %v5687_v33 }
0x109d   : > { %3991 = vmatpush3.msra.mxu0 %v5533_v40  ;;  %4022 = vmatprep.mubr.msk.f32.mxu0 %vm4903_vm0, %v4902_v2 }
0x109e   : > { %3992 = vmatprep.subr.mxu0 %v4902_v2 }
0x109f   : > { %3993 = vmatpush3.msra.mxu0 %v5539_v42 }
0x10a0   : > { %3994 = vmatprep.subr.mxu0 %v4902_v2 }
0x10a1   : > { %3995 = vmatpush3.msra.mxu0 %v5543_v43 }
0x10a2   : > { %3996 = vmatprep.subr.mxu0 %v4902_v2 }
0x10a3   : > { %3997 = vmatpush3.msra.mxu0 %v5588_v45 }
0x10a4   : > { %3998 = vmatprep.subr.mxu0 %v4902_v2 }
0x10a5   : > { %3999 = vmatpush3.msra.mxu0 %v5592_v46 }
0x10a6   : > { %4000 = vmatprep.subr.mxu0 %v4902_v2 }
0x10a7   : > { %4001 = vmatpush3.msra.mxu0 %v5596_v47 }
0x10a8   : > { %4002 = vmatprep.subr.mxu0 %v4902_v2 }
0x10a9   : > { %4003 = vmatpush3.msra.mxu0 %v5600_v48 }
0x10aa   : > { %4004 = vmatprep.subr.mxu0 %v4902_v2 }
0x10ab   : > { %4005 = vmatpush3.msra.mxu0 %v5604_v49 }
0x10ac   : > { %4006 = vmatprep.subr.mxu0 %v4902_v2 }
0x10ad   : > { %4007 = vmatpush3.msra.mxu0 %v5608_v50 }
0x10ae   : > { %4008 = vmatprep.subr.mxu0 %v4902_v2 }
0x10af   : > { %4009 = vmatpush3.msra.mxu0 %v5612_v51 }
0x10b0   : > { %4010 = vmatprep.subr.mxu0 %v4902_v2 }
0x10b1   : > { %4011 = vmatpush3.msra.mxu0 %v5616_v52 }
0x10b2   : > { %4012 = vmatprep.subr.mxu0 %v4902_v2 }
0x10b3   : > { %4013 = vmatpush3.msra.mxu0 %v5620_v53 }
0x10b4   : > { %4014 = vmatprep.subr.mxu0 %v4902_v2 }
0x10b5   : > { %4015 = vmatpush3.msra.mxu0 %v5624_v54 }
0x10b6   : > { %4016 = vmatprep.subr.mxu0 %v4902_v2 }
0x10b7   : > { %4017 = vmatpush3.msra.mxu0 %v5628_v56 }
0x10b8   : > { %4018 = vmatprep.subr.mxu0 %v4902_v2 }
0x10b9   : > { %4019 = vmatpush3.msra.mxu0 %v5632_v57 }
0x10ba   : > { %4020 = vmatprep.subr.mxu0 %v4902_v2 }
0x10bb   : > { %4021 = vmatpush3.msra.mxu0 %v5636_v58 }
0x10bc   : > { %4060 = vmatprep.subr.mxu0 %v4902_v2 }
0x115c   : > { %v1304_v34 = vpop.f32.mrf.mxu0 }
0x115d   : > { %v1305_v35 = vadd.f32 %v5682_v25, %v1304_v34 }
0x115e   : > { %v3954_v37 = vpop.f32.mrf.mxu0 }
0x115f   : > { %v1308_v38 = vmul.f32 %v1305_v35, %v5687_v33 }
0x1161   : > { %1309 = vadd.xlane.f32.xlu0 %v1308_v38 }
0x11ea   : > { %v1310_v39 = vpop.xlane.xlu0 %1309 }
0x11eb   : > { %v1311_v5 = vsub.f32 %v1305_v35, %v1310_v39 }
0x11ed   : > { %v1312_v6 = vmul.f32 %v1311_v5, %v5687_v33 }
0x11ef   : > { %v1313_v7 = vmul.f32 %v1312_v6, %v5196_v26 }
0x11f1   : > { %v1316_v8 = vmul.f32 %v1313_v7, %v5199_v28  ;;  %v1314_v16 = vmul.f32 %v1313_v7, %v5240_v36 }
0x11f3   : > { %v1317_v9 = vadd.f32 %v1316_v8, %v5687_v33  ;;  %v1315_v59 = vadd.f32 %v1314_v16, %v5687_v33 }
0x11f5   : > { %3988 = vmatmul.mubr.f32.vlgmr.msra.gmra.mxu1 %v1317_v9 }
0x11f6   : > { %4026 = vmatpush3.msra.mxu1 %v5533_v40  ;;  %4057 = vmatprep.mubr.msk.f32.mxu1 %vm4903_vm0, %v4902_v2 }
0x11f7   : > { %4027 = vmatprep.subr.mxu1 %v4902_v2 }
0x11f8   : > { %4028 = vmatpush3.msra.mxu1 %v5539_v42 }
0x11f9   : > { %4029 = vmatprep.subr.mxu1 %v4902_v2 }
0x11fa   : > { %4030 = vmatpush3.msra.mxu1 %v5543_v43 }
0x11fb   : > { %4031 = vmatprep.subr.mxu1 %v4902_v2 }
0x11fc   : > { %4032 = vmatpush3.msra.mxu1 %v5588_v45 }
0x11fd   : > { %4033 = vmatprep.subr.mxu1 %v4902_v2 }
0x11fe   : > { %4034 = vmatpush3.msra.mxu1 %v5592_v46 }
0x11ff   : > { %4035 = vmatprep.subr.mxu1 %v4902_v2 }
0x1200   : > { %4036 = vmatpush3.msra.mxu1 %v5596_v47 }
0x1201   : > { %4037 = vmatprep.subr.mxu1 %v4902_v2 }
0x1202   : > { %4038 = vmatpush3.msra.mxu1 %v5600_v48 }
0x1203   : > { %4039 = vmatprep.subr.mxu1 %v4902_v2 }
0x1204   : > { %4040 = vmatpush3.msra.mxu1 %v5604_v49 }
0x1205   : > { %4041 = vmatprep.subr.mxu1 %v4902_v2 }
0x1206   : > { %4042 = vmatpush3.msra.mxu1 %v5608_v50 }
0x1207   : > { %4043 = vmatprep.subr.mxu1 %v4902_v2 }
0x1208   : > { %4044 = vmatpush3.msra.mxu1 %v5612_v51 }
0x1209   : > { %4045 = vmatprep.subr.mxu1 %v4902_v2 }
0x120a   : > { %4046 = vmatpush3.msra.mxu1 %v5616_v52 }
0x120b   : > { %4047 = vmatprep.subr.mxu1 %v4902_v2 }
0x120c   : > { %4048 = vmatpush3.msra.mxu1 %v5620_v53 }
0x120d   : > { %4049 = vmatprep.subr.mxu1 %v4902_v2 }
0x120e   : > { %4050 = vmatpush3.msra.mxu1 %v5624_v54 }
0x120f   : > { %4051 = vmatprep.subr.mxu1 %v4902_v2 }
0x1210   : > { %4052 = vmatpush3.msra.mxu1 %v5628_v56 }
0x1211   : > { %4053 = vmatprep.subr.mxu1 %v4902_v2 }
0x1212   : > { %4054 = vmatpush3.msra.mxu1 %v5632_v57 }
0x1213   : > { %4055 = vmatprep.subr.mxu1 %v4902_v2 }
0x1214   : > { %4056 = vmatpush3.msra.mxu1 %v5636_v58 }
0x1215   : > { %4095 = vmatprep.subr.mxu1 %v4902_v2 }
0x12b5   : > { %v1384_v10 = vpop.f32.mrf.mxu1 }
0x12b6   : > { %v1385_v11 = vadd.f32 %v5682_v25, %v1384_v10 }
0x12b7   : > { %v3989_v12 = vpop.f32.mrf.mxu1 }
0x12b8   : > { %v1388_v13 = vmul.f32 %v1385_v11, %v1317_v9 }
0x12ba   : > { %1389 = vadd.xlane.f32.xlu1 %v1388_v13 }
0x1343   : > { %v1390_v14 = vpop.xlane.xlu1 %1389 }
0x1344   : > { %v1391_v15 = vsub.f32 %v1385_v11, %v1390_v14 }
0x1346   : > { %v1392_v17 = vmul.f32 %v1391_v15, %v1317_v9 }
0x1348   : > { %v1393_v44 = vmul.f32 %v1392_v17, %v5196_v26 }
0x134a   : > { %v1394_v60 = vmul.f32 %v1393_v44, %v5244_v41  ;;  %v1396_v61 = vmul.f32 %v1393_v44, %v5199_v28 }
0x134c   : > { %v1395_v62 = vadd.f32 %v1394_v60, %v1315_v59  ;;  %v1397_v63 = vadd.f32 %v1396_v61, %v5687_v33 }
0x134e   : > { %4023 = vmatmul.mubr.f32.vlgmr.msra.gmra.mxu0 %v1397_v63 }
0x134f   : > { %4061 = vmatpush3.msra.mxu0 %v5533_v40  ;;  %4092 = vmatprep.mubr.msk.f32.mxu0 %vm4903_vm0, %v4902_v2 }
0x1350   : > { %4062 = vmatprep.subr.mxu0 %v4902_v2 }
0x1351   : > { %4063 = vmatpush3.msra.mxu0 %v5539_v42 }
0x1352   : > { %4064 = vmatprep.subr.mxu0 %v4902_v2 }
0x1353   : > { %4065 = vmatpush3.msra.mxu0 %v5543_v43 }
0x1354   : > { %4066 = vmatprep.subr.mxu0 %v4902_v2 }
0x1355   : > { %4067 = vmatpush3.msra.mxu0 %v5588_v45 }
0x1356   : > { %4068 = vmatprep.subr.mxu0 %v4902_v2 }
0x1357   : > { %4069 = vmatpush3.msra.mxu0 %v5592_v46 }
0x1358   : > { %4070 = vmatprep.subr.mxu0 %v4902_v2 }
0x1359   : > { %4071 = vmatpush3.msra.mxu0 %v5596_v47 }
0x135a   : > { %4072 = vmatprep.subr.mxu0 %v4902_v2 }
0x135b   : > { %4073 = vmatpush3.msra.mxu0 %v5600_v48 }
0x135c   : > { %4074 = vmatprep.subr.mxu0 %v4902_v2 }
0x135d   : > { %4075 = vmatpush3.msra.mxu0 %v5604_v49 }
0x135e   : > { %4076 = vmatprep.subr.mxu0 %v4902_v2 }
0x135f   : > { %4077 = vmatpush3.msra.mxu0 %v5608_v50 }
0x1360   : > { %4078 = vmatprep.subr.mxu0 %v4902_v2 }
0x1361   : > { %4079 = vmatpush3.msra.mxu0 %v5612_v51 }
0x1362   : > { %4080 = vmatprep.subr.mxu0 %v4902_v2 }
0x1363   : > { %4081 = vmatpush3.msra.mxu0 %v5616_v52 }
0x1364   : > { %4082 = vmatprep.subr.mxu0 %v4902_v2 }
0x1365   : > { %4083 = vmatpush3.msra.mxu0 %v5620_v53 }
0x1366   : > { %4084 = vmatprep.subr.mxu0 %v4902_v2 }
0x1367   : > { %4085 = vmatpush3.msra.mxu0 %v5624_v54 }
0x1368   : > { %4086 = vmatprep.subr.mxu0 %v4902_v2 }
0x1369   : > { %4087 = vmatpush3.msra.mxu0 %v5628_v56 }
0x136a   : > { %4088 = vmatprep.subr.mxu0 %v4902_v2 }
0x136b   : > { %4089 = vmatpush3.msra.mxu0 %v5632_v57 }
0x136c   : > { %4090 = vmatprep.subr.mxu0 %v4902_v2 }
0x136d   : > { %4091 = vmatpush3.msra.mxu0 %v5636_v58 }
0x136e   : > { %4130 = vmatprep.subr.mxu0 %v4902_v2 }
0x140e   : > { %v1464_v0 = vpop.f32.mrf.mxu0 }
0x140f   : > { %v1465_v18 = vadd.f32 %v5682_v25, %v1464_v0 }
0x1410   : > { %v4024_v20 = vpop.f32.mrf.mxu0 }
0x1411   : > { %v1468_v21 = vmul.f32 %v1465_v18, %v1397_v63 }
0x1413   : > { %1469 = vadd.xlane.f32.xlu0 %v1468_v21 }
0x149c   : > { %v1470_v22 = vpop.xlane.xlu0 %1469 }
0x149d   : > { %v1471_v23 = vsub.f32 %v1465_v18, %v1470_v22 }
0x149f   : > { %v1472_v24 = vmul.f32 %v1471_v23, %v1397_v63 }
0x14a1   : > { %v1473_v19 = vmul.f32 %v1472_v24, %v5196_v26 }
0x14a3   : > { %v1474_v27 = vmul.f32 %v1473_v19, %v5244_v41  ;;  %v1476_v29 = vmul.f32 %v1473_v19, %v5287_v55 }
0x14a5   : > { %v1475_v30 = vadd.f32 %v1474_v27, %v1395_v62  ;;  %v1477_v31 = vadd.f32 %v1476_v29, %v5687_v33 }
0x14a7   : > { %4058 = vmatmul.mubr.f32.vlgmr.msra.gmra.mxu1 %v1477_v31 }
0x14a8   : > { %4096 = vmatpush3.msra.mxu1 %v5533_v40  ;;  %4127 = vmatprep.mubr.msk.f32.mxu1 %vm4903_vm0, %v4902_v2 }
0x14a9   : > { %4097 = vmatprep.subr.mxu1 %v4902_v2 }
0x14aa   : > { %4098 = vmatpush3.msra.mxu1 %v5539_v42 }
0x14ab   : > { %4099 = vmatprep.subr.mxu1 %v4902_v2 }
0x14ac   : > { %4100 = vmatpush3.msra.mxu1 %v5543_v43 }
0x14ad   : > { %4101 = vmatprep.subr.mxu1 %v4902_v2 }
0x14ae   : > { %4102 = vmatpush3.msra.mxu1 %v5588_v45 }
0x14af   : > { %4103 = vmatprep.subr.mxu1 %v4902_v2 }
0x14b0   : > { %4104 = vmatpush3.msra.mxu1 %v5592_v46 }
0x14b1   : > { %4105 = vmatprep.subr.mxu1 %v4902_v2 }
0x14b2   : > { %4106 = vmatpush3.msra.mxu1 %v5596_v47 }
0x14b3   : > { %4107 = vmatprep.subr.mxu1 %v4902_v2 }
0x14b4   : > { %4108 = vmatpush3.msra.mxu1 %v5600_v48 }
0x14b5   : > { %4109 = vmatprep.subr.mxu1 %v4902_v2 }
0x14b6   : > { %4110 = vmatpush3.msra.mxu1 %v5604_v49 }
0x14b7   : > { %4111 = vmatprep.subr.mxu1 %v4902_v2 }
0x14b8   : > { %4112 = vmatpush3.msra.mxu1 %v5608_v50 }
0x14b9   : > { %4113 = vmatprep.subr.mxu1 %v4902_v2 }
0x14ba   : > { %4114 = vmatpush3.msra.mxu1 %v5612_v51 }
0x14bb   : > { %4115 = vmatprep.subr.mxu1 %v4902_v2 }
0x14bc   : > { %4116 = vmatpush3.msra.mxu1 %v5616_v52 }
0x14bd   : > { %4117 = vmatprep.subr.mxu1 %v4902_v2 }
0x14be   : > { %4118 = vmatpush3.msra.mxu1 %v5620_v53 }
0x14bf   : > { %4119 = vmatprep.subr.mxu1 %v4902_v2 }
0x14c0   : > { %4120 = vmatpush3.msra.mxu1 %v5624_v54 }
0x14c1   : > { %4121 = vmatprep.subr.mxu1 %v4902_v2 }
0x14c2   : > { %4122 = vmatpush3.msra.mxu1 %v5628_v56 }
0x14c3   : > { %4123 = vmatprep.subr.mxu1 %v4902_v2 }
0x14c4   : > { %4124 = vmatpush3.msra.mxu1 %v5632_v57 }
0x14c5   : > { %4125 = vmatprep.subr.mxu1 %v4902_v2 }
0x14c6   : > { %4126 = vmatpush3.msra.mxu1 %v5636_v58 }
0x14c7   : > { %4165 = vmatprep.subr.mxu1 %v4902_v2 }
0x1567   : > { %v1544_v1 = vpop.f32.mrf.mxu1 }
0x1568   : > { %v1545_v3 = vadd.f32 %v5682_v25, %v1544_v1 }
0x1569   : > { %v4059_v4 = vpop.f32.mrf.mxu1 }
0x156a   : > { %v1548_v32 = vmul.f32 %v1545_v3, %v1477_v31 }
0x156c   : > { %1549 = vadd.xlane.f32.xlu1 %v1548_v32 }
0x15f5   : > { %v1550_v33 = vpop.xlane.xlu1 %1549 }
0x15f6   : > { %v1551_v34 = vsub.f32 %v1545_v3, %v1550_v33 }
0x15f8   : > { %v1552_v35 = vmul.f32 %v1551_v34, %v1477_v31 }
0x15fa   : > { %v1553_v37 = vmul.f32 %v1552_v35, %v5196_v26 }
0x15fc   : > { %v1554_v38 = vmul.f32 %v1553_v37, %v5240_v36 }
0x15fe   : > { %v5847_v39 = vadd.f32 %v1554_v38, %v1475_v30 }
0x1600   : > { %4093 = vmatmul.mubr.f32.vlgmr.msra.gmra.mxu0 %v5847_v39 }
0x1601   : > { %4131 = vmatpush3.msra.mxu0 %v5533_v40  ;;  %4162 = vmatprep.mubr.msk.f32.mxu0 %vm4903_vm0, %v4902_v2 }
0x1602   : > { %4132 = vmatprep.subr.mxu0 %v4902_v2 }
0x1603   : > { %4133 = vmatpush3.msra.mxu0 %v5539_v42 }
0x1604   : > { %4134 = vmatprep.subr.mxu0 %v4902_v2 }
0x1605   : > { %4135 = vmatpush3.msra.mxu0 %v5543_v43 }
0x1606   : > { %4136 = vmatprep.subr.mxu0 %v4902_v2 }
0x1607   : > { %4137 = vmatpush3.msra.mxu0 %v5588_v45 }
0x1608   : > { %4138 = vmatprep.subr.mxu0 %v4902_v2 }
0x1609   : > { %4139 = vmatpush3.msra.mxu0 %v5592_v46 }
0x160a   : > { %4140 = vmatprep.subr.mxu0 %v4902_v2 }
0x160b   : > { %4141 = vmatpush3.msra.mxu0 %v5596_v47 }
0x160c   : > { %4142 = vmatprep.subr.mxu0 %v4902_v2 }
0x160d   : > { %4143 = vmatpush3.msra.mxu0 %v5600_v48 }
0x160e   : > { %4144 = vmatprep.subr.mxu0 %v4902_v2 }
0x160f   : > { %4145 = vmatpush3.msra.mxu0 %v5604_v49 }
0x1610   : > { %4146 = vmatprep.subr.mxu0 %v4902_v2 }
0x1611   : > { %4147 = vmatpush3.msra.mxu0 %v5608_v50 }
0x1612   : > { %4148 = vmatprep.subr.mxu0 %v4902_v2 }
0x1613   : > { %4149 = vmatpush3.msra.mxu0 %v5612_v51 }
0x1614   : > { %4150 = vmatprep.subr.mxu0 %v4902_v2 }
0x1615   : > { %4151 = vmatpush3.msra.mxu0 %v5616_v52 }
0x1616   : > { %4152 = vmatprep.subr.mxu0 %v4902_v2 }
0x1617   : > { %4153 = vmatpush3.msra.mxu0 %v5620_v53 }
0x1618   : > { %4154 = vmatprep.subr.mxu0 %v4902_v2 }
0x1619   : > { %4155 = vmatpush3.msra.mxu0 %v5624_v54 }
0x161a   : > { %4156 = vmatprep.subr.mxu0 %v4902_v2 }
0x161b   : > { %4157 = vmatpush3.msra.mxu0 %v5628_v56 }
0x161c   : > { %4158 = vmatprep.subr.mxu0 %v4902_v2 }
0x161d   : > { %4159 = vmatpush3.msra.mxu0 %v5632_v57 }
0x161e   : > { %4160 = vmatprep.subr.mxu0 %v4902_v2 }
0x161f   : > { %4161 = vmatpush3.msra.mxu0 %v5636_v58 }
0x1620   : > { %4200 = vmatprep.subr.mxu0 %v4902_v2 }
0x16c0   : > { %v1622_v5 = vpop.f32.mrf.mxu0 }
0x16c1   : > { %v1623_v6 = vadd.f32 %v5682_v25, %v1622_v5 }
0x16c2   : > { %v4094_v7 = vpop.f32.mrf.mxu0 }
0x16c3   : > { %v1626_v8 = vmul.f32 %v1623_v6, %v5847_v39  ;;  %v6010_v7 = vld [vmem:[#allocation8 + $0x78] sm:$0xff] }
0x16c5   : > { %1627 = vadd.xlane.f32.xlu0 %v1626_v8  ;;  %v6016_v8 = vld [vmem:[#allocation8 + $0x70] sm:$0xff] }
0x174e   : > { %v1628_v9 = vpop.xlane.xlu0 %1627 }
0x174f   : > { %v1629_v10 = vsub.f32 %v1623_v6, %v1628_v9  ;;  %v6020_v9 = vld [vmem:[#allocation8 + $0x68] sm:$0xff] }
0x1751   : > { %v1630_v11 = vmul.f32 %v1629_v10, %v5847_v39 }
0x1753   : > { %v1631_v12 = vmul.f32 %v1630_v11, %v5196_v26 }
0x1755   : > { %v1634_v13 = vmul.f32 %v1631_v12, %v5199_v28  ;;  %v1632_v61 = vmul.f32 %v1631_v12, %v5240_v36 }
0x1757   : > { %v1635_v14 = vadd.f32 %v1634_v13, %v5847_v39  ;;  %v1633_v0 = vadd.f32 %v1632_v61, %v5847_v39  ;;  %v6105_v61 = vld [vmem:[#allocation8 + $0x60] sm:$0xff] }
0x1759   : > { %4128 = vmatmul.mubr.f32.vlgmr.msra.gmra.mxu1 %v1635_v14 }
0x175a   : > { %4166 = vmatpush3.msra.mxu1 %v5533_v40  ;;  %4197 = vmatprep.mubr.msk.f32.mxu1 %vm4903_vm0, %v4902_v2 }
0x175b   : > { %4167 = vmatprep.subr.mxu1 %v4902_v2 }
0x175c   : > { %4168 = vmatpush3.msra.mxu1 %v5539_v42 }
0x175d   : > { %4169 = vmatprep.subr.mxu1 %v4902_v2 }
0x175e   : > { %4170 = vmatpush3.msra.mxu1 %v5543_v43 }
0x175f   : > { %4171 = vmatprep.subr.mxu1 %v4902_v2 }
0x1760   : > { %4172 = vmatpush3.msra.mxu1 %v5588_v45 }
0x1761   : > { %4173 = vmatprep.subr.mxu1 %v4902_v2 }
0x1762   : > { %4174 = vmatpush3.msra.mxu1 %v5592_v46 }
0x1763   : > { %4175 = vmatprep.subr.mxu1 %v4902_v2 }
0x1764   : > { %4176 = vmatpush3.msra.mxu1 %v5596_v47 }
0x1765   : > { %4177 = vmatprep.subr.mxu1 %v4902_v2 }
0x1766   : > { %4178 = vmatpush3.msra.mxu1 %v5600_v48 }
0x1767   : > { %4179 = vmatprep.subr.mxu1 %v4902_v2 }
0x1768   : > { %4180 = vmatpush3.msra.mxu1 %v5604_v49 }
0x1769   : > { %4181 = vmatprep.subr.mxu1 %v4902_v2 }
0x176a   : > { %4182 = vmatpush3.msra.mxu1 %v5608_v50 }
0x176b   : > { %4183 = vmatprep.subr.mxu1 %v4902_v2 }
0x176c   : > { %4184 = vmatpush3.msra.mxu1 %v5612_v51 }
0x176d   : > { %4185 = vmatprep.subr.mxu1 %v4902_v2 }
0x176e   : > { %4186 = vmatpush3.msra.mxu1 %v5616_v52 }
0x176f   : > { %4187 = vmatprep.subr.mxu1 %v4902_v2 }
0x1770   : > { %4188 = vmatpush3.msra.mxu1 %v5620_v53 }
0x1771   : > { %4189 = vmatprep.subr.mxu1 %v4902_v2 }
0x1772   : > { %4190 = vmatpush3.msra.mxu1 %v5624_v54 }
0x1773   : > { %4191 = vmatprep.subr.mxu1 %v4902_v2 }
0x1774   : > { %4192 = vmatpush3.msra.mxu1 %v5628_v56 }
0x1775   : > { %4193 = vmatprep.subr.mxu1 %v4902_v2 }
0x1776   : > { %4194 = vmatpush3.msra.mxu1 %v5632_v57 }
0x1777   : > { %4195 = vmatprep.subr.mxu1 %v4902_v2 }
0x1778   : > { %4196 = vmatpush3.msra.mxu1 %v5636_v58 }
0x1779   : > { %4235 = vmatprep.subr.mxu1 %v4902_v2 }
0x1819   : > { %v1702_v15 = vpop.f32.mrf.mxu1 }
0x181a   : > { %v1703_v16 = vadd.f32 %v5682_v25, %v1702_v15 }
0x181b   : > { %v4129_v17 = vpop.f32.mrf.mxu1 }
0x181c   : > { %v1706_v44 = vmul.f32 %v1703_v16, %v1635_v14 }
0x181e   : > { %1707 = vadd.xlane.f32.xlu1 %v1706_v44 }
0x18a7   : > { %v1708_v59 = vpop.xlane.xlu1 %1707 }
0x18a8   : > { %v1709_v60 = vsub.f32 %v1703_v16, %v1708_v59 }
0x18aa   : > { %v1710_v62 = vmul.f32 %v1709_v60, %v1635_v14 }
0x18ac   : > { %v1711_v63 = vmul.f32 %v1710_v62, %v5196_v26  ;;  %v6109_v62 = vld [vmem:[#allocation8 + $0x58] sm:$0xff] }
0x18ae   : > { %v1712_v18 = vmul.f32 %v1711_v63, %v5244_v41  ;;  %v1714_v20 = vmul.f32 %v1711_v63, %v5199_v28  ;;  %v6113_v63 = vld [vmem:[#allocation8 + $0x50] sm:$0xff] }
0x18b0   : > { %v1713_v21 = vadd.f32 %v1712_v18, %v1633_v0  ;;  %v1715_v22 = vadd.f32 %v1714_v20, %v5847_v39  ;;  %v6117_v0 = vld [vmem:[#allocation8 + $0x48] sm:$0xff]  ;;  %v6121_v18 = vld [vmem:[#allocation8 + $0x40] sm:$0xff]  ;;  %v6125_v20 = vld [vmem:[#allocation8 + $0x38] sm:$0xff] }
0x18b2   : > { %4163 = vmatmul.mubr.f32.vlgmr.msra.gmra.mxu0 %v1715_v22 }
0x18b3   : > { %4201 = vmatpush3.msra.mxu0 %v5533_v40  ;;  %4232 = vmatprep.mubr.msk.f32.mxu0 %vm4903_vm0, %v4902_v2 }
0x18b4   : > { %4202 = vmatprep.subr.mxu0 %v4902_v2 }
0x18b5   : > { %4203 = vmatpush3.msra.mxu0 %v5539_v42 }
0x18b6   : > { %4204 = vmatprep.subr.mxu0 %v4902_v2 }
0x18b7   : > { %4205 = vmatpush3.msra.mxu0 %v5543_v43 }
0x18b8   : > { %4206 = vmatprep.subr.mxu0 %v4902_v2 }
0x18b9   : > { %4207 = vmatpush3.msra.mxu0 %v5588_v45 }
0x18ba   : > { %4208 = vmatprep.subr.mxu0 %v4902_v2 }
0x18bb   : > { %4209 = vmatpush3.msra.mxu0 %v5592_v46 }
0x18bc   : > { %4210 = vmatprep.subr.mxu0 %v4902_v2 }
0x18bd   : > { %4211 = vmatpush3.msra.mxu0 %v5596_v47 }
0x18be   : > { %4212 = vmatprep.subr.mxu0 %v4902_v2 }
0x18bf   : > { %4213 = vmatpush3.msra.mxu0 %v5600_v48 }
0x18c0   : > { %4214 = vmatprep.subr.mxu0 %v4902_v2 }
0x18c1   : > { %4215 = vmatpush3.msra.mxu0 %v5604_v49 }
0x18c2   : > { %4216 = vmatprep.subr.mxu0 %v4902_v2 }
0x18c3   : > { %4217 = vmatpush3.msra.mxu0 %v5608_v50 }
0x18c4   : > { %4218 = vmatprep.subr.mxu0 %v4902_v2 }
0x18c5   : > { %4219 = vmatpush3.msra.mxu0 %v5612_v51 }
0x18c6   : > { %4220 = vmatprep.subr.mxu0 %v4902_v2 }
0x18c7   : > { %4221 = vmatpush3.msra.mxu0 %v5616_v52 }
0x18c8   : > { %4222 = vmatprep.subr.mxu0 %v4902_v2 }
0x18c9   : > { %4223 = vmatpush3.msra.mxu0 %v5620_v53 }
0x18ca   : > { %4224 = vmatprep.subr.mxu0 %v4902_v2 }
0x18cb   : > { %4225 = vmatpush3.msra.mxu0 %v5624_v54 }
0x18cc   : > { %4226 = vmatprep.subr.mxu0 %v4902_v2 }
0x18cd   : > { %4227 = vmatpush3.msra.mxu0 %v5628_v56 }
0x18ce   : > { %4228 = vmatprep.subr.mxu0 %v4902_v2 }
0x18cf   : > { %4229 = vmatpush3.msra.mxu0 %v5632_v57 }
0x18d0   : > { %4230 = vmatprep.subr.mxu0 %v4902_v2 }
0x18d1   : > { %4231 = vmatpush3.msra.mxu0 %v5636_v58 }
0x18d2   : > { %4270 = vmatprep.subr.mxu0 %v4902_v2 }
0x1972   : > { %v1782_v23 = vpop.f32.mrf.mxu0 }
0x1973   : > { %v1783_v24 = vadd.f32 %v5682_v25, %v1782_v23  ;;  %v6137_v23 = vld [vmem:[#allocation8 + $0x20] sm:$0xff] }
0x1974   : > { %v4164_v19 = vpop.f32.mrf.mxu0 }
0x1975   : > { %v1786_v27 = vmul.f32 %v1783_v24, %v1715_v22  ;;  %v6145_v19 = vld [vmem:[#allocation8 + $0x10] sm:$0xff] }
0x1977   : > { %1787 = vadd.xlane.f32.xlu0 %v1786_v27  ;;  %v6149_v27 = vld [vmem:[#allocation8 + $0x8] sm:$0xff] }
0x1a00   : > { %v1788_v29 = vpop.xlane.xlu0 %1787 }
0x1a01   : > { %v1789_v30 = vsub.f32 %v1783_v24, %v1788_v29  ;;  %v6141_v24 = vld [vmem:[#allocation8 + $0x18] sm:$0xff]  ;;  %v6153_v29 = vld [vmem:[#allocation8] sm:$0xff] }
0x1a03   : > { %v1790_v31 = vmul.f32 %v1789_v30, %v1715_v22  ;;  %v6133_v22 = vld [vmem:[#allocation8 + $0x28] sm:$0xff] }
0x1a05   : > { %v1791_v1 = vmul.f32 %v1790_v31, %v5196_v26 }
0x1a07   : > { %v1792_v3 = vmul.f32 %v1791_v1, %v5244_v41  ;;  %v1794_v4 = vmul.f32 %v1791_v1, %v5287_v55 }
0x1a09   : > { %v1793_v32 = vadd.f32 %v1792_v3, %v1713_v21  ;;  %v1795_v33 = vadd.f32 %v1794_v4, %v5847_v39  ;;  %v6129_v21 = vld [vmem:[#allocation8 + $0x30] sm:$0xff] }
0x1a0b   : > { %4198 = vmatmul.mubr.f32.vlgmr.msra.gmra.mxu1 %v1795_v33 }
0x1a0c   : > { %4236 = vmatpush3.msra.mxu1 %v5533_v40  ;;  %4267 = vmatprep.mubr.msk.f32.mxu1 %vm4903_vm0, %v4902_v2 }
0x1a0d   : > { %4237 = vmatprep.subr.mxu1 %v4902_v2 }
0x1a0e   : > { %4238 = vmatpush3.msra.mxu1 %v5539_v42 }
0x1a0f   : > { %4239 = vmatprep.subr.mxu1 %v4902_v2 }
0x1a10   : > { %4240 = vmatpush3.msra.mxu1 %v5543_v43 }
0x1a11   : > { %4241 = vmatprep.subr.mxu1 %v4902_v2 }
0x1a12   : > { %4242 = vmatpush3.msra.mxu1 %v5588_v45 }
0x1a13   : > { %4243 = vmatprep.subr.mxu1 %v4902_v2 }
0x1a14   : > { %4244 = vmatpush3.msra.mxu1 %v5592_v46 }
0x1a15   : > { %4245 = vmatprep.subr.mxu1 %v4902_v2 }
0x1a16   : > { %4246 = vmatpush3.msra.mxu1 %v5596_v47 }
0x1a17   : > { %4247 = vmatprep.subr.mxu1 %v4902_v2 }
0x1a18   : > { %4248 = vmatpush3.msra.mxu1 %v5600_v48 }
0x1a19   : > { %4249 = vmatprep.subr.mxu1 %v4902_v2 }
0x1a1a   : > { %4250 = vmatpush3.msra.mxu1 %v5604_v49 }
0x1a1b   : > { %4251 = vmatprep.subr.mxu1 %v4902_v2 }
0x1a1c   : > { %4252 = vmatpush3.msra.mxu1 %v5608_v50 }
0x1a1d   : > { %4253 = vmatprep.subr.mxu1 %v4902_v2 }
0x1a1e   : > { %4254 = vmatpush3.msra.mxu1 %v5612_v51 }
0x1a1f   : > { %4255 = vmatprep.subr.mxu1 %v4902_v2 }
0x1a20   : > { %4256 = vmatpush3.msra.mxu1 %v5616_v52 }
0x1a21   : > { %4257 = vmatprep.subr.mxu1 %v4902_v2 }
0x1a22   : > { %4258 = vmatpush3.msra.mxu1 %v5620_v53 }
0x1a23   : > { %4259 = vmatprep.subr.mxu1 %v4902_v2 }
0x1a24   : > { %4260 = vmatpush3.msra.mxu1 %v5624_v54 }
0x1a25   : > { %4261 = vmatprep.subr.mxu1 %v4902_v2 }
0x1a26   : > { %4262 = vmatpush3.msra.mxu1 %v5628_v56 }
0x1a27   : > { %4263 = vmatprep.subr.mxu1 %v4902_v2 }
0x1a28   : > { %4264 = vmatpush3.msra.mxu1 %v5632_v57 }
0x1a29   : > { %4265 = vmatprep.subr.mxu1 %v4902_v2 }
0x1a2a   : > { %4266 = vmatpush3.msra.mxu1 %v5636_v58 }
0x1a2b   : > { %4305 = vmatprep.subr.mxu1 %v4902_v2 }
0x1acb   : > { %v1862_v40 = vpop.f32.mrf.mxu1 }
0x1acc   : > { %v1863_v42 = vadd.f32 %v5682_v25, %v1862_v40 }
0x1acd   : > { %v4199_v43 = vpop.f32.mrf.mxu1 }
0x1ace   : > { %v1866_v34 = vmul.f32 %v1863_v42, %v1795_v33 }
0x1ad0   : > { %1867 = vadd.xlane.f32.xlu1 %v1866_v34 }
0x1b59   : > { %v1868_v35 = vpop.xlane.xlu1 %1867 }
0x1b5a   : > { %v1869_v37 = vsub.f32 %v1863_v42, %v1868_v35 }
0x1b5c   : > { %v1870_v38 = vmul.f32 %v1869_v37, %v1795_v33  ;;  %v6199_v37 = vld [vmem:[%s6501_s3] ss:$0 sm:$0xff] }
0x1b5e   : > { %v1871_v39 = vmul.f32 %v1870_v38, %v5196_v26 }
0x1b60   : > { %v1872_v5 = vmul.f32 %v1871_v39, %v5240_v36 }
0x1b62   : > { %v6007_v6 = vadd.f32 %v1872_v5, %v1793_v32 }
0x1b64   : > { %4233 = vmatmul.mubr.f32.vlgmr.msra.gmra.mxu0 %v6007_v6 }
0x1b65   : > { %4271 = vmatpush3.msra.mxu0 %v6010_v7  ;;  %4302 = vmatprep.mubr.msk.f32.mxu0 %vm4903_vm0, %v4902_v2 }
0x1b66   : > { %4272 = vmatprep.subr.mxu0 %v4902_v2 }
0x1b67   : > { %4273 = vmatpush3.msra.mxu0 %v6016_v8 }
0x1b68   : > { %4274 = vmatprep.subr.mxu0 %v4902_v2 }
0x1b69   : > { %4275 = vmatpush3.msra.mxu0 %v6020_v9 }
0x1b6a   : > { %4276 = vmatprep.subr.mxu0 %v4902_v2 }
0x1b6b   : > { %4277 = vmatpush3.msra.mxu0 %v5588_v45 }
0x1b6c   : > { %4278 = vmatprep.subr.mxu0 %v4902_v2 }
0x1b6d   : > { %4279 = vmatpush3.msra.mxu0 %v5592_v46 }
0x1b6e   : > { %4280 = vmatprep.subr.mxu0 %v4902_v2 }
0x1b6f   : > { %4281 = vmatpush3.msra.mxu0 %v5596_v47 }
0x1b70   : > { %4282 = vmatprep.subr.mxu0 %v4902_v2 }
0x1b71   : > { %4283 = vmatpush3.msra.mxu0 %v5600_v48 }
0x1b72   : > { %4284 = vmatprep.subr.mxu0 %v4902_v2 }
0x1b73   : > { %4285 = vmatpush3.msra.mxu0 %v5604_v49 }
0x1b74   : > { %4286 = vmatprep.subr.mxu0 %v4902_v2 }
0x1b75   : > { %4287 = vmatpush3.msra.mxu0 %v5608_v50 }
0x1b76   : > { %4288 = vmatprep.subr.mxu0 %v4902_v2 }
0x1b77   : > { %4289 = vmatpush3.msra.mxu0 %v5612_v51 }
0x1b78   : > { %4290 = vmatprep.subr.mxu0 %v4902_v2 }
0x1b79   : > { %4291 = vmatpush3.msra.mxu0 %v5616_v52 }
0x1b7a   : > { %4292 = vmatprep.subr.mxu0 %v4902_v2 }
0x1b7b   : > { %4293 = vmatpush3.msra.mxu0 %v5620_v53 }
0x1b7c   : > { %4294 = vmatprep.subr.mxu0 %v4902_v2 }
0x1b7d   : > { %4295 = vmatpush3.msra.mxu0 %v5624_v54 }
0x1b7e   : > { %4296 = vmatprep.subr.mxu0 %v4902_v2 }
0x1b7f   : > { %4297 = vmatpush3.msra.mxu0 %v5628_v56 }
0x1b80   : > { %4298 = vmatprep.subr.mxu0 %v4902_v2 }
0x1b81   : > { %4299 = vmatpush3.msra.mxu0 %v5632_v57 }
0x1b82   : > { %4300 = vmatprep.subr.mxu0 %v4902_v2 }
0x1b83   : > { %4301 = vmatpush3.msra.mxu0 %v5636_v58 }
0x1b84   : > { %4340 = vmatprep.subr.mxu0 %v4902_v2 }
0x1c24   : > { %v1940_v10 = vpop.f32.mrf.mxu0 }
0x1c25   : > { %v1941_v11 = vadd.f32 %v5682_v25, %v1940_v10 }
0x1c26   : > { %v4234_v12 = vpop.f32.mrf.mxu0 }
0x1c27   : > { %v1944_v13 = vmul.f32 %v1941_v11, %v6007_v6 }
0x1c29   : > { %1945 = vadd.xlane.f32.xlu0 %v1944_v13 }
0x1cb2   : > { %v1946_v14 = vpop.xlane.xlu0 %1945 }
0x1cb3   : > { %v1947_v15 = vsub.f32 %v1941_v11, %v1946_v14 }
0x1cb5   : > { %v1948_v16 = vmul.f32 %v1947_v15, %v6007_v6 }
0x1cb7   : > { %v1949_v17 = vmul.f32 %v1948_v16, %v5196_v26 }
0x1cb9   : > { %v1952_v44 = vmul.f32 %v1949_v17, %v5199_v28 }
0x1cbb   : > { %v1953_v59 = vadd.f32 %v1952_v44, %v6007_v6 }
0x1cbd   : > { %4268 = vmatmul.mubr.f32.vlgmr.msra.gmra.mxu1 %v1953_v59 }
0x1cbe   : > { %4306 = vmatpush3.msra.mxu1 %v6010_v7  ;;  %4337 = vmatprep.mubr.msk.f32.mxu1 %vm4903_vm0, %v4902_v2 }
0x1cbf   : > { %4307 = vmatprep.subr.mxu1 %v4902_v2 }
0x1cc0   : > { %4308 = vmatpush3.msra.mxu1 %v6016_v8 }
0x1cc1   : > { %4309 = vmatprep.subr.mxu1 %v4902_v2 }
0x1cc2   : > { %4310 = vmatpush3.msra.mxu1 %v6020_v9 }
0x1cc3   : > { %4311 = vmatprep.subr.mxu1 %v4902_v2 }
0x1cc4   : > { %4312 = vmatpush3.msra.mxu1 %v5588_v45 }
0x1cc5   : > { %4313 = vmatprep.subr.mxu1 %v4902_v2 }
0x1cc6   : > { %4314 = vmatpush3.msra.mxu1 %v5592_v46 }
0x1cc7   : > { %4315 = vmatprep.subr.mxu1 %v4902_v2 }
0x1cc8   : > { %4316 = vmatpush3.msra.mxu1 %v5596_v47 }
0x1cc9   : > { %4317 = vmatprep.subr.mxu1 %v4902_v2 }
0x1cca   : > { %4318 = vmatpush3.msra.mxu1 %v5600_v48 }
0x1ccb   : > { %4319 = vmatprep.subr.mxu1 %v4902_v2 }
0x1ccc   : > { %4320 = vmatpush3.msra.mxu1 %v5604_v49 }
0x1ccd   : > { %4321 = vmatprep.subr.mxu1 %v4902_v2 }
0x1cce   : > { %4322 = vmatpush3.msra.mxu1 %v5608_v50 }
0x1ccf   : > { %4323 = vmatprep.subr.mxu1 %v4902_v2 }
0x1cd0   : > { %4324 = vmatpush3.msra.mxu1 %v5612_v51  ;;  %v1950_v51 = vmul.f32 %v1949_v17, %v5240_v36 }
0x1cd1   : > { %4325 = vmatprep.subr.mxu1 %v4902_v2 }
0x1cd2   : > { %4326 = vmatpush3.msra.mxu1 %v5616_v52 }
0x1cd3   : > { %4327 = vmatprep.subr.mxu1 %v4902_v2 }
0x1cd4   : > { %4328 = vmatpush3.msra.mxu1 %v5620_v53 }
0x1cd5   : > { %4329 = vmatprep.subr.mxu1 %v4902_v2 }
0x1cd6   : > { %4330 = vmatpush3.msra.mxu1 %v5624_v54  ;;  %v1951_v54 = vadd.f32 %v1950_v51, %v6007_v6 }
0x1cd7   : > { %4331 = vmatprep.subr.mxu1 %v4902_v2 }
0x1cd8   : > { %4332 = vmatpush3.msra.mxu1 %v5628_v56 }
0x1cd9   : > { %4333 = vmatprep.subr.mxu1 %v4902_v2 }
0x1cda   : > { %4334 = vmatpush3.msra.mxu1 %v5632_v57 }
0x1cdb   : > { %4335 = vmatprep.subr.mxu1 %v4902_v2 }
0x1cdc   : > { %4336 = vmatpush3.msra.mxu1 %v5636_v58 }
0x1cdd   : > { %4375 = vmatprep.subr.mxu1 %v4902_v2 }
0x1d7d   : > { %v2020_v45 = vpop.f32.mrf.mxu1 }
0x1d7e   : > { %v2021_v46 = vadd.f32 %v5682_v25, %v2020_v45 }
0x1d7f   : > { %v4269_v47 = vpop.f32.mrf.mxu1 }
0x1d80   : > { %v2024_v48 = vmul.f32 %v2021_v46, %v1953_v59 }
0x1d82   : > { %2025 = vadd.xlane.f32.xlu1 %v2024_v48 }
0x1e0b   : > { %v2026_v49 = vpop.xlane.xlu1 %2025 }
0x1e0c   : > { %v2027_v50 = vsub.f32 %v2021_v46, %v2026_v49 }
0x1e0e   : > { %v2028_v52 = vmul.f32 %v2027_v50, %v1953_v59 }
0x1e10   : > { %v2029_v53 = vmul.f32 %v2028_v52, %v5196_v26 }
0x1e12   : > { %v2030_v56 = vmul.f32 %v2029_v53, %v5244_v41  ;;  %v2032_v57 = vmul.f32 %v2029_v53, %v5199_v28 }
0x1e14   : > { %v2031_v58 = vadd.f32 %v2030_v56, %v1951_v54  ;;  %v2033_v60 = vadd.f32 %v2032_v57, %v6007_v6 }
0x1e16   : > { %4303 = vmatmul.mubr.f32.vlgmr.msra.gmra.mxu0 %v2033_v60 }
0x1e17   : > { %4341 = vmatpush3.msra.mxu0 %v6010_v7  ;;  %4372 = vmatprep.mubr.msk.f32.mxu0 %vm4903_vm0, %v4902_v2 }
0x1e18   : > { %4342 = vmatprep.subr.mxu0 %v4902_v2 }
0x1e19   : > { %4343 = vmatpush3.msra.mxu0 %v6016_v8 }
0x1e1a   : > { %4344 = vmatprep.subr.mxu0 %v4902_v2 }
0x1e1b   : > { %4345 = vmatpush3.msra.mxu0 %v6020_v9 }
0x1e1c   : > { %4346 = vmatprep.subr.mxu0 %v4902_v2 }
0x1e1d   : > { %4347 = vmatpush3.msra.mxu0 %v6105_v61 }
0x1e1e   : > { %4348 = vmatprep.subr.mxu0 %v4902_v2 }
0x1e1f   : > { %4349 = vmatpush3.msra.mxu0 %v6109_v62 }
0x1e20   : > { %4350 = vmatprep.subr.mxu0 %v4902_v2 }
0x1e21   : > { %4351 = vmatpush3.msra.mxu0 %v6113_v63 }
0x1e22   : > { %4352 = vmatprep.subr.mxu0 %v4902_v2 }
0x1e23   : > { %4353 = vmatpush3.msra.mxu0 %v6117_v0 }
0x1e24   : > { %4354 = vmatprep.subr.mxu0 %v4902_v2 }
0x1e25   : > { %4355 = vmatpush3.msra.mxu0 %v6121_v18 }
0x1e26   : > { %4356 = vmatprep.subr.mxu0 %v4902_v2 }
0x1e27   : > { %4357 = vmatpush3.msra.mxu0 %v6125_v20 }
0x1e28   : > { %4358 = vmatprep.subr.mxu0 %v4902_v2 }
0x1e29   : > { %4359 = vmatpush3.msra.mxu0 %v6129_v21 }
0x1e2a   : > { %4360 = vmatprep.subr.mxu0 %v4902_v2 }
0x1e2b   : > { %4361 = vmatpush3.msra.mxu0 %v6133_v22 }
0x1e2c   : > { %4362 = vmatprep.subr.mxu0 %v4902_v2 }
0x1e2d   : > { %4363 = vmatpush3.msra.mxu0 %v6137_v23 }
0x1e2e   : > { %4364 = vmatprep.subr.mxu0 %v4902_v2 }
0x1e2f   : > { %4365 = vmatpush3.msra.mxu0 %v6141_v24 }
0x1e30   : > { %4366 = vmatprep.subr.mxu0 %v4902_v2 }
0x1e31   : > { %4367 = vmatpush3.msra.mxu0 %v6145_v19 }
0x1e32   : > { %4368 = vmatprep.subr.mxu0 %v4902_v2 }
0x1e33   : > { %4369 = vmatpush3.msra.mxu0 %v6149_v27 }
0x1e34   : > { %4370 = vmatprep.subr.mxu0 %v4902_v2 }
0x1e35   : > { %4371 = vmatpush3.msra.mxu0 %v6153_v29 }
0x1e36   : > { %4410 = vmatprep.subr.mxu0 %v4902_v2 }
0x1ed6   : > { %v2100_v30 = vpop.f32.mrf.mxu0 }
0x1ed7   : > { %v2101_v31 = vadd.f32 %v5682_v25, %v2100_v30 }
0x1ed8   : > { %v4304_v1 = vpop.f32.mrf.mxu0 }
0x1ed9   : > { %v2104_v3 = vmul.f32 %v2101_v31, %v2033_v60 }
0x1edb   : > { %2105 = vadd.xlane.f32.xlu0 %v2104_v3 }
0x1f64   : > { %v2106_v4 = vpop.xlane.xlu0 %2105 }
0x1f65   : > { %v2107_v32 = vsub.f32 %v2101_v31, %v2106_v4 }
0x1f67   : > { %v2108_v33 = vmul.f32 %v2107_v32, %v2033_v60 }
0x1f69   : > { %v2109_v40 = vmul.f32 %v2108_v33, %v5196_v26 }
0x1f6b   : > { %v2110_v42 = vmul.f32 %v2109_v40, %v5244_v41  ;;  %v2112_v43 = vmul.f32 %v2109_v40, %v5287_v55 }
0x1f6d   : > { %v2111_v34 = vadd.f32 %v2110_v42, %v2031_v58  ;;  %v2113_v35 = vadd.f32 %v2112_v43, %v6007_v6 }
0x1f6f   : > { %4338 = vmatmul.mubr.f32.vlgmr.msra.gmra.mxu1 %v2113_v35 }
0x1f70   : > { %4376 = vmatpush3.msra.mxu1 %v6010_v7  ;;  %4407 = vmatprep.mubr.msk.f32.mxu1 %vm4903_vm0, %v4902_v2 }
0x1f71   : > { %4377 = vmatprep.subr.mxu1 %v4902_v2 }
0x1f72   : > { %4378 = vmatpush3.msra.mxu1 %v6016_v8 }
0x1f73   : > { %4379 = vmatprep.subr.mxu1 %v4902_v2 }
0x1f74   : > { %4380 = vmatpush3.msra.mxu1 %v6020_v9 }
0x1f75   : > { %4381 = vmatprep.subr.mxu1 %v4902_v2 }
0x1f76   : > { %4382 = vmatpush3.msra.mxu1 %v6105_v61 }
0x1f77   : > { %4383 = vmatprep.subr.mxu1 %v4902_v2 }
0x1f78   : > { %4384 = vmatpush3.msra.mxu1 %v6109_v62 }
0x1f79   : > { %4385 = vmatprep.subr.mxu1 %v4902_v2 }
0x1f7a   : > { %4386 = vmatpush3.msra.mxu1 %v6113_v63 }
0x1f7b   : > { %4387 = vmatprep.subr.mxu1 %v4902_v2 }
0x1f7c   : > { %4388 = vmatpush3.msra.mxu1 %v6117_v0 }
0x1f7d   : > { %4389 = vmatprep.subr.mxu1 %v4902_v2 }
0x1f7e   : > { %4390 = vmatpush3.msra.mxu1 %v6121_v18 }
0x1f7f   : > { %4391 = vmatprep.subr.mxu1 %v4902_v2 }
0x1f80   : > { %4392 = vmatpush3.msra.mxu1 %v6125_v20 }
0x1f81   : > { %4393 = vmatprep.subr.mxu1 %v4902_v2 }
0x1f82   : > { %4394 = vmatpush3.msra.mxu1 %v6129_v21 }
0x1f83   : > { %4395 = vmatprep.subr.mxu1 %v4902_v2 }
0x1f84   : > { %4396 = vmatpush3.msra.mxu1 %v6133_v22 }
0x1f85   : > { %4397 = vmatprep.subr.mxu1 %v4902_v2 }
0x1f86   : > { %4398 = vmatpush3.msra.mxu1 %v6137_v23 }
0x1f87   : > { %4399 = vmatprep.subr.mxu1 %v4902_v2 }
0x1f88   : > { %4400 = vmatpush3.msra.mxu1 %v6141_v24 }
0x1f89   : > { %4401 = vmatprep.subr.mxu1 %v4902_v2 }
0x1f8a   : > { %4402 = vmatpush3.msra.mxu1 %v6145_v19 }
0x1f8b   : > { %4403 = vmatprep.subr.mxu1 %v4902_v2 }
0x1f8c   : > { %4404 = vmatpush3.msra.mxu1 %v6149_v27 }
0x1f8d   : > { %4405 = vmatprep.subr.mxu1 %v4902_v2 }
0x1f8e   : > { %4406 = vmatpush3.msra.mxu1 %v6153_v29 }
0x1f8f   : > { %4445 = vmatprep.subr.mxu1 %v4902_v2 }
0x202f   : > { %v2180_v25 = vpop.f32.mrf.mxu1 }
0x2030   : > { %v2181_v38 = vadd.f32 %v6199_v37, %v2180_v25 }
0x2031   : > { %v4339_v39 = vpop.f32.mrf.mxu1 }
0x2032   : > { %v2184_v5 = vmul.f32 %v2181_v38, %v2113_v35 }
0x2034   : > { %2185 = vadd.xlane.f32.xlu1 %v2184_v5 }
0x20bd   : > { %v2186_v6 = vpop.xlane.xlu1 %2185 }
0x20be   : > { %v2187_v10 = vsub.f32 %v2181_v38, %v2186_v6 }
0x20c0   : > { %v2188_v11 = vmul.f32 %v2187_v10, %v2113_v35 }
0x20c2   : > { %v2189_v12 = vmul.f32 %v2188_v11, %v5196_v26 }
0x20c4   : > { %v2190_v13 = vmul.f32 %v2189_v12, %v5240_v36 }
0x20c6   : > { %v6204_v14 = vadd.f32 %v2190_v13, %v2111_v34 }
0x20c8   : > { %4373 = vmatmul.mubr.f32.vlgmr.msra.gmra.mxu0 %v6204_v14 }
0x20c9   : > { %4411 = vmatpush3.msra.mxu0 %v6010_v7  ;;  %4442 = vmatprep.mubr.msk.f32.mxu0 %vm4903_vm0, %v4902_v2 }
0x20ca   : > { %4412 = vmatprep.subr.mxu0 %v4902_v2 }
0x20cb   : > { %4413 = vmatpush3.msra.mxu0 %v6016_v8 }
0x20cc   : > { %4414 = vmatprep.subr.mxu0 %v4902_v2 }
0x20cd   : > { %4415 = vmatpush3.msra.mxu0 %v6020_v9 }
0x20ce   : > { %4416 = vmatprep.subr.mxu0 %v4902_v2 }
0x20cf   : > { %4417 = vmatpush3.msra.mxu0 %v6105_v61 }
0x20d0   : > { %4418 = vmatprep.subr.mxu0 %v4902_v2 }
0x20d1   : > { %4419 = vmatpush3.msra.mxu0 %v6109_v62 }
0x20d2   : > { %4420 = vmatprep.subr.mxu0 %v4902_v2 }
0x20d3   : > { %4421 = vmatpush3.msra.mxu0 %v6113_v63 }
0x20d4   : > { %4422 = vmatprep.subr.mxu0 %v4902_v2 }
0x20d5   : > { %4423 = vmatpush3.msra.mxu0 %v6117_v0 }
0x20d6   : > { %4424 = vmatprep.subr.mxu0 %v4902_v2 }
0x20d7   : > { %4425 = vmatpush3.msra.mxu0 %v6121_v18 }
0x20d8   : > { %4426 = vmatprep.subr.mxu0 %v4902_v2 }
0x20d9   : > { %4427 = vmatpush3.msra.mxu0 %v6125_v20 }
0x20da   : > { %4428 = vmatprep.subr.mxu0 %v4902_v2 }
0x20db   : > { %4429 = vmatpush3.msra.mxu0 %v6129_v21 }
0x20dc   : > { %4430 = vmatprep.subr.mxu0 %v4902_v2 }
0x20dd   : > { %4431 = vmatpush3.msra.mxu0 %v6133_v22 }
0x20de   : > { %4432 = vmatprep.subr.mxu0 %v4902_v2 }
0x20df   : > { %4433 = vmatpush3.msra.mxu0 %v6137_v23 }
0x20e0   : > { %4434 = vmatprep.subr.mxu0 %v4902_v2 }
0x20e1   : > { %4435 = vmatpush3.msra.mxu0 %v6141_v24 }
0x20e2   : > { %4436 = vmatprep.subr.mxu0 %v4902_v2 }
0x20e3   : > { %4437 = vmatpush3.msra.mxu0 %v6145_v19 }
0x20e4   : > { %4438 = vmatprep.subr.mxu0 %v4902_v2 }
0x20e5   : > { %4439 = vmatpush3.msra.mxu0 %v6149_v27 }
0x20e6   : > { %4440 = vmatprep.subr.mxu0 %v4902_v2 }
0x20e7   : > { %4441 = vmatpush3.msra.mxu0 %v6153_v29 }
0x20e8   : > { %4480 = vmatprep.subr.mxu0 %v4902_v2 }
0x2188   : > { %v2258_v15 = vpop.f32.mrf.mxu0 }
0x2189   : > { %v2259_v16 = vadd.f32 %v6199_v37, %v2258_v15 }
0x218a   : > { %v4374_v17 = vpop.f32.mrf.mxu0 }
0x218b   : > { %v2262_v44 = vmul.f32 %v2259_v16, %v6204_v14 }
0x218d   : > { %2263 = vadd.xlane.f32.xlu0 %v2262_v44 }
0x2216   : > { %v2264_v59 = vpop.xlane.xlu0 %2263 }
0x2217   : > { %v2265_v45 = vsub.f32 %v2259_v16, %v2264_v59 }
0x2219   : > { %v2266_v46 = vmul.f32 %v2265_v45, %v6204_v14 }
0x221b   : > { %v2267_v47 = vmul.f32 %v2266_v46, %v5196_v26 }
0x221d   : > { %v2270_v48 = vmul.f32 %v2267_v47, %v5199_v28  ;;  %v2268_v57 = vmul.f32 %v2267_v47, %v5240_v36 }
0x221f   : > { %v2271_v49 = vadd.f32 %v2270_v48, %v6204_v14  ;;  %v2269_v30 = vadd.f32 %v2268_v57, %v6204_v14 }
0x2221   : > { %4408 = vmatmul.mubr.f32.vlgmr.msra.gmra.mxu1 %v2271_v49 }
0x2222   : > { %4446 = vmatpush3.msra.mxu1 %v6010_v7  ;;  %4477 = vmatprep.mubr.msk.f32.mxu1 %vm4903_vm0, %v4902_v2 }
0x2223   : > { %4447 = vmatprep.subr.mxu1 %v4902_v2 }
0x2224   : > { %4448 = vmatpush3.msra.mxu1 %v6016_v8 }
0x2225   : > { %4449 = vmatprep.subr.mxu1 %v4902_v2 }
0x2226   : > { %4450 = vmatpush3.msra.mxu1 %v6020_v9 }
0x2227   : > { %4451 = vmatprep.subr.mxu1 %v4902_v2 }
0x2228   : > { %4452 = vmatpush3.msra.mxu1 %v6105_v61 }
0x2229   : > { %4453 = vmatprep.subr.mxu1 %v4902_v2 }
0x222a   : > { %4454 = vmatpush3.msra.mxu1 %v6109_v62 }
0x222b   : > { %4455 = vmatprep.subr.mxu1 %v4902_v2 }
0x222c   : > { %4456 = vmatpush3.msra.mxu1 %v6113_v63 }
0x222d   : > { %4457 = vmatprep.subr.mxu1 %v4902_v2 }
0x222e   : > { %4458 = vmatpush3.msra.mxu1 %v6117_v0 }
0x222f   : > { %4459 = vmatprep.subr.mxu1 %v4902_v2 }
0x2230   : > { %4460 = vmatpush3.msra.mxu1 %v6121_v18 }
0x2231   : > { %4461 = vmatprep.subr.mxu1 %v4902_v2 }
0x2232   : > { %4462 = vmatpush3.msra.mxu1 %v6125_v20 }
0x2233   : > { %4463 = vmatprep.subr.mxu1 %v4902_v2 }
0x2234   : > { %4464 = vmatpush3.msra.mxu1 %v6129_v21 }
0x2235   : > { %4465 = vmatprep.subr.mxu1 %v4902_v2 }
0x2236   : > { %4466 = vmatpush3.msra.mxu1 %v6133_v22 }
0x2237   : > { %4467 = vmatprep.subr.mxu1 %v4902_v2 }
0x2238   : > { %4468 = vmatpush3.msra.mxu1 %v6137_v23 }
0x2239   : > { %4469 = vmatprep.subr.mxu1 %v4902_v2 }
0x223a   : > { %4470 = vmatpush3.msra.mxu1 %v6141_v24 }
0x223b   : > { %4471 = vmatprep.subr.mxu1 %v4902_v2 }
0x223c   : > { %4472 = vmatpush3.msra.mxu1 %v6145_v19 }
0x223d   : > { %4473 = vmatprep.subr.mxu1 %v4902_v2 }
0x223e   : > { %4474 = vmatpush3.msra.mxu1 %v6149_v27 }
0x223f   : > { %4475 = vmatprep.subr.mxu1 %v4902_v2 }
0x2240   : > { %4476 = vmatpush3.msra.mxu1 %v6153_v29 }
0x2241   : > { %4515 = vmatprep.subr.mxu1 %v4902_v2 }
0x22e1   : > { %v2338_v50 = vpop.f32.mrf.mxu1 }
0x22e2   : > { %v2339_v51 = vadd.f32 %v6199_v37, %v2338_v50 }
0x22e3   : > { %v4409_v52 = vpop.f32.mrf.mxu1 }
0x22e4   : > { %v2342_v53 = vmul.f32 %v2339_v51, %v2271_v49 }
0x22e6   : > { %2343 = vadd.xlane.f32.xlu1 %v2342_v53 }
0x236f   : > { %v2344_v54 = vpop.xlane.xlu1 %2343 }
0x2370   : > { %v2345_v56 = vsub.f32 %v2339_v51, %v2344_v54 }
0x2372   : > { %v2346_v58 = vmul.f32 %v2345_v56, %v2271_v49 }
0x2374   : > { %v2347_v60 = vmul.f32 %v2346_v58, %v5196_v26 }
0x2376   : > { %v2348_v31 = vmul.f32 %v2347_v60, %v5244_v41  ;;  %v2350_v1 = vmul.f32 %v2347_v60, %v5199_v28 }
0x2378   : > { %v2349_v3 = vadd.f32 %v2348_v31, %v2269_v30  ;;  %v2351_v4 = vadd.f32 %v2350_v1, %v6204_v14 }
0x237a   : > { %4443 = vmatmul.mubr.f32.vlgmr.msra.gmra.mxu0 %v2351_v4 }
0x237b   : > { %4481 = vmatpush3.msra.mxu0 %v6010_v7  ;;  %4512 = vmatprep.mubr.msk.f32.mxu0 %vm4903_vm0, %v4902_v2 }
0x237c   : > { %4482 = vmatprep.subr.mxu0 %v4902_v2 }
0x237d   : > { %4483 = vmatpush3.msra.mxu0 %v6016_v8 }
0x237e   : > { %4484 = vmatprep.subr.mxu0 %v4902_v2 }
0x237f   : > { %4485 = vmatpush3.msra.mxu0 %v6020_v9 }
0x2380   : > { %4486 = vmatprep.subr.mxu0 %v4902_v2 }
0x2381   : > { %4487 = vmatpush3.msra.mxu0 %v6105_v61 }
0x2382   : > { %4488 = vmatprep.subr.mxu0 %v4902_v2 }
0x2383   : > { %4489 = vmatpush3.msra.mxu0 %v6109_v62 }
0x2384   : > { %4490 = vmatprep.subr.mxu0 %v4902_v2 }
0x2385   : > { %4491 = vmatpush3.msra.mxu0 %v6113_v63 }
0x2386   : > { %4492 = vmatprep.subr.mxu0 %v4902_v2 }
0x2387   : > { %4493 = vmatpush3.msra.mxu0 %v6117_v0 }
0x2388   : > { %4494 = vmatprep.subr.mxu0 %v4902_v2 }
0x2389   : > { %4495 = vmatpush3.msra.mxu0 %v6121_v18 }
0x238a   : > { %4496 = vmatprep.subr.mxu0 %v4902_v2 }
0x238b   : > { %4497 = vmatpush3.msra.mxu0 %v6125_v20 }
0x238c   : > { %4498 = vmatprep.subr.mxu0 %v4902_v2 }
0x238d   : > { %4499 = vmatpush3.msra.mxu0 %v6129_v21 }
0x238e   : > { %4500 = vmatprep.subr.mxu0 %v4902_v2 }
0x238f   : > { %4501 = vmatpush3.msra.mxu0 %v6133_v22 }
0x2390   : > { %4502 = vmatprep.subr.mxu0 %v4902_v2 }
0x2391   : > { %4503 = vmatpush3.msra.mxu0 %v6137_v23 }
0x2392   : > { %4504 = vmatprep.subr.mxu0 %v4902_v2 }
0x2393   : > { %4505 = vmatpush3.msra.mxu0 %v6141_v24 }
0x2394   : > { %4506 = vmatprep.subr.mxu0 %v4902_v2 }
0x2395   : > { %4507 = vmatpush3.msra.mxu0 %v6145_v19 }
0x2396   : > { %4508 = vmatprep.subr.mxu0 %v4902_v2 }
0x2397   : > { %4509 = vmatpush3.msra.mxu0 %v6149_v27 }
0x2398   : > { %4510 = vmatprep.subr.mxu0 %v4902_v2 }
0x2399   : > { %4511 = vmatpush3.msra.mxu0 %v6153_v29 }
0x239a   : > { %4550 = vmatprep.subr.mxu0 %v4902_v2 }
0x243a   : > { %v2418_v32 = vpop.f32.mrf.mxu0 }
0x243b   : > { %v2419_v33 = vadd.f32 %v6199_v37, %v2418_v32 }
0x243c   : > { %v4444_v40 = vpop.f32.mrf.mxu0 }
0x243d   : > { %v2422_v42 = vmul.f32 %v2419_v33, %v2351_v4 }
0x243f   : > { %2423 = vadd.xlane.f32.xlu0 %v2422_v42 }
0x24c8   : > { %v2424_v43 = vpop.xlane.xlu0 %2423 }
0x24c9   : > { %v2425_v34 = vsub.f32 %v2419_v33, %v2424_v43 }
0x24cb   : > { %v2426_v35 = vmul.f32 %v2425_v34, %v2351_v4 }
0x24cd   : > { %v2427_v25 = vmul.f32 %v2426_v35, %v5196_v26 }
0x24cf   : > { %v2428_v38 = vmul.f32 %v2427_v25, %v5244_v41  ;;  %v2430_v39 = vmul.f32 %v2427_v25, %v5287_v55 }
0x24d1   : > { %v2429_v5 = vadd.f32 %v2428_v38, %v2349_v3  ;;  %v2431_v6 = vadd.f32 %v2430_v39, %v6204_v14 }
0x24d3   : > { %4478 = vmatmul.mubr.f32.vlgmr.msra.gmra.mxu1 %v2431_v6 }
0x24d4   : > { %4516 = vmatpush3.msra.mxu1 %v6010_v7  ;;  %4547 = vmatprep.mubr.msk.f32.mxu1 %vm4903_vm0, %v4902_v2 }
0x24d5   : > { %4517 = vmatprep.subr.mxu1 %v4902_v2 }
0x24d6   : > { %4518 = vmatpush3.msra.mxu1 %v6016_v8 }
0x24d7   : > { %4519 = vmatprep.subr.mxu1 %v4902_v2 }
0x24d8   : > { %4520 = vmatpush3.msra.mxu1 %v6020_v9 }
0x24d9   : > { %4521 = vmatprep.subr.mxu1 %v4902_v2 }
0x24da   : > { %4522 = vmatpush3.msra.mxu1 %v6105_v61 }
0x24db   : > { %4523 = vmatprep.subr.mxu1 %v4902_v2 }
0x24dc   : > { %4524 = vmatpush3.msra.mxu1 %v6109_v62 }
0x24dd   : > { %4525 = vmatprep.subr.mxu1 %v4902_v2 }
0x24de   : > { %4526 = vmatpush3.msra.mxu1 %v6113_v63 }
0x24df   : > { %4527 = vmatprep.subr.mxu1 %v4902_v2 }
0x24e0   : > { %4528 = vmatpush3.msra.mxu1 %v6117_v0 }
0x24e1   : > { %4529 = vmatprep.subr.mxu1 %v4902_v2 }
0x24e2   : > { %4530 = vmatpush3.msra.mxu1 %v6121_v18 }
0x24e3   : > { %4531 = vmatprep.subr.mxu1 %v4902_v2 }
0x24e4   : > { %4532 = vmatpush3.msra.mxu1 %v6125_v20 }
0x24e5   : > { %4533 = vmatprep.subr.mxu1 %v4902_v2 }
0x24e6   : > { %4534 = vmatpush3.msra.mxu1 %v6129_v21 }
0x24e7   : > { %4535 = vmatprep.subr.mxu1 %v4902_v2 }
0x24e8   : > { %4536 = vmatpush3.msra.mxu1 %v6133_v22 }
0x24e9   : > { %4537 = vmatprep.subr.mxu1 %v4902_v2 }
0x24ea   : > { %4538 = vmatpush3.msra.mxu1 %v6137_v23 }
0x24eb   : > { %4539 = vmatprep.subr.mxu1 %v4902_v2 }
0x24ec   : > { %4540 = vmatpush3.msra.mxu1 %v6141_v24 }
0x24ed   : > { %4541 = vmatprep.subr.mxu1 %v4902_v2 }
0x24ee   : > { %4542 = vmatpush3.msra.mxu1 %v6145_v19 }
0x24ef   : > { %4543 = vmatprep.subr.mxu1 %v4902_v2 }
0x24f0   : > { %4544 = vmatpush3.msra.mxu1 %v6149_v27 }
0x24f1   : > { %4545 = vmatprep.subr.mxu1 %v4902_v2 }
0x24f2   : > { %4546 = vmatpush3.msra.mxu1 %v6153_v29 }
0x24f3   : > { %4585 = vmatprep.subr.mxu1 %v4902_v2 }
0x2593   : > { %v2498_v10 = vpop.f32.mrf.mxu1 }
0x2594   : > { %v2499_v11 = vadd.f32 %v6199_v37, %v2498_v10 }
0x2595   : > { %v4479_v12 = vpop.f32.mrf.mxu1 }
0x2596   : > { %v2502_v13 = vmul.f32 %v2499_v11, %v2431_v6 }
0x2598   : > { %2503 = vadd.xlane.f32.xlu1 %v2502_v13 }
0x2621   : > { %v2504_v14 = vpop.xlane.xlu1 %2503 }
0x2622   : > { %v2505_v15 = vsub.f32 %v2499_v11, %v2504_v14 }
0x2624   : > { %v2506_v16 = vmul.f32 %v2505_v15, %v2431_v6 }
0x2626   : > { %v2507_v17 = vmul.f32 %v2506_v16, %v5196_v26 }
0x2628   : > { %v2508_v44 = vmul.f32 %v2507_v17, %v5240_v36 }
0x262a   : > { %v6364_v59 = vadd.f32 %v2508_v44, %v2429_v5 }
0x262c   : > { %4513 = vmatmul.mubr.f32.vlgmr.msra.gmra.mxu0 %v6364_v59 }
0x262d   : > { %4551 = vmatpush3.msra.mxu0 %v6010_v7  ;;  %4582 = vmatprep.mubr.msk.f32.mxu0 %vm4903_vm0, %v4902_v2 }
0x262e   : > { %4552 = vmatprep.subr.mxu0 %v4902_v2 }
0x262f   : > { %4553 = vmatpush3.msra.mxu0 %v6016_v8 }
0x2630   : > { %4554 = vmatprep.subr.mxu0 %v4902_v2 }
0x2631   : > { %4555 = vmatpush3.msra.mxu0 %v6020_v9 }
0x2632   : > { %4556 = vmatprep.subr.mxu0 %v4902_v2 }
0x2633   : > { %4557 = vmatpush3.msra.mxu0 %v6105_v61 }
0x2634   : > { %4558 = vmatprep.subr.mxu0 %v4902_v2 }
0x2635   : > { %4559 = vmatpush3.msra.mxu0 %v6109_v62 }
0x2636   : > { %4560 = vmatprep.subr.mxu0 %v4902_v2 }
0x2637   : > { %4561 = vmatpush3.msra.mxu0 %v6113_v63 }
0x2638   : > { %4562 = vmatprep.subr.mxu0 %v4902_v2 }
0x2639   : > { %4563 = vmatpush3.msra.mxu0 %v6117_v0 }
0x263a   : > { %4564 = vmatprep.subr.mxu0 %v4902_v2 }
0x263b   : > { %4565 = vmatpush3.msra.mxu0 %v6121_v18 }
0x263c   : > { %4566 = vmatprep.subr.mxu0 %v4902_v2 }
0x263d   : > { %4567 = vmatpush3.msra.mxu0 %v6125_v20 }
0x263e   : > { %4568 = vmatprep.subr.mxu0 %v4902_v2 }
0x263f   : > { %4569 = vmatpush3.msra.mxu0 %v6129_v21 }
0x2640   : > { %4570 = vmatprep.subr.mxu0 %v4902_v2 }
0x2641   : > { %4571 = vmatpush3.msra.mxu0 %v6133_v22 }
0x2642   : > { %4572 = vmatprep.subr.mxu0 %v4902_v2 }
0x2643   : > { %4573 = vmatpush3.msra.mxu0 %v6137_v23 }
0x2644   : > { %4574 = vmatprep.subr.mxu0 %v4902_v2 }
0x2645   : > { %4575 = vmatpush3.msra.mxu0 %v6141_v24 }
0x2646   : > { %4576 = vmatprep.subr.mxu0 %v4902_v2 }
0x2647   : > { %4577 = vmatpush3.msra.mxu0 %v6145_v19 }
0x2648   : > { %4578 = vmatprep.subr.mxu0 %v4902_v2 }
0x2649   : > { %4579 = vmatpush3.msra.mxu0 %v6149_v27 }
0x264a   : > { %4580 = vmatprep.subr.mxu0 %v4902_v2 }
0x264b   : > { %4581 = vmatpush3.msra.mxu0 %v6153_v29 }
0x26ec   : > { %v2576_v45 = vpop.f32.mrf.mxu0 }
0x26ed   : > { %v2577_v46 = vadd.f32 %v6199_v37, %v2576_v45 }
0x26ee   : > { %v4514_v47 = vpop.f32.mrf.mxu0 }
0x26ef   : > { %v2580_v48 = vmul.f32 %v2577_v46, %v6364_v59 }
0x26f1   : > { %2581 = vadd.xlane.f32.xlu0 %v2580_v48 }
0x277a   : > { %v2582_v49 = vpop.xlane.xlu0 %2581 }
0x277b   : > { %v2583_v50 = vsub.f32 %v2577_v46, %v2582_v49 }
0x277d   : > { %v2584_v51 = vmul.f32 %v2583_v50, %v6364_v59 }
0x277f   : > { %v2585_v52 = vmul.f32 %v2584_v51, %v5196_v26 }
0x2781   : > { %v2588_v53 = vmul.f32 %v2585_v52, %v5199_v28 }
0x2783   : > { %v2589_v54 = vadd.f32 %v2588_v53, %v6364_v59 }
0x2785   : > { %4548 = vmatmul.mubr.f32.vlgmr.msra.gmra.mxu1 %v2589_v54 }
0x2786   : > { %4586 = vmatpush3.msra.mxu1 %v6010_v7  ;;  %4617 = vmatprep.mubr.msk.f32.mxu1 %vm4903_vm0, %v4902_v2 }
0x2787   : > { %4587 = vmatprep.subr.mxu1 %v4902_v2 }
0x2788   : > { %4588 = vmatpush3.msra.mxu1 %v6016_v8 }
0x2789   : > { %4589 = vmatprep.subr.mxu1 %v4902_v2 }
0x278a   : > { %4590 = vmatpush3.msra.mxu1 %v6020_v9 }
0x278b   : > { %4591 = vmatprep.subr.mxu1 %v4902_v2 }
0x278c   : > { %4592 = vmatpush3.msra.mxu1 %v6105_v61 }
0x278d   : > { %4593 = vmatprep.subr.mxu1 %v4902_v2 }
0x278e   : > { %4594 = vmatpush3.msra.mxu1 %v6109_v62 }
0x278f   : > { %4595 = vmatprep.subr.mxu1 %v4902_v2 }
0x2790   : > { %4596 = vmatpush3.msra.mxu1 %v6113_v63 }
0x2791   : > { %4597 = vmatprep.subr.mxu1 %v4902_v2 }
0x2792   : > { %4598 = vmatpush3.msra.mxu1 %v6117_v0  ;;  %v2586_v0 = vmul.f32 %v2585_v52, %v5240_v36 }
0x2793   : > { %4599 = vmatprep.subr.mxu1 %v4902_v2 }
0x2794   : > { %4600 = vmatpush3.msra.mxu1 %v6121_v18 }
0x2795   : > { %4601 = vmatprep.subr.mxu1 %v4902_v2 }
0x2796   : > { %4602 = vmatpush3.msra.mxu1 %v6125_v20 }
0x2797   : > { %4603 = vmatprep.subr.mxu1 %v4902_v2 }
0x2798   : > { %4604 = vmatpush3.msra.mxu1 %v6129_v21  ;;  %v2587_v21 = vadd.f32 %v2586_v0, %v6364_v59 }
0x2799   : > { %4605 = vmatprep.subr.mxu1 %v4902_v2 }
0x279a   : > { %4606 = vmatpush3.msra.mxu1 %v6133_v22 }
0x279b   : > { %4607 = vmatprep.subr.mxu1 %v4902_v2 }
0x279c   : > { %4608 = vmatpush3.msra.mxu1 %v6137_v23 }
0x279d   : > { %4609 = vmatprep.subr.mxu1 %v4902_v2 }
0x279e   : > { %4610 = vmatpush3.msra.mxu1 %v6141_v24 }
0x279f   : > { %4611 = vmatprep.subr.mxu1 %v4902_v2 }
0x27a0   : > { %4612 = vmatpush3.msra.mxu1 %v6145_v19 }
0x27a1   : > { %4613 = vmatprep.subr.mxu1 %v4902_v2 }
0x27a2   : > { %4614 = vmatpush3.msra.mxu1 %v6149_v27 }
0x27a3   : > { %4615 = vmatprep.subr.mxu1 %v4902_v2 }
0x27a4   : > { %4616 = vmatpush3.msra.mxu1 %v6153_v29 }
0x2845   : > { %v2656_v7 = vpop.f32.mrf.mxu1 }
0x2846   : > { %v2657_v8 = vadd.f32 %v6199_v37, %v2656_v7 }
0x2847   : > { %v4549_v9 = vpop.f32.mrf.mxu1 }
0x2848   : > { %v2660_v61 = vmul.f32 %v2657_v8, %v2589_v54 }
0x284a   : > { %2661 = vadd.xlane.f32.xlu1 %v2660_v61 }
0x28d3   : > { %v2662_v62 = vpop.xlane.xlu1 %2661 }
0x28d4   : > { %v2663_v63 = vsub.f32 %v2657_v8, %v2662_v62 }
0x28d6   : > { %v2664_v18 = vmul.f32 %v2663_v63, %v2589_v54 }
0x28d8   : > { %v2665_v20 = vmul.f32 %v2664_v18, %v5196_v26 }
0x28da   : > { %v2666_v22 = vmul.f32 %v2665_v20, %v5244_v41  ;;  %v2668_v2 = vmul.f32 %v2665_v20, %v5199_v28 }
0x28dc   : > { %v2667_v23 = vadd.f32 %v2666_v22, %v2587_v21  ;;  %v2669_v24 = vadd.f32 %v2668_v2, %v6364_v59 }
0x28de   : > { %4583 = vmatmul.mubr.f32.vlgmr.msra.gmra.mxu0 %v2669_v24 }
0x299e   : > { %v2736_v19 = vpop.f32.mrf.mxu0 }
0x299f   : > { %v2737_v27 = vadd.f32 %v6199_v37, %v2736_v19 }
0x29a0   : > { %v4584_v29 = vpop.f32.mrf.mxu0 }
0x29a1   : > { %v2740_v56 = vmul.f32 %v2737_v27, %v2669_v24 }
0x29a3   : > { %2741 = vadd.xlane.f32.xlu0 %v2740_v56 }
0x2a2c   : > { %v2742_v57 = vpop.xlane.xlu0 %2741 }
0x2a2d   : > { %v2743_v58 = vsub.f32 %v2737_v27, %v2742_v57 }
0x2a2f   : > { %v2744_v60 = vmul.f32 %v2743_v58, %v2669_v24 }
0x2a31   : > { %v2745_v30 = vmul.f32 %v2744_v60, %v5196_v26 }
0x2a33   : > { %v2746_v31 = vmul.f32 %v2745_v30, %v5244_v41  ;;  %v2748_v1 = vmul.f32 %v2745_v30, %v5287_v55 }
0x2a35   : > { %v2747_v28 = vadd.f32 %v2746_v31, %v2667_v23  ;;  %v2749_v3 = vadd.f32 %v2748_v1, %v6364_v59 }
0x2a37   : > { %4618 = vmatmul.mubr.f32.vlgmr.msra.gmra.mxu1 %v2749_v3 }
0x2af7   : > { %v2816_v4 = vpop.f32.mrf.mxu1 }
0x2af8   : > { %v2817_v32 = vadd.f32 %v6199_v37, %v2816_v4 }
0x2af9   : > { %v4619_v33 = vpop.f32.mrf.mxu1 }
0x2afa   : > { %v2820_v40 = vmul.f32 %v2817_v32, %v2749_v3 }
0x2afc   : > { %2821 = vadd.xlane.f32.xlu1 %v2820_v40 }
0x2b85   : > { %v2822_v42 = vpop.xlane.xlu1 %2821 }
0x2b86   : > { %v2823_v43 = vsub.f32 %v2817_v32, %v2822_v42 }
0x2b88   : > { %v2824_v34 = vmul.f32 %v2823_v43, %v2749_v3 }
0x2b8a   : > { %v2825_v35 = vmul.f32 %v2824_v34, %v5196_v26 }
0x2b8c   : > { %v2826_v25 = vmul.f32 %v2825_v35, %v5240_v36 }
0x2b8e   : > { %v2827_v41 = vadd.f32 %v2826_v25, %v2747_v28 }
0x2b90   : > { %2828 = vst [vmem:[#allocation2] sm:$0xff] %v2827_v41 }
0x2b91 PF: > { %s2953_s8 = sshll.u32 %s4887_s18, 7  ;;  %s2846_s11 = sshll.u32 %s236_s7, 4  ;;  %s2847_s11 = int_to_ptr.vmem [resolvable:$true] %s2846_s11 }
0x2b92   : > { %s2844_s10 = scalar_lea.hbm %s6502_s4, %s2953_s8  ;;  %s2832_s12 = scalar_lea.sflag [#allocation5], %s234_s29 }
0x2b93   : > { %s4807_s13 = scalar_lea.vmem %s2847_s11, 128  ;;  %p6514_p11 = scmp.ne.s32.totalorder %s6507_s25, 0 }
0x2b94   : > { %p4808_p10 = scmp.ne.s32.totalorder %s2847_s11, %s4807_s13  ;;  %s4904_s14 = smov [#allocation10]  }
0x2b95   : > { %s4811_s21 = sshll.u32 %s4904_s14, 4  ;;  %s4812_s21 = int_to_ptr.vmem [resolvable:$false] %s4811_s21 }
0x2b96   : > { %p4809_p13 = pnand %p4808_p10, %p6514_p11  ;;  %s4813_s18 = scalar_lea.vmem %s4812_s21, 256 }
0x2b97   : > { %v2829_v55 = vld [vmem:[#allocation2] sm:$0xff]  ;;  %p4814_p6 = scmp.lt.s32.totalorder %s2847_s11, %s4812_s21  ;;  %p4815_p7 = scmp.lt.s32.totalorder %s4813_s18, %s4807_s13 }
0x2b98   : > { %2830 = vst [vmem:[%s236_s7] sm:$0xff] %v2829_v55  ;;  %p4810_p0 = pneg %p4809_p13 }
0x2b99   : > { %p4816_p9 = por %p4815_p7, %p4814_p6 }
0x2b9b   : > { %p4817_p12 = pnand %p4816_p9, %p4810_p0 }
0x2b9d   : > { %4820 = shalt.err (!%p4817_p12)
}
0x2b9e   : > { %s4821_s22 = scalar_lea.hbm %s2844_s10, 128  ;;  %s4825_s7 = scalar_lea.hbm %s6502_s4, 640 }
0x2b9f   : > { %p4822_p1 = scmp.ne.s32.totalorder %s2844_s10, %s4821_s22  ;;  %p4826_p5 = scmp.lt.s32.totalorder %s2844_s10, %s6502_s4 }
0x2ba0   : > { %p4827_p4 = scmp.lt.s32.totalorder %s4825_s7, %s4821_s22 }
0x2ba1   : > { %p4823_p2 = pnand %p4822_p1, %p6514_p11 }
0x2ba2   : > { %p4828_p8 = por %p4827_p4, %p4826_p5 }
0x2ba3   : > { %p4824_p3 = pneg %p4823_p2 }
0x2ba5   : > { %p4829_p10 = pnand %p4828_p8, %p4824_p3 }
0x2ba7   : > { %4832 = shalt.err (!%p4829_p10)
}
0x2ba8   : > { %4632 = dma.vmem_to_hbm [thread:$0]  (%p6514_p11), %s2847_s11, 128, %s2844_s10, %s2832_s12  }
0x2ba9 PF: > { %p4654_p13 = scmp.ge.s32.totalorder %s4895_s20, 2  ;;  %s2858_s5 = sand.u32 1, %s4875_s15  }
0x2baa   : > { %p6515_p0 = scmp.ne.s32.totalorder %s6508_s27, 0  ;;  %s2859_s8 = scalar_lea.sflag [#allocation5], %s2858_s5 }
0x2bac   : > { %p4645_p6 = pnand %p4654_p13, %p6515_p0 }
0x2bae   : > { %p4646_p7 = pneg %p4645_p6 }
0x2bb0   : > { %4870 = dma.done.wait (%p4646_p7), %s2859_s8, 128  }
0x2bb1   : > { %4872 = vsyncadd (%p4646_p7), %s2859_s8, 4294967168  ;;  %s20_s20 = sadd.s32 1, %s4895_s20   ;;  %s6516_s15 = smov %s4879_s16 }
0x2bb2   : > { %p17_p9 = scmp.ge.s32.totalorder %s20_s20, 7   ;;  %s6517_s16 = smov %s4883_s17 }
0x2bb3   : > { %s6518_s17 = smov %s4983_s28  ;;  %s6519_s18 = smov %s4891_s19 }
0x2bb4   : > { %s6520_s19 = smov %s6522_s23  ;;  %19 = sbr.rel (!%p17_p9) target bundleno = 7 (0x7), region = 91 }
0x2bb9   :  { %2864 = vsyncpa [#allocation4], 1 }
0x2bba   :  { %2866 = vsyncpa [#allocation4 + $0x1], 1 }
0x2bbb   :  { %2867 = vsyncpa [#allocation9], 1 }
0x2bbc   :  { %2868 = vsyncpa [#allocation5], 1 }
0x2bbd   :  { %2870 = vsyncpa [#allocation5 + $0x1], 1 }
0x2bbe   :  { %2871 = vsyncpa [#allocation6], 1 }
0x2bbf   :  { %2873 = vsyncpa [#allocation6 + $0x1], 1 }

</bundles_post_ra>
